<compile_context>
chip_gen: v5e
topology: v5e:2x2
jax: 0.10.0
libtpu: 0.0.40
codegen_flags: <defaults>
</compile_context>

<pallas_src>
import functools

import jax
import jax.numpy as jnp
from jax.experimental import pallas as pl
from jax.experimental.pallas import tpu as pltpu

H = 50          # real hidden size (nn.LSTM hidden_size)
H_PAD = 128     # lane-aligned padded hidden size


# ----------------------------- Pallas kernel --------------------------------
def lstm_kernel(x_ref, wih0r_ref, b0_ref, whh0_ref, w1s_ref, b1_ref,
                wfc_ref, bfc_ref, out_ref, *, T, BP):
    HP = H_PAD
    f32 = jnp.float32
    bf16 = jnp.bfloat16

    # ---- loop-invariant loads / broadcasts (hoisted) ----
    whh0 = whh0_ref[...]                                    # (HP, 4HP)  bf16
    w1s = w1s_ref[...]                                      # (2HP, 4HP) bf16
    b1 = jnp.broadcast_to(b1_ref[...], (BP, 4 * HP))        # (BP, 4HP)  f32

    # ---- layer-0 input projection for ALL timesteps (off the serial path) ----
    # input_size == 1  =>  outer product, pure VPU.  Bias b0 folded in here.
    # x_ref: (T*BP, 1), wih0r_ref/b0_ref: (1, 4HP)  ->  pre0: (T*BP, 4HP)
    pre0 = x_ref[...] * wih0r_ref[...] + b0_ref[...]

    def activate(gates, c):
        # PyTorch gate order [i, f, g, o], each a 128-lane-aligned block.
        i = jax.nn.sigmoid(gates[:, 0 * HP:1 * HP])
        f = jax.nn.sigmoid(gates[:, 1 * HP:2 * HP])
        g = jnp.tanh(gates[:, 2 * HP:3 * HP])
        o = jax.nn.sigmoid(gates[:, 3 * HP:4 * HP])
        c_new = f * c + i * g
        h_new = o * jnp.tanh(c_new)
        return h_new, c_new

    zeros = jnp.zeros((BP, HP), f32)

    # t = 0 prologue: h0_{-1} = c0_{-1} = 0  =>  layer-0 gates are just pre0[0].
    h0, c0 = activate(pre0[0:BP, :], zeros)
    h1, c1 = zeros, zeros

    # Wavefront over time, fully unrolled (T is small & static): iteration t
    # computes layer-0 at step t and layer-1 at step t-1 — independent work the
    # scheduler can interleave across MXU / EUP / VPU slots.
    for t in range(1, T):
        g0 = pre0[t * BP:(t + 1) * BP, :] + jnp.dot(
            h0.astype(bf16), whh0, preferred_element_type=f32)
        cat = jnp.concatenate([h0, h1], axis=1).astype(bf16)        # (BP, 2HP)
        g1 = jnp.dot(cat, w1s, preferred_element_type=f32) + b1
        h0, c0 = activate(g0, c0)
        h1, c1 = activate(g1, c1)

    # Epilogue: layer-1 at the last timestep.
    cat = jnp.concatenate([h0, h1], axis=1).astype(bf16)
    g1 = jnp.dot(cat, w1s, preferred_element_type=f32) + b1
    h1, c1 = activate(g1, c1)

    # Final fc on the last top-layer hidden state; only column 0 is meaningful.
    out_ref[...] = (jnp.dot(h1, wfc_ref[...], preferred_element_type=f32)
                    + bfc_ref[...])


# --------------------------- packing / wrapper -------------------------------
def pack_gate_weight(W, in_dim, in_pad, dtype=jnp.float32):
    """W: (4H, in_dim) PyTorch layout -> (in_pad, 4*H_PAD), gate blocks lane-aligned."""
    out = jnp.zeros((in_pad, 4 * H_PAD), jnp.float32)
    for g in range(4):
        blk = W[g * H:(g + 1) * H, :].T                     # (in_dim, H)
        out = out.at[:in_dim, g * H_PAD:g * H_PAD + H].set(blk)
    return out.astype(dtype)


def pack_gate_bias(b):
    """b: (4H,) -> (1, 4*H_PAD)."""
    out = jnp.zeros((1, 4 * H_PAD), jnp.float32)
    for g in range(4):
        out = out.at[0, g * H_PAD:g * H_PAD + H].set(b[g * H:(g + 1) * H])
    return out


def lstm_model_forward(x, params):
    """x: (B, T, 1) float32.  Returns (B, 1) = fc(lstm_out[:, -1, :])."""
    B, T, _ = x.shape
    BP = ((B + 7) // 8) * 8                                  # sublane-aligned batch

    # ---- pack / pad parameters ----
    # Layer 0: single input feature -> keep only the one meaningful row of W_ih0.
    wih0_row = pack_gate_weight(params["w_ih0"], 1, 1)               # (1, 4HP) f32
    b0_p = pack_gate_bias(params["b_ih0"] + params["b_hh0"])         # (1, 4HP) f32
    whh0_p = pack_gate_weight(params["w_hh0"], H, H_PAD, jnp.bfloat16)
    # Layer 1: stack [W_ih1; W_hh1] -> one 256-deep contraction per step.
    wih1_p = pack_gate_weight(params["w_ih1"], H, H_PAD)
    whh1_p = pack_gate_weight(params["w_hh1"], H, H_PAD)
    w1s_p = jnp.concatenate([wih1_p, whh1_p], axis=0).astype(jnp.bfloat16)
    b1_p = pack_gate_bias(params["b_ih1"] + params["b_hh1"])         # (1, 4HP) f32

    wfc_p = jnp.zeros((H_PAD, H_PAD), jnp.float32).at[:H, 0].set(params["w_fc"][0, :])
    bfc_p = jnp.zeros((1, H_PAD), jnp.float32).at[0, 0].set(params["b_fc"][0])

    # Time-major scalar input, batch padded to BP rows: (T*BP, 1)
    x_tm = jnp.transpose(x, (1, 0, 2))[:, :, 0]                      # (T, B)
    x_col = jnp.zeros((T, BP), jnp.float32).at[:, :B].set(x_tm)
    x_col = x_col.reshape(T * BP, 1)

    kernel = functools.partial(lstm_kernel, T=T, BP=BP)
    out_padded = pl.pallas_call(
        kernel,
        out_shape=jax.ShapeDtypeStruct((BP, H_PAD), jnp.float32),
        in_specs=[pl.BlockSpec(memory_space=pltpu.MemorySpace.VMEM)] * 8,
        out_specs=pl.BlockSpec(memory_space=pltpu.MemorySpace.VMEM),
    )(x_col, wih0_row, b0_p, whh0_p, w1s_p, b1_p, wfc_p, bfc_p)

    return out_padded[:B, :1]                                        # (B, 1)


# --------------------------- pure-JAX reference ------------------------------
def lstm_model_ref(x, params):
    B, T, _ = x.shape

    def cell(x_t, h, c, Wih, Whh, bih, bhh):
        gates = x_t @ Wih.T + h @ Whh.T + bih + bhh
        i, f, g, o = jnp.split(gates, 4, axis=-1)
        i, f, o = jax.nn.sigmoid(i), jax.nn.sigmoid(f), jax.nn.sigmoid(o)
        g = jnp.tanh(g)
        c = f * c + i * g
        h = o * jnp.tanh(c)
        return h, c

    h0 = c0 = h1 = c1 = jnp.zeros((B, H), jnp.float32)
    for t in range(T):
        h0, c0 = cell(x[:, t, :], h0, c0, params["w_ih0"], params["w_hh0"],
                      params["b_ih0"], params["b_hh0"])
        h1, c1 = cell(h0, h1, c1, params["w_ih1"], params["w_hh1"],
                      params["b_ih1"], params["b_hh1"])
    return h1 @ params["w_fc"].T + params["b_fc"]


# ---------------------------------- main -------------------------------------
if __name__ == "__main__":
    key = jax.random.PRNGKey(0)
    B, T = 2, 8
    scale = 1.0 / jnp.sqrt(jnp.float32(H))                   # PyTorch default init range

    ks = jax.random.split(key, 12)
    uni = lambda k, shape: jax.random.uniform(k, shape, jnp.float32, -scale, scale)

    params = {
        "w_ih0": uni(ks[0], (4 * H, 1)),
        "w_hh0": uni(ks[1], (4 * H, H)),
        "b_ih0": uni(ks[2], (4 * H,)),
        "b_hh0": uni(ks[3], (4 * H,)),
        "w_ih1": uni(ks[4], (4 * H, H)),
        "w_hh1": uni(ks[5], (4 * H, H)),
        "b_ih1": uni(ks[6], (4 * H,)),
        "b_hh1": uni(ks[7], (4 * H,)),
        "w_fc": uni(ks[8], (1, H)),
        "b_fc": uni(ks[9], (1,)),
    }

    x = jax.random.normal(ks[10], (B, T, 1), jnp.float32)

    out = jax.block_until_ready(lstm_model_forward(x, params))
    ref = jax.block_until_ready(lstm_model_ref(x, params))

    assert out.shape == (B, 1), out.shape
    # bf16 recurrent weights / hidden-state casts -> slightly looser tolerance
    # than the pure-f32 version (accumulation stays f32).
    assert jnp.allclose(out, ref, atol=2e-2, rtol=2e-2), (out, ref)
    print("KERNEL_OK")
</pallas_src>

<mosaic_0001>
module attributes {stable_mosaic.version = 11 : i64} {
  func.func @lstm_kernel(%arg0: memref<64x1xf32, #tpu.memory_space<vmem>>, %arg1: memref<1x512xf32, #tpu.memory_space<vmem>>, %arg2: memref<1x512xf32, #tpu.memory_space<vmem>>, %arg3: memref<128x512xbf16, #tpu.memory_space<vmem>>, %arg4: memref<256x512xbf16, #tpu.memory_space<vmem>>, %arg5: memref<1x512xf32, #tpu.memory_space<vmem>>, %arg6: memref<128x128xf32, #tpu.memory_space<vmem>>, %arg7: memref<1x128xf32, #tpu.memory_space<vmem>>, %arg8: memref<8x128xf32, #tpu.memory_space<vmem>>) attributes {dimension_semantics = [], scalar_prefetch = 0 : i64, scratch_operands = 0 : i64, tpu.core_type = #tpu.core_type<tc>} {
    %c0 = arith.constant 0 : index
    %c0_0 = arith.constant 0 : index
    %0 = vector.load %arg3[%c0, %c0_0] : memref<128x512xbf16, #tpu.memory_space<vmem>>, vector<128x512xbf16>
    %c0_1 = arith.constant 0 : index
    %c0_2 = arith.constant 0 : index
    %1 = vector.load %arg4[%c0_1, %c0_2] : memref<256x512xbf16, #tpu.memory_space<vmem>>, vector<256x512xbf16>
    %c0_3 = arith.constant 0 : index
    %c0_4 = arith.constant 0 : index
    %2 = vector.load %arg5[%c0_3, %c0_4] : memref<1x512xf32, #tpu.memory_space<vmem>>, vector<1x512xf32>
    %3 = vector.shape_cast %2 : vector<1x512xf32> to vector<1x512xf32>
    %4 = vector.broadcast %3 : vector<1x512xf32> to vector<8x512xf32>
    %c0_5 = arith.constant 0 : index
    %c0_6 = arith.constant 0 : index
    %5 = vector.load %arg0[%c0_5, %c0_6] : memref<64x1xf32, #tpu.memory_space<vmem>>, vector<64x1xf32>
    %c0_7 = arith.constant 0 : index
    %c0_8 = arith.constant 0 : index
    %6 = vector.load %arg1[%c0_7, %c0_8] : memref<1x512xf32, #tpu.memory_space<vmem>>, vector<1x512xf32>
    %7 = vector.broadcast %5 : vector<64x1xf32> to vector<64x512xf32>
    %8 = vector.broadcast %6 : vector<1x512xf32> to vector<64x512xf32>
    %9 = arith.mulf %7, %8 : vector<64x512xf32>
    %c0_9 = arith.constant 0 : index
    %c0_10 = arith.constant 0 : index
    %10 = vector.load %arg2[%c0_9, %c0_10] : memref<1x512xf32, #tpu.memory_space<vmem>>, vector<1x512xf32>
    %11 = vector.broadcast %10 : vector<1x512xf32> to vector<64x512xf32>
    %12 = arith.addf %9, %11 : vector<64x512xf32>
    %cst = arith.constant 0.000000e+00 : f32
    %13 = vector.broadcast %cst : f32 to vector<8x128xf32>
    %14 = vector.extract_strided_slice %12 {offsets = [0, 0], sizes = [8, 512], strides = [1, 1]} : vector<64x512xf32> to vector<8x512xf32>
    %15 = vector.extract_strided_slice %14 {offsets = [0, 0], sizes = [8, 128], strides = [1, 1]} : vector<8x512xf32> to vector<8x128xf32>
    %16 = arith.negf %15 : vector<8x128xf32>
    %17 = math.exp %16 : vector<8x128xf32>
    %cst_11 = arith.constant 1.000000e+00 : f32
    %18 = vector.broadcast %cst_11 : f32 to vector<8x128xf32>
    %19 = arith.addf %18, %17 : vector<8x128xf32>
    %20 = arith.divf %18, %19 : vector<8x128xf32>
    %21 = vector.extract_strided_slice %14 {offsets = [0, 128], sizes = [8, 128], strides = [1, 1]} : vector<8x512xf32> to vector<8x128xf32>
    %22 = arith.negf %21 : vector<8x128xf32>
    %23 = math.exp %22 : vector<8x128xf32>
    %cst_12 = arith.constant 1.000000e+00 : f32
    %24 = vector.broadcast %cst_12 : f32 to vector<8x128xf32>
    %25 = arith.addf %24, %23 : vector<8x128xf32>
    %26 = arith.divf %24, %25 : vector<8x128xf32>
    %27 = vector.extract_strided_slice %14 {offsets = [0, 256], sizes = [8, 128], strides = [1, 1]} : vector<8x512xf32> to vector<8x128xf32>
    %28 = math.tanh %27 : vector<8x128xf32>
    %29 = vector.extract_strided_slice %14 {offsets = [0, 384], sizes = [8, 128], strides = [1, 1]} : vector<8x512xf32> to vector<8x128xf32>
    %30 = arith.negf %29 : vector<8x128xf32>
    %31 = math.exp %30 : vector<8x128xf32>
    %cst_13 = arith.constant 1.000000e+00 : f32
    %32 = vector.broadcast %cst_13 : f32 to vector<8x128xf32>
    %33 = arith.addf %32, %31 : vector<8x128xf32>
    %34 = arith.divf %32, %33 : vector<8x128xf32>
    %35 = arith.mulf %26, %13 : vector<8x128xf32>
    %36 = arith.mulf %20, %28 : vector<8x128xf32>
    %37 = arith.addf %35, %36 : vector<8x128xf32>
    %38 = math.tanh %37 : vector<8x128xf32>
    %39 = arith.mulf %34, %38 : vector<8x128xf32>
    %40 = vector.extract_strided_slice %12 {offsets = [8, 0], sizes = [8, 512], strides = [1, 1]} : vector<64x512xf32> to vector<8x512xf32>
    %41 = arith.truncf %39 : vector<8x128xf32> to vector<8x128xbf16>
    %cst_14 = arith.constant dense<0.000000e+00> : vector<8x512xf32>
    %42 = tpu.matmul %41, %0, %cst_14 {dimension_numbers = #tpu.dot_dimension_numbers<[1], [0], [0], [1], [0, 0, 1, 1], [], []>} : vector<8x128xbf16>, vector<128x512xbf16>, vector<8x512xf32> -> vector<8x512xf32>
    %43 = arith.addf %40, %42 : vector<8x512xf32>
    %44 = tpu.concatenate %39, %13 in 1 : vector<8x128xf32>, vector<8x128xf32> -> vector<8x256xf32>
    %45 = arith.truncf %44 : vector<8x256xf32> to vector<8x256xbf16>
    %cst_15 = arith.constant dense<0.000000e+00> : vector<8x512xf32>
    %46 = tpu.matmul %45, %1, %cst_15 {dimension_numbers = #tpu.dot_dimension_numbers<[1], [0], [0], [1], [0, 0, 1, 1], [], []>} : vector<8x256xbf16>, vector<256x512xbf16>, vector<8x512xf32> -> vector<8x512xf32>
    %47 = arith.addf %46, %4 : vector<8x512xf32>
    %48 = vector.extract_strided_slice %43 {offsets = [0, 0], sizes = [8, 128], strides = [1, 1]} : vector<8x512xf32> to vector<8x128xf32>
    %49 = arith.negf %48 : vector<8x128xf32>
    %50 = math.exp %49 : vector<8x128xf32>
    %cst_16 = arith.constant 1.000000e+00 : f32
    %51 = vector.broadcast %cst_16 : f32 to vector<8x128xf32>
    %52 = arith.addf %51, %50 : vector<8x128xf32>
    %53 = arith.divf %51, %52 : vector<8x128xf32>
    %54 = vector.extract_strided_slice %43 {offsets = [0, 128], sizes = [8, 128], strides = [1, 1]} : vector<8x512xf32> to vector<8x128xf32>
    %55 = arith.negf %54 : vector<8x128xf32>
    %56 = math.exp %55 : vector<8x128xf32>
    %cst_17 = arith.constant 1.000000e+00 : f32
    %57 = vector.broadcast %cst_17 : f32 to vector<8x128xf32>
    %58 = arith.addf %57, %56 : vector<8x128xf32>
    %59 = arith.divf %57, %58 : vector<8x128xf32>
    %60 = vector.extract_strided_slice %43 {offsets = [0, 256], sizes = [8, 128], strides = [1, 1]} : vector<8x512xf32> to vector<8x128xf32>
    %61 = math.tanh %60 : vector<8x128xf32>
    %62 = vector.extract_strided_slice %43 {offsets = [0, 384], sizes = [8, 128], strides = [1, 1]} : vector<8x512xf32> to vector<8x128xf32>
    %63 = arith.negf %62 : vector<8x128xf32>
    %64 = math.exp %63 : vector<8x128xf32>
    %cst_18 = arith.constant 1.000000e+00 : f32
    %65 = vector.broadcast %cst_18 : f32 to vector<8x128xf32>
    %66 = arith.addf %65, %64 : vector<8x128xf32>
    %67 = arith.divf %65, %66 : vector<8x128xf32>
    %68 = arith.mulf %59, %37 : vector<8x128xf32>
    %69 = arith.mulf %53, %61 : vector<8x128xf32>
    %70 = arith.addf %68, %69 : vector<8x128xf32>
    %71 = math.tanh %70 : vector<8x128xf32>
    %72 = arith.mulf %67, %71 : vector<8x128xf32>
    %73 = vector.extract_strided_slice %47 {offsets = [0, 0], sizes = [8, 128], strides = [1, 1]} : vector<8x512xf32> to vector<8x128xf32>
    %74 = arith.negf %73 : vector<8x128xf32>
    %75 = math.exp %74 : vector<8x128xf32>
    %cst_19 = arith.constant 1.000000e+00 : f32
    %76 = vector.broadcast %cst_19 : f32 to vector<8x128xf32>
    %77 = arith.addf %76, %75 : vector<8x128xf32>
    %78 = arith.divf %76, %77 : vector<8x128xf32>
    %79 = vector.extract_strided_slice %47 {offsets = [0, 128], sizes = [8, 128], strides = [1, 1]} : vector<8x512xf32> to vector<8x128xf32>
    %80 = arith.negf %79 : vector<8x128xf32>
    %81 = math.exp %80 : vector<8x128xf32>
    %cst_20 = arith.constant 1.000000e+00 : f32
    %82 = vector.broadcast %cst_20 : f32 to vector<8x128xf32>
    %83 = arith.addf %82, %81 : vector<8x128xf32>
    %84 = arith.divf %82, %83 : vector<8x128xf32>
    %85 = vector.extract_strided_slice %47 {offsets = [0, 256], sizes = [8, 128], strides = [1, 1]} : vector<8x512xf32> to vector<8x128xf32>
    %86 = math.tanh %85 : vector<8x128xf32>
    %87 = vector.extract_strided_slice %47 {offsets = [0, 384], sizes = [8, 128], strides = [1, 1]} : vector<8x512xf32> to vector<8x128xf32>
    %88 = arith.negf %87 : vector<8x128xf32>
    %89 = math.exp %88 : vector<8x128xf32>
    %cst_21 = arith.constant 1.000000e+00 : f32
    %90 = vector.broadcast %cst_21 : f32 to vector<8x128xf32>
    %91 = arith.addf %90, %89 : vector<8x128xf32>
    %92 = arith.divf %90, %91 : vector<8x128xf32>
    %93 = arith.mulf %84, %13 : vector<8x128xf32>
    %94 = arith.mulf %78, %86 : vector<8x128xf32>
    %95 = arith.addf %93, %94 : vector<8x128xf32>
    %96 = math.tanh %95 : vector<8x128xf32>
    %97 = arith.mulf %92, %96 : vector<8x128xf32>
    %98 = vector.extract_strided_slice %12 {offsets = [16, 0], sizes = [8, 512], strides = [1, 1]} : vector<64x512xf32> to vector<8x512xf32>
    %99 = arith.truncf %72 : vector<8x128xf32> to vector<8x128xbf16>
    %cst_22 = arith.constant dense<0.000000e+00> : vector<8x512xf32>
    %100 = tpu.matmul %99, %0, %cst_22 {dimension_numbers = #tpu.dot_dimension_numbers<[1], [0], [0], [1], [0, 0, 1, 1], [], []>} : vector<8x128xbf16>, vector<128x512xbf16>, vector<8x512xf32> -> vector<8x512xf32>
    %101 = arith.addf %98, %100 : vector<8x512xf32>
    %102 = tpu.concatenate %72, %97 in 1 : vector<8x128xf32>, vector<8x128xf32> -> vector<8x256xf32>
    %103 = arith.truncf %102 : vector<8x256xf32> to vector<8x256xbf16>
    %cst_23 = arith.constant dense<0.000000e+00> : vector<8x512xf32>
    %104 = tpu.matmul %103, %1, %cst_23 {dimension_numbers = #tpu.dot_dimension_numbers<[1], [0], [0], [1], [0, 0, 1, 1], [], []>} : vector<8x256xbf16>, vector<256x512xbf16>, vector<8x512xf32> -> vector<8x512xf32>
    %105 = arith.addf %104, %4 : vector<8x512xf32>
    %106 = vector.extract_strided_slice %101 {offsets = [0, 0], sizes = [8, 128], strides = [1, 1]} : vector<8x512xf32> to vector<8x128xf32>
    %107 = arith.negf %106 : vector<8x128xf32>
    %108 = math.exp %107 : vector<8x128xf32>
    %cst_24 = arith.constant 1.000000e+00 : f32
    %109 = vector.broadcast %cst_24 : f32 to vector<8x128xf32>
    %110 = arith.addf %109, %108 : vector<8x128xf32>
    %111 = arith.divf %109, %110 : vector<8x128xf32>
    %112 = vector.extract_strided_slice %101 {offsets = [0, 128], sizes = [8, 128], strides = [1, 1]} : vector<8x512xf32> to vector<8x128xf32>
    %113 = arith.negf %112 : vector<8x128xf32>
    %114 = math.exp %113 : vector<8x128xf32>
    %cst_25 = arith.constant 1.000000e+00 : f32
    %115 = vector.broadcast %cst_25 : f32 to vector<8x128xf32>
    %116 = arith.addf %115, %114 : vector<8x128xf32>
    %117 = arith.divf %115, %116 : vector<8x128xf32>
    %118 = vector.extract_strided_slice %101 {offsets = [0, 256], sizes = [8, 128], strides = [1, 1]} : vector<8x512xf32> to vector<8x128xf32>
    %119 = math.tanh %118 : vector<8x128xf32>
    %120 = vector.extract_strided_slice %101 {offsets = [0, 384], sizes = [8, 128], strides = [1, 1]} : vector<8x512xf32> to vector<8x128xf32>
    %121 = arith.negf %120 : vector<8x128xf32>
    %122 = math.exp %121 : vector<8x128xf32>
    %cst_26 = arith.constant 1.000000e+00 : f32
    %123 = vector.broadcast %cst_26 : f32 to vector<8x128xf32>
    %124 = arith.addf %123, %122 : vector<8x128xf32>
    %125 = arith.divf %123, %124 : vector<8x128xf32>
    %126 = arith.mulf %117, %70 : vector<8x128xf32>
    %127 = arith.mulf %111, %119 : vector<8x128xf32>
    %128 = arith.addf %126, %127 : vector<8x128xf32>
    %129 = math.tanh %128 : vector<8x128xf32>
    %130 = arith.mulf %125, %129 : vector<8x128xf32>
    %131 = vector.extract_strided_slice %105 {offsets = [0, 0], sizes = [8, 128], strides = [1, 1]} : vector<8x512xf32> to vector<8x128xf32>
    %132 = arith.negf %131 : vector<8x128xf32>
    %133 = math.exp %132 : vector<8x128xf32>
    %cst_27 = arith.constant 1.000000e+00 : f32
    %134 = vector.broadcast %cst_27 : f32 to vector<8x128xf32>
    %135 = arith.addf %134, %133 : vector<8x128xf32>
    %136 = arith.divf %134, %135 : vector<8x128xf32>
    %137 = vector.extract_strided_slice %105 {offsets = [0, 128], sizes = [8, 128], strides = [1, 1]} : vector<8x512xf32> to vector<8x128xf32>
    %138 = arith.negf %137 : vector<8x128xf32>
    %139 = math.exp %138 : vector<8x128xf32>
    %cst_28 = arith.constant 1.000000e+00 : f32
    %140 = vector.broadcast %cst_28 : f32 to vector<8x128xf32>
    %141 = arith.addf %140, %139 : vector<8x128xf32>
    %142 = arith.divf %140, %141 : vector<8x128xf32>
    %143 = vector.extract_strided_slice %105 {offsets = [0, 256], sizes = [8, 128], strides = [1, 1]} : vector<8x512xf32> to vector<8x128xf32>
    %144 = math.tanh %143 : vector<8x128xf32>
    %145 = vector.extract_strided_slice %105 {offsets = [0, 384], sizes = [8, 128], strides = [1, 1]} : vector<8x512xf32> to vector<8x128xf32>
    %146 = arith.negf %145 : vector<8x128xf32>
    %147 = math.exp %146 : vector<8x128xf32>
    %cst_29 = arith.constant 1.000000e+00 : f32
    %148 = vector.broadcast %cst_29 : f32 to vector<8x128xf32>
    %149 = arith.addf %148, %147 : vector<8x128xf32>
    %150 = arith.divf %148, %149 : vector<8x128xf32>
    %151 = arith.mulf %142, %95 : vector<8x128xf32>
    %152 = arith.mulf %136, %144 : vector<8x128xf32>
    %153 = arith.addf %151, %152 : vector<8x128xf32>
    %154 = math.tanh %153 : vector<8x128xf32>
    %155 = arith.mulf %150, %154 : vector<8x128xf32>
    %156 = vector.extract_strided_slice %12 {offsets = [24, 0], sizes = [8, 512], strides = [1, 1]} : vector<64x512xf32> to vector<8x512xf32>
    %157 = arith.truncf %130 : vector<8x128xf32> to vector<8x128xbf16>
    %cst_30 = arith.constant dense<0.000000e+00> : vector<8x512xf32>
    %158 = tpu.matmul %157, %0, %cst_30 {dimension_numbers = #tpu.dot_dimension_numbers<[1], [0], [0], [1], [0, 0, 1, 1], [], []>} : vector<8x128xbf16>, vector<128x512xbf16>, vector<8x512xf32> -> vector<8x512xf32>
    %159 = arith.addf %156, %158 : vector<8x512xf32>
    %160 = tpu.concatenate %130, %155 in 1 : vector<8x128xf32>, vector<8x128xf32> -> vector<8x256xf32>
    %161 = arith.truncf %160 : vector<8x256xf32> to vector<8x256xbf16>
    %cst_31 = arith.constant dense<0.000000e+00> : vector<8x512xf32>
    %162 = tpu.matmul %161, %1, %cst_31 {dimension_numbers = #tpu.dot_dimension_numbers<[1], [0], [0], [1], [0, 0, 1, 1], [], []>} : vector<8x256xbf16>, vector<256x512xbf16>, vector<8x512xf32> -> vector<8x512xf32>
    %163 = arith.addf %162, %4 : vector<8x512xf32>
    %164 = vector.extract_strided_slice %159 {offsets = [0, 0], sizes = [8, 128], strides = [1, 1]} : vector<8x512xf32> to vector<8x128xf32>
    %165 = arith.negf %164 : vector<8x128xf32>
    %166 = math.exp %165 : vector<8x128xf32>
    %cst_32 = arith.constant 1.000000e+00 : f32
    %167 = vector.broadcast %cst_32 : f32 to vector<8x128xf32>
    %168 = arith.addf %167, %166 : vector<8x128xf32>
    %169 = arith.divf %167, %168 : vector<8x128xf32>
    %170 = vector.extract_strided_slice %159 {offsets = [0, 128], sizes = [8, 128], strides = [1, 1]} : vector<8x512xf32> to vector<8x128xf32>
    %171 = arith.negf %170 : vector<8x128xf32>
    %172 = math.exp %171 : vector<8x128xf32>
    %cst_33 = arith.constant 1.000000e+00 : f32
    %173 = vector.broadcast %cst_33 : f32 to vector<8x128xf32>
    %174 = arith.addf %173, %172 : vector<8x128xf32>
    %175 = arith.divf %173, %174 : vector<8x128xf32>
    %176 = vector.extract_strided_slice %159 {offsets = [0, 256], sizes = [8, 128], strides = [1, 1]} : vector<8x512xf32> to vector<8x128xf32>
    %177 = math.tanh %176 : vector<8x128xf32>
    %178 = vector.extract_strided_slice %159 {offsets = [0, 384], sizes = [8, 128], strides = [1, 1]} : vector<8x512xf32> to vector<8x128xf32>
    %179 = arith.negf %178 : vector<8x128xf32>
    %180 = math.exp %179 : vector<8x128xf32>
    %cst_34 = arith.constant 1.000000e+00 : f32
    %181 = vector.broadcast %cst_34 : f32 to vector<8x128xf32>
    %182 = arith.addf %181, %180 : vector<8x128xf32>
    %183 = arith.divf %181, %182 : vector<8x128xf32>
    %184 = arith.mulf %175, %128 : vector<8x128xf32>
    %185 = arith.mulf %169, %177 : vector<8x128xf32>
    %186 = arith.addf %184, %185 : vector<8x128xf32>
    %187 = math.tanh %186 : vector<8x128xf32>
    %188 = arith.mulf %183, %187 : vector<8x128xf32>
    %189 = vector.extract_strided_slice %163 {offsets = [0, 0], sizes = [8, 128], strides = [1, 1]} : vector<8x512xf32> to vector<8x128xf32>
    %190 = arith.negf %189 : vector<8x128xf32>
    %191 = math.exp %190 : vector<8x128xf32>
    %cst_35 = arith.constant 1.000000e+00 : f32
    %192 = vector.broadcast %cst_35 : f32 to vector<8x128xf32>
    %193 = arith.addf %192, %191 : vector<8x128xf32>
    %194 = arith.divf %192, %193 : vector<8x128xf32>
    %195 = vector.extract_strided_slice %163 {offsets = [0, 128], sizes = [8, 128], strides = [1, 1]} : vector<8x512xf32> to vector<8x128xf32>
    %196 = arith.negf %195 : vector<8x128xf32>
    %197 = math.exp %196 : vector<8x128xf32>
    %cst_36 = arith.constant 1.000000e+00 : f32
    %198 = vector.broadcast %cst_36 : f32 to vector<8x128xf32>
    %199 = arith.addf %198, %197 : vector<8x128xf32>
    %200 = arith.divf %198, %199 : vector<8x128xf32>
    %201 = vector.extract_strided_slice %163 {offsets = [0, 256], sizes = [8, 128], strides = [1, 1]} : vector<8x512xf32> to vector<8x128xf32>
    %202 = math.tanh %201 : vector<8x128xf32>
    %203 = vector.extract_strided_slice %163 {offsets = [0, 384], sizes = [8, 128], strides = [1, 1]} : vector<8x512xf32> to vector<8x128xf32>
    %204 = arith.negf %203 : vector<8x128xf32>
    %205 = math.exp %204 : vector<8x128xf32>
    %cst_37 = arith.constant 1.000000e+00 : f32
    %206 = vector.broadcast %cst_37 : f32 to vector<8x128xf32>
    %207 = arith.addf %206, %205 : vector<8x128xf32>
    %208 = arith.divf %206, %207 : vector<8x128xf32>
    %209 = arith.mulf %200, %153 : vector<8x128xf32>
    %210 = arith.mulf %194, %202 : vector<8x128xf32>
    %211 = arith.addf %209, %210 : vector<8x128xf32>
    %212 = math.tanh %211 : vector<8x128xf32>
    %213 = arith.mulf %208, %212 : vector<8x128xf32>
    %214 = vector.extract_strided_slice %12 {offsets = [32, 0], sizes = [8, 512], strides = [1, 1]} : vector<64x512xf32> to vector<8x512xf32>
    %215 = arith.truncf %188 : vector<8x128xf32> to vector<8x128xbf16>
    %cst_38 = arith.constant dense<0.000000e+00> : vector<8x512xf32>
    %216 = tpu.matmul %215, %0, %cst_38 {dimension_numbers = #tpu.dot_dimension_numbers<[1], [0], [0], [1], [0, 0, 1, 1], [], []>} : vector<8x128xbf16>, vector<128x512xbf16>, vector<8x512xf32> -> vector<8x512xf32>
    %217 = arith.addf %214, %216 : vector<8x512xf32>
    %218 = tpu.concatenate %188, %213 in 1 : vector<8x128xf32>, vector<8x128xf32> -> vector<8x256xf32>
    %219 = arith.truncf %218 : vector<8x256xf32> to vector<8x256xbf16>
    %cst_39 = arith.constant dense<0.000000e+00> : vector<8x512xf32>
    %220 = tpu.matmul %219, %1, %cst_39 {dimension_numbers = #tpu.dot_dimension_numbers<[1], [0], [0], [1], [0, 0, 1, 1], [], []>} : vector<8x256xbf16>, vector<256x512xbf16>, vector<8x512xf32> -> vector<8x512xf32>
    %221 = arith.addf %220, %4 : vector<8x512xf32>
    %222 = vector.extract_strided_slice %217 {offsets = [0, 0], sizes = [8, 128], strides = [1, 1]} : vector<8x512xf32> to vector<8x128xf32>
    %223 = arith.negf %222 : vector<8x128xf32>
    %224 = math.exp %223 : vector<8x128xf32>
    %cst_40 = arith.constant 1.000000e+00 : f32
    %225 = vector.broadcast %cst_40 : f32 to vector<8x128xf32>
    %226 = arith.addf %225, %224 : vector<8x128xf32>
    %227 = arith.divf %225, %226 : vector<8x128xf32>
    %228 = vector.extract_strided_slice %217 {offsets = [0, 128], sizes = [8, 128], strides = [1, 1]} : vector<8x512xf32> to vector<8x128xf32>
    %229 = arith.negf %228 : vector<8x128xf32>
    %230 = math.exp %229 : vector<8x128xf32>
    %cst_41 = arith.constant 1.000000e+00 : f32
    %231 = vector.broadcast %cst_41 : f32 to vector<8x128xf32>
    %232 = arith.addf %231, %230 : vector<8x128xf32>
    %233 = arith.divf %231, %232 : vector<8x128xf32>
    %234 = vector.extract_strided_slice %217 {offsets = [0, 256], sizes = [8, 128], strides = [1, 1]} : vector<8x512xf32> to vector<8x128xf32>
    %235 = math.tanh %234 : vector<8x128xf32>
    %236 = vector.extract_strided_slice %217 {offsets = [0, 384], sizes = [8, 128], strides = [1, 1]} : vector<8x512xf32> to vector<8x128xf32>
    %237 = arith.negf %236 : vector<8x128xf32>
    %238 = math.exp %237 : vector<8x128xf32>
    %cst_42 = arith.constant 1.000000e+00 : f32
    %239 = vector.broadcast %cst_42 : f32 to vector<8x128xf32>
    %240 = arith.addf %239, %238 : vector<8x128xf32>
    %241 = arith.divf %239, %240 : vector<8x128xf32>
    %242 = arith.mulf %233, %186 : vector<8x128xf32>
    %243 = arith.mulf %227, %235 : vector<8x128xf32>
    %244 = arith.addf %242, %243 : vector<8x128xf32>
    %245 = math.tanh %244 : vector<8x128xf32>
    %246 = arith.mulf %241, %245 : vector<8x128xf32>
    %247 = vector.extract_strided_slice %221 {offsets = [0, 0], sizes = [8, 128], strides = [1, 1]} : vector<8x512xf32> to vector<8x128xf32>
    %248 = arith.negf %247 : vector<8x128xf32>
    %249 = math.exp %248 : vector<8x128xf32>
    %cst_43 = arith.constant 1.000000e+00 : f32
    %250 = vector.broadcast %cst_43 : f32 to vector<8x128xf32>
    %251 = arith.addf %250, %249 : vector<8x128xf32>
    %252 = arith.divf %250, %251 : vector<8x128xf32>
    %253 = vector.extract_strided_slice %221 {offsets = [0, 128], sizes = [8, 128], strides = [1, 1]} : vector<8x512xf32> to vector<8x128xf32>
    %254 = arith.negf %253 : vector<8x128xf32>
    %255 = math.exp %254 : vector<8x128xf32>
    %cst_44 = arith.constant 1.000000e+00 : f32
    %256 = vector.broadcast %cst_44 : f32 to vector<8x128xf32>
    %257 = arith.addf %256, %255 : vector<8x128xf32>
    %258 = arith.divf %256, %257 : vector<8x128xf32>
    %259 = vector.extract_strided_slice %221 {offsets = [0, 256], sizes = [8, 128], strides = [1, 1]} : vector<8x512xf32> to vector<8x128xf32>
    %260 = math.tanh %259 : vector<8x128xf32>
    %261 = vector.extract_strided_slice %221 {offsets = [0, 384], sizes = [8, 128], strides = [1, 1]} : vector<8x512xf32> to vector<8x128xf32>
    %262 = arith.negf %261 : vector<8x128xf32>
    %263 = math.exp %262 : vector<8x128xf32>
    %cst_45 = arith.constant 1.000000e+00 : f32
    %264 = vector.broadcast %cst_45 : f32 to vector<8x128xf32>
    %265 = arith.addf %264, %263 : vector<8x128xf32>
    %266 = arith.divf %264, %265 : vector<8x128xf32>
    %267 = arith.mulf %258, %211 : vector<8x128xf32>
    %268 = arith.mulf %252, %260 : vector<8x128xf32>
    %269 = arith.addf %267, %268 : vector<8x128xf32>
    %270 = math.tanh %269 : vector<8x128xf32>
    %271 = arith.mulf %266, %270 : vector<8x128xf32>
    %272 = vector.extract_strided_slice %12 {offsets = [40, 0], sizes = [8, 512], strides = [1, 1]} : vector<64x512xf32> to vector<8x512xf32>
    %273 = arith.truncf %246 : vector<8x128xf32> to vector<8x128xbf16>
    %cst_46 = arith.constant dense<0.000000e+00> : vector<8x512xf32>
    %274 = tpu.matmul %273, %0, %cst_46 {dimension_numbers = #tpu.dot_dimension_numbers<[1], [0], [0], [1], [0, 0, 1, 1], [], []>} : vector<8x128xbf16>, vector<128x512xbf16>, vector<8x512xf32> -> vector<8x512xf32>
    %275 = arith.addf %272, %274 : vector<8x512xf32>
    %276 = tpu.concatenate %246, %271 in 1 : vector<8x128xf32>, vector<8x128xf32> -> vector<8x256xf32>
    %277 = arith.truncf %276 : vector<8x256xf32> to vector<8x256xbf16>
    %cst_47 = arith.constant dense<0.000000e+00> : vector<8x512xf32>
    %278 = tpu.matmul %277, %1, %cst_47 {dimension_numbers = #tpu.dot_dimension_numbers<[1], [0], [0], [1], [0, 0, 1, 1], [], []>} : vector<8x256xbf16>, vector<256x512xbf16>, vector<8x512xf32> -> vector<8x512xf32>
    %279 = arith.addf %278, %4 : vector<8x512xf32>
    %280 = vector.extract_strided_slice %275 {offsets = [0, 0], sizes = [8, 128], strides = [1, 1]} : vector<8x512xf32> to vector<8x128xf32>
    %281 = arith.negf %280 : vector<8x128xf32>
    %282 = math.exp %281 : vector<8x128xf32>
    %cst_48 = arith.constant 1.000000e+00 : f32
    %283 = vector.broadcast %cst_48 : f32 to vector<8x128xf32>
    %284 = arith.addf %283, %282 : vector<8x128xf32>
    %285 = arith.divf %283, %284 : vector<8x128xf32>
    %286 = vector.extract_strided_slice %275 {offsets = [0, 128], sizes = [8, 128], strides = [1, 1]} : vector<8x512xf32> to vector<8x128xf32>
    %287 = arith.negf %286 : vector<8x128xf32>
    %288 = math.exp %287 : vector<8x128xf32>
    %cst_49 = arith.constant 1.000000e+00 : f32
    %289 = vector.broadcast %cst_49 : f32 to vector<8x128xf32>
    %290 = arith.addf %289, %288 : vector<8x128xf32>
    %291 = arith.divf %289, %290 : vector<8x128xf32>
    %292 = vector.extract_strided_slice %275 {offsets = [0, 256], sizes = [8, 128], strides = [1, 1]} : vector<8x512xf32> to vector<8x128xf32>
    %293 = math.tanh %292 : vector<8x128xf32>
    %294 = vector.extract_strided_slice %275 {offsets = [0, 384], sizes = [8, 128], strides = [1, 1]} : vector<8x512xf32> to vector<8x128xf32>
    %295 = arith.negf %294 : vector<8x128xf32>
    %296 = math.exp %295 : vector<8x128xf32>
    %cst_50 = arith.constant 1.000000e+00 : f32
    %297 = vector.broadcast %cst_50 : f32 to vector<8x128xf32>
    %298 = arith.addf %297, %296 : vector<8x128xf32>
    %299 = arith.divf %297, %298 : vector<8x128xf32>
    %300 = arith.mulf %291, %244 : vector<8x128xf32>
    %301 = arith.mulf %285, %293 : vector<8x128xf32>
    %302 = arith.addf %300, %301 : vector<8x128xf32>
    %303 = math.tanh %302 : vector<8x128xf32>
    %304 = arith.mulf %299, %303 : vector<8x128xf32>
    %305 = vector.extract_strided_slice %279 {offsets = [0, 0], sizes = [8, 128], strides = [1, 1]} : vector<8x512xf32> to vector<8x128xf32>
    %306 = arith.negf %305 : vector<8x128xf32>
    %307 = math.exp %306 : vector<8x128xf32>
    %cst_51 = arith.constant 1.000000e+00 : f32
    %308 = vector.broadcast %cst_51 : f32 to vector<8x128xf32>
    %309 = arith.addf %308, %307 : vector<8x128xf32>
    %310 = arith.divf %308, %309 : vector<8x128xf32>
    %311 = vector.extract_strided_slice %279 {offsets = [0, 128], sizes = [8, 128], strides = [1, 1]} : vector<8x512xf32> to vector<8x128xf32>
    %312 = arith.negf %311 : vector<8x128xf32>
    %313 = math.exp %312 : vector<8x128xf32>
    %cst_52 = arith.constant 1.000000e+00 : f32
    %314 = vector.broadcast %cst_52 : f32 to vector<8x128xf32>
    %315 = arith.addf %314, %313 : vector<8x128xf32>
    %316 = arith.divf %314, %315 : vector<8x128xf32>
    %317 = vector.extract_strided_slice %279 {offsets = [0, 256], sizes = [8, 128], strides = [1, 1]} : vector<8x512xf32> to vector<8x128xf32>
    %318 = math.tanh %317 : vector<8x128xf32>
    %319 = vector.extract_strided_slice %279 {offsets = [0, 384], sizes = [8, 128], strides = [1, 1]} : vector<8x512xf32> to vector<8x128xf32>
    %320 = arith.negf %319 : vector<8x128xf32>
    %321 = math.exp %320 : vector<8x128xf32>
    %cst_53 = arith.constant 1.000000e+00 : f32
    %322 = vector.broadcast %cst_53 : f32 to vector<8x128xf32>
    %323 = arith.addf %322, %321 : vector<8x128xf32>
    %324 = arith.divf %322, %323 : vector<8x128xf32>
    %325 = arith.mulf %316, %269 : vector<8x128xf32>
    %326 = arith.mulf %310, %318 : vector<8x128xf32>
    %327 = arith.addf %325, %326 : vector<8x128xf32>
    %328 = math.tanh %327 : vector<8x128xf32>
    %329 = arith.mulf %324, %328 : vector<8x128xf32>
    %330 = vector.extract_strided_slice %12 {offsets = [48, 0], sizes = [8, 512], strides = [1, 1]} : vector<64x512xf32> to vector<8x512xf32>
    %331 = arith.truncf %304 : vector<8x128xf32> to vector<8x128xbf16>
    %cst_54 = arith.constant dense<0.000000e+00> : vector<8x512xf32>
    %332 = tpu.matmul %331, %0, %cst_54 {dimension_numbers = #tpu.dot_dimension_numbers<[1], [0], [0], [1], [0, 0, 1, 1], [], []>} : vector<8x128xbf16>, vector<128x512xbf16>, vector<8x512xf32> -> vector<8x512xf32>
    %333 = arith.addf %330, %332 : vector<8x512xf32>
    %334 = tpu.concatenate %304, %329 in 1 : vector<8x128xf32>, vector<8x128xf32> -> vector<8x256xf32>
    %335 = arith.truncf %334 : vector<8x256xf32> to vector<8x256xbf16>
    %cst_55 = arith.constant dense<0.000000e+00> : vector<8x512xf32>
    %336 = tpu.matmul %335, %1, %cst_55 {dimension_numbers = #tpu.dot_dimension_numbers<[1], [0], [0], [1], [0, 0, 1, 1], [], []>} : vector<8x256xbf16>, vector<256x512xbf16>, vector<8x512xf32> -> vector<8x512xf32>
    %337 = arith.addf %336, %4 : vector<8x512xf32>
    %338 = vector.extract_strided_slice %333 {offsets = [0, 0], sizes = [8, 128], strides = [1, 1]} : vector<8x512xf32> to vector<8x128xf32>
    %339 = arith.negf %338 : vector<8x128xf32>
    %340 = math.exp %339 : vector<8x128xf32>
    %cst_56 = arith.constant 1.000000e+00 : f32
    %341 = vector.broadcast %cst_56 : f32 to vector<8x128xf32>
    %342 = arith.addf %341, %340 : vector<8x128xf32>
    %343 = arith.divf %341, %342 : vector<8x128xf32>
    %344 = vector.extract_strided_slice %333 {offsets = [0, 128], sizes = [8, 128], strides = [1, 1]} : vector<8x512xf32> to vector<8x128xf32>
    %345 = arith.negf %344 : vector<8x128xf32>
    %346 = math.exp %345 : vector<8x128xf32>
    %cst_57 = arith.constant 1.000000e+00 : f32
    %347 = vector.broadcast %cst_57 : f32 to vector<8x128xf32>
    %348 = arith.addf %347, %346 : vector<8x128xf32>
    %349 = arith.divf %347, %348 : vector<8x128xf32>
    %350 = vector.extract_strided_slice %333 {offsets = [0, 256], sizes = [8, 128], strides = [1, 1]} : vector<8x512xf32> to vector<8x128xf32>
    %351 = math.tanh %350 : vector<8x128xf32>
    %352 = vector.extract_strided_slice %333 {offsets = [0, 384], sizes = [8, 128], strides = [1, 1]} : vector<8x512xf32> to vector<8x128xf32>
    %353 = arith.negf %352 : vector<8x128xf32>
    %354 = math.exp %353 : vector<8x128xf32>
    %cst_58 = arith.constant 1.000000e+00 : f32
    %355 = vector.broadcast %cst_58 : f32 to vector<8x128xf32>
    %356 = arith.addf %355, %354 : vector<8x128xf32>
    %357 = arith.divf %355, %356 : vector<8x128xf32>
    %358 = arith.mulf %349, %302 : vector<8x128xf32>
    %359 = arith.mulf %343, %351 : vector<8x128xf32>
    %360 = arith.addf %358, %359 : vector<8x128xf32>
    %361 = math.tanh %360 : vector<8x128xf32>
    %362 = arith.mulf %357, %361 : vector<8x128xf32>
    %363 = vector.extract_strided_slice %337 {offsets = [0, 0], sizes = [8, 128], strides = [1, 1]} : vector<8x512xf32> to vector<8x128xf32>
    %364 = arith.negf %363 : vector<8x128xf32>
    %365 = math.exp %364 : vector<8x128xf32>
    %cst_59 = arith.constant 1.000000e+00 : f32
    %366 = vector.broadcast %cst_59 : f32 to vector<8x128xf32>
    %367 = arith.addf %366, %365 : vector<8x128xf32>
    %368 = arith.divf %366, %367 : vector<8x128xf32>
    %369 = vector.extract_strided_slice %337 {offsets = [0, 128], sizes = [8, 128], strides = [1, 1]} : vector<8x512xf32> to vector<8x128xf32>
    %370 = arith.negf %369 : vector<8x128xf32>
    %371 = math.exp %370 : vector<8x128xf32>
    %cst_60 = arith.constant 1.000000e+00 : f32
    %372 = vector.broadcast %cst_60 : f32 to vector<8x128xf32>
    %373 = arith.addf %372, %371 : vector<8x128xf32>
    %374 = arith.divf %372, %373 : vector<8x128xf32>
    %375 = vector.extract_strided_slice %337 {offsets = [0, 256], sizes = [8, 128], strides = [1, 1]} : vector<8x512xf32> to vector<8x128xf32>
    %376 = math.tanh %375 : vector<8x128xf32>
    %377 = vector.extract_strided_slice %337 {offsets = [0, 384], sizes = [8, 128], strides = [1, 1]} : vector<8x512xf32> to vector<8x128xf32>
    %378 = arith.negf %377 : vector<8x128xf32>
    %379 = math.exp %378 : vector<8x128xf32>
    %cst_61 = arith.constant 1.000000e+00 : f32
    %380 = vector.broadcast %cst_61 : f32 to vector<8x128xf32>
    %381 = arith.addf %380, %379 : vector<8x128xf32>
    %382 = arith.divf %380, %381 : vector<8x128xf32>
    %383 = arith.mulf %374, %327 : vector<8x128xf32>
    %384 = arith.mulf %368, %376 : vector<8x128xf32>
    %385 = arith.addf %383, %384 : vector<8x128xf32>
    %386 = math.tanh %385 : vector<8x128xf32>
    %387 = arith.mulf %382, %386 : vector<8x128xf32>
    %388 = vector.extract_strided_slice %12 {offsets = [56, 0], sizes = [8, 512], strides = [1, 1]} : vector<64x512xf32> to vector<8x512xf32>
    %389 = arith.truncf %362 : vector<8x128xf32> to vector<8x128xbf16>
    %cst_62 = arith.constant dense<0.000000e+00> : vector<8x512xf32>
    %390 = tpu.matmul %389, %0, %cst_62 {dimension_numbers = #tpu.dot_dimension_numbers<[1], [0], [0], [1], [0, 0, 1, 1], [], []>} : vector<8x128xbf16>, vector<128x512xbf16>, vector<8x512xf32> -> vector<8x512xf32>
    %391 = arith.addf %388, %390 : vector<8x512xf32>
    %392 = tpu.concatenate %362, %387 in 1 : vector<8x128xf32>, vector<8x128xf32> -> vector<8x256xf32>
    %393 = arith.truncf %392 : vector<8x256xf32> to vector<8x256xbf16>
    %cst_63 = arith.constant dense<0.000000e+00> : vector<8x512xf32>
    %394 = tpu.matmul %393, %1, %cst_63 {dimension_numbers = #tpu.dot_dimension_numbers<[1], [0], [0], [1], [0, 0, 1, 1], [], []>} : vector<8x256xbf16>, vector<256x512xbf16>, vector<8x512xf32> -> vector<8x512xf32>
    %395 = arith.addf %394, %4 : vector<8x512xf32>
    %396 = vector.extract_strided_slice %391 {offsets = [0, 0], sizes = [8, 128], strides = [1, 1]} : vector<8x512xf32> to vector<8x128xf32>
    %397 = arith.negf %396 : vector<8x128xf32>
    %398 = math.exp %397 : vector<8x128xf32>
    %cst_64 = arith.constant 1.000000e+00 : f32
    %399 = vector.broadcast %cst_64 : f32 to vector<8x128xf32>
    %400 = arith.addf %399, %398 : vector<8x128xf32>
    %401 = arith.divf %399, %400 : vector<8x128xf32>
    %402 = vector.extract_strided_slice %391 {offsets = [0, 128], sizes = [8, 128], strides = [1, 1]} : vector<8x512xf32> to vector<8x128xf32>
    %403 = arith.negf %402 : vector<8x128xf32>
    %404 = math.exp %403 : vector<8x128xf32>
    %cst_65 = arith.constant 1.000000e+00 : f32
    %405 = vector.broadcast %cst_65 : f32 to vector<8x128xf32>
    %406 = arith.addf %405, %404 : vector<8x128xf32>
    %407 = arith.divf %405, %406 : vector<8x128xf32>
    %408 = vector.extract_strided_slice %391 {offsets = [0, 256], sizes = [8, 128], strides = [1, 1]} : vector<8x512xf32> to vector<8x128xf32>
    %409 = math.tanh %408 : vector<8x128xf32>
    %410 = vector.extract_strided_slice %391 {offsets = [0, 384], sizes = [8, 128], strides = [1, 1]} : vector<8x512xf32> to vector<8x128xf32>
    %411 = arith.negf %410 : vector<8x128xf32>
    %412 = math.exp %411 : vector<8x128xf32>
    %cst_66 = arith.constant 1.000000e+00 : f32
    %413 = vector.broadcast %cst_66 : f32 to vector<8x128xf32>
    %414 = arith.addf %413, %412 : vector<8x128xf32>
    %415 = arith.divf %413, %414 : vector<8x128xf32>
    %416 = arith.mulf %407, %360 : vector<8x128xf32>
    %417 = arith.mulf %401, %409 : vector<8x128xf32>
    %418 = arith.addf %416, %417 : vector<8x128xf32>
    %419 = math.tanh %418 : vector<8x128xf32>
    %420 = arith.mulf %415, %419 : vector<8x128xf32>
    %421 = vector.extract_strided_slice %395 {offsets = [0, 0], sizes = [8, 128], strides = [1, 1]} : vector<8x512xf32> to vector<8x128xf32>
    %422 = arith.negf %421 : vector<8x128xf32>
    %423 = math.exp %422 : vector<8x128xf32>
    %cst_67 = arith.constant 1.000000e+00 : f32
    %424 = vector.broadcast %cst_67 : f32 to vector<8x128xf32>
    %425 = arith.addf %424, %423 : vector<8x128xf32>
    %426 = arith.divf %424, %425 : vector<8x128xf32>
    %427 = vector.extract_strided_slice %395 {offsets = [0, 128], sizes = [8, 128], strides = [1, 1]} : vector<8x512xf32> to vector<8x128xf32>
    %428 = arith.negf %427 : vector<8x128xf32>
    %429 = math.exp %428 : vector<8x128xf32>
    %cst_68 = arith.constant 1.000000e+00 : f32
    %430 = vector.broadcast %cst_68 : f32 to vector<8x128xf32>
    %431 = arith.addf %430, %429 : vector<8x128xf32>
    %432 = arith.divf %430, %431 : vector<8x128xf32>
    %433 = vector.extract_strided_slice %395 {offsets = [0, 256], sizes = [8, 128], strides = [1, 1]} : vector<8x512xf32> to vector<8x128xf32>
    %434 = math.tanh %433 : vector<8x128xf32>
    %435 = vector.extract_strided_slice %395 {offsets = [0, 384], sizes = [8, 128], strides = [1, 1]} : vector<8x512xf32> to vector<8x128xf32>
    %436 = arith.negf %435 : vector<8x128xf32>
    %437 = math.exp %436 : vector<8x128xf32>
    %cst_69 = arith.constant 1.000000e+00 : f32
    %438 = vector.broadcast %cst_69 : f32 to vector<8x128xf32>
    %439 = arith.addf %438, %437 : vector<8x128xf32>
    %440 = arith.divf %438, %439 : vector<8x128xf32>
    %441 = arith.mulf %432, %385 : vector<8x128xf32>
    %442 = arith.mulf %426, %434 : vector<8x128xf32>
    %443 = arith.addf %441, %442 : vector<8x128xf32>
    %444 = math.tanh %443 : vector<8x128xf32>
    %445 = arith.mulf %440, %444 : vector<8x128xf32>
    %446 = tpu.concatenate %420, %445 in 1 : vector<8x128xf32>, vector<8x128xf32> -> vector<8x256xf32>
    %447 = arith.truncf %446 : vector<8x256xf32> to vector<8x256xbf16>
    %cst_70 = arith.constant dense<0.000000e+00> : vector<8x512xf32>
    %448 = tpu.matmul %447, %1, %cst_70 {dimension_numbers = #tpu.dot_dimension_numbers<[1], [0], [0], [1], [0, 0, 1, 1], [], []>} : vector<8x256xbf16>, vector<256x512xbf16>, vector<8x512xf32> -> vector<8x512xf32>
    %449 = arith.addf %448, %4 : vector<8x512xf32>
    %450 = vector.extract_strided_slice %449 {offsets = [0, 0], sizes = [8, 128], strides = [1, 1]} : vector<8x512xf32> to vector<8x128xf32>
    %451 = arith.negf %450 : vector<8x128xf32>
    %452 = math.exp %451 : vector<8x128xf32>
    %cst_71 = arith.constant 1.000000e+00 : f32
    %453 = vector.broadcast %cst_71 : f32 to vector<8x128xf32>
    %454 = arith.addf %453, %452 : vector<8x128xf32>
    %455 = arith.divf %453, %454 : vector<8x128xf32>
    %456 = vector.extract_strided_slice %449 {offsets = [0, 128], sizes = [8, 128], strides = [1, 1]} : vector<8x512xf32> to vector<8x128xf32>
    %457 = arith.negf %456 : vector<8x128xf32>
    %458 = math.exp %457 : vector<8x128xf32>
    %cst_72 = arith.constant 1.000000e+00 : f32
    %459 = vector.broadcast %cst_72 : f32 to vector<8x128xf32>
    %460 = arith.addf %459, %458 : vector<8x128xf32>
    %461 = arith.divf %459, %460 : vector<8x128xf32>
    %462 = vector.extract_strided_slice %449 {offsets = [0, 256], sizes = [8, 128], strides = [1, 1]} : vector<8x512xf32> to vector<8x128xf32>
    %463 = math.tanh %462 : vector<8x128xf32>
    %464 = vector.extract_strided_slice %449 {offsets = [0, 384], sizes = [8, 128], strides = [1, 1]} : vector<8x512xf32> to vector<8x128xf32>
    %465 = arith.negf %464 : vector<8x128xf32>
    %466 = math.exp %465 : vector<8x128xf32>
    %cst_73 = arith.constant 1.000000e+00 : f32
    %467 = vector.broadcast %cst_73 : f32 to vector<8x128xf32>
    %468 = arith.addf %467, %466 : vector<8x128xf32>
    %469 = arith.divf %467, %468 : vector<8x128xf32>
    %470 = arith.mulf %461, %443 : vector<8x128xf32>
    %471 = arith.mulf %455, %463 : vector<8x128xf32>
    %472 = arith.addf %470, %471 : vector<8x128xf32>
    %473 = math.tanh %472 : vector<8x128xf32>
    %474 = arith.mulf %469, %473 : vector<8x128xf32>
    %c0_74 = arith.constant 0 : index
    %c0_75 = arith.constant 0 : index
    %475 = vector.load %arg6[%c0_74, %c0_75] : memref<128x128xf32, #tpu.memory_space<vmem>>, vector<128x128xf32>
    %cst_76 = arith.constant dense<0.000000e+00> : vector<8x128xf32>
    %476 = tpu.matmul %474, %475, %cst_76 {dimension_numbers = #tpu.dot_dimension_numbers<[1], [0], [0], [1], [0, 0, 1, 1], [], []>} : vector<8x128xf32>, vector<128x128xf32>, vector<8x128xf32> -> vector<8x128xf32>
    %c0_77 = arith.constant 0 : index
    %c0_78 = arith.constant 0 : index
    %477 = vector.load %arg7[%c0_77, %c0_78] : memref<1x128xf32, #tpu.memory_space<vmem>>, vector<1x128xf32>
    %478 = vector.broadcast %477 : vector<1x128xf32> to vector<8x128xf32>
    %479 = arith.addf %476, %478 : vector<8x128xf32>
    %c0_79 = arith.constant 0 : index
    %c0_80 = arith.constant 0 : index
    %480 = vector.load %arg8[%c0_79, %c0_80] : memref<8x128xf32, #tpu.memory_space<vmem>>, vector<8x128xf32>
    tpu.vector_store %arg8[%c0_79, %c0_80], %479 {strides = array<i32>} : memref<8x128xf32, #tpu.memory_space<vmem>>, vector<8x128xf32>,
    return
  }
}

</mosaic_0001>

<bundles_post_ra>
// kernel: tpu_custom_call.1
= control target key start
LH: loop header
LB: loop body
LE: loop exit
PB: predicated region body
PF: predicated region fallthrough
CT: control target
= control target key end

     0   :  { %13 = vsyncpa [#allocation3], 0  ;;  %s5452_s0 = inlined_call_operand.vmem [shape: f32[64,1], index: 0, kind: input, shape index: {}]   ;;  %s5453_s1 = inlined_call_operand.vmem [shape: f32[1,512], index: 1, kind: input, shape index: {}]   ;;  %s5454_s2 = inlined_call_operand.vmem [shape: f32[1,512], index: 2, kind: input, shape index: {}]   ;;  %s5455_s3 = inlined_call_operand.hbm [shape: bf16[128,512], index: 3, kind: input, shape index: {}]   ;;  %s5456_s4 = inlined_call_operand.hbm [shape: bf16[256,512], index: 4, kind: input, shape index: {}]   ;;  %s5457_s5 = inlined_call_operand.vmem [shape: f32[1,512], index: 5, kind: input, shape index: {}]   ;;  %s5458_s6 = inlined_call_operand.hbm [shape: f32[128,128], index: 6, kind: input, shape index: {}]   ;;  %s5459_s7 = inlined_call_operand.vmem [shape: f32[1,128], index: 7, kind: input, shape index: {}]   ;;  %s5460_s8 = inlined_call_operand.hbm [shape: f32[8,128], index: 8, kind: output, shape index: {}]  }
   0x1   :  { %14 = vsyncpa [#allocation6], 0 }
   0x2   :  { %15 = vsyncpa [#allocation4], 0  ;;  %s39_s29 = sshll.u32 %s5456_s4, 4  ;;  %s4002_s30 = smov [#allocation5]   ;;  %s40_s29 = int_to_ptr.hbm [resolvable:$true] %s39_s29 }
   0x3   :  { %s41_s9 = sshll.u32 %s4002_s30, 4  ;;  %s26_s12 = sshll.u32 %s5455_s3, 4  ;;  %s42_s9 = int_to_ptr.vmem [resolvable:$true] %s41_s9  ;;  %s27_s12 = int_to_ptr.hbm [resolvable:$true] %s26_s12 }
   0x4   :  { %s4003_s13 = smov 256   ;;  %s4004_s14 = smov 16  }
   0x5   :  { %47 = dma.hbm_to_vmem [thread:$0]  %s40_s29, 8192, %s42_s9, [#allocation6], %s4003_s13, %s4003_s13, %s4004_s14  }
   0x6   :  { %s4005_s15 = smov [#allocation2]   ;;  %s54_s19 = sshll.u32 %s5458_s6, 4  ;;  %s55_s19 = int_to_ptr.hbm [resolvable:$true] %s54_s19 }
   0x7   :  { %s28_s16 = sshll.u32 %s4005_s15, 4  ;;  %s4006_s4 = smov [#allocation7]   ;;  %s29_s16 = int_to_ptr.vmem [resolvable:$true] %s28_s16 }
   0x8   :  { %34 = dma.hbm_to_vmem [thread:$0]  %s27_s12, 4096, %s29_s16, [#allocation3], %s4003_s13, %s4003_s13, %s4004_s14  }
   0x9   :  { %s56_s20 = sshll.u32 %s4006_s4, 4  ;;  %s4007_s21 = smov 128   ;;  %s57_s20 = int_to_ptr.vmem [resolvable:$true] %s56_s20 }
   0xa   :  { %s4008_s22 = smov 8  }
   0xb   :  { %62 = dma.hbm_to_vmem [thread:$0]  %s55_s19, 2048, %s57_s20, [#allocation6], %s4007_s21, %s4007_s21, %s4008_s22  }
   0xc   :  { %3996 = dma.done.wait [#allocation3], 4096  }
   0xd   :  { %3997 = vsyncadd [#allocation3], 4294963200 }
   0xe   :  { %3998 = dma.done.wait [#allocation6], 10240  }
   0xf   :  { %3999 = vsyncadd [#allocation6], 4294957056  ;;  %v4009_v0 = vmov 0   ;;  %v183_v1 = vld [vmem:[%s5452_s0] sm:$0xff]  ;;  %v3564_v3 = vld [vmem:[#allocation2 + $0xec] sm:$0xf0] }
  0x10   :  { %3640 = vset.pattern.permute.xlu0 %v4009_v0  ;;  %3641 = vset.pattern.permute.xlu1 %v4009_v0  ;;  %v3219_v2 = vld [vmem:[#allocation2 + $0xe0] sm:$0xf]  ;;  %v3227_v4 = vld [vmem:[#allocation2 + $0xe8] sm:$0xf]  ;;  %v3565_v6 = vld [vmem:[#allocation2 + $0xf4] sm:$0xf0] }
  0x11   :  { %3642 = vset.pattern.permute.xlu2 %v4009_v0  ;;  %194 = vperm.xlu0 %3640, %v183_v1   ;;  %v4069_v5 = vor.u32 %v3564_v3, %v3219_v2  ;;  %v3563_v7 = vld [vmem:[#allocation2 + $0xec] sm:$0xf]  ;;  %v3229_v8 = vld [vmem:[#allocation2 + $0xf8] sm:$0xf0]  ;;  %v4071_v9 = vor.u32 %v3565_v6, %v3227_v4  ;;  %v3562_v11 = vld [vmem:[#allocation2 + $0xe4] sm:$0xf] }
  0x12   :  { %v4073_v10 = vor.u32 %v3563_v7, %v3229_v8  ;;  %v3221_v12 = vld [vmem:[#allocation2 + $0xf0] sm:$0xf0]  ;;  %v3203_v13 = vld [vmem:[#allocation2 + $0xc0] sm:$0xf]  ;;  %v184_v14 = vld [vmem:[%s5452_s0 + $0x8] sm:$0xff]  ;;  %s4011_s19 = smov [#allocation8]  }
  0x13   :  { %5661 = vst [vmem:[#allocation12_spill] sm:$0xff] %v4069_v5  ;;  %539 = vmatpush.bf16.msra.mxu0 %v4069_v5  ;;  %v4079_v15 = vor.u32 %v3562_v11, %v3221_v12  ;;  %v3560_v16 = vld [vmem:[#allocation2 + $0xcc] sm:$0xf0]  ;;  %v3211_v17 = vld [vmem:[#allocation2 + $0xc8] sm:$0xf]  ;;  %565 = vmatpush.bf16.msra.mxu2 %v4071_v9  ;;  %s3089_s4 = sshll.u32 %s4011_s19, 4  ;;  %s3090_s4 = int_to_ptr.vmem [resolvable:$true] %s3089_s4 }
  0x14   :  { %5662 = vst [vmem:[#allocation13_spill] sm:$0xff] %v4071_v9  ;;  %v3561_v18 = vld [vmem:[#allocation2 + $0xd4] sm:$0xf0]  ;;  %578 = vmatpush.bf16.msra.mxu3 %v4073_v10  ;;  %v4083_v19 = vor.u32 %v3560_v16, %v3203_v13  ;;  %v3559_v21 = vld [vmem:[#allocation2 + $0xcc] sm:$0xf]  ;;  %v189_v36 = vld [vmem:[%s5452_s0 + $0x30] sm:$0xff] }
  0x15   :  { %5663 = vst [vmem:[#allocation14_spill] sm:$0xff] %v4073_v10  ;;  %v4085_v20 = vor.u32 %v3561_v18, %v3211_v17  ;;  %v3213_v22 = vld [vmem:[#allocation2 + $0xd8] sm:$0xf0]  ;;  %v3558_v23 = vld [vmem:[#allocation2 + $0xc4] sm:$0xf]  ;;  %552 = vmatpush.bf16.msra.mxu1 %v4079_v15  ;;  %s3091_s22 = sshll.u32 %s5460_s8, 4  ;;  %s3092_s22 = int_to_ptr.hbm [resolvable:$true] %s3091_s22 }
  0x16   :  { %5664 = vst [vmem:[#allocation15_spill] sm:$0xff] %v4079_v15  ;;  %v4088_v24 = vor.u32 %v3559_v21, %v3213_v22  ;;  %v3205_v25 = vld [vmem:[#allocation2 + $0xd0] sm:$0xf0]  ;;  %v3187_v26 = vld [vmem:[#allocation2 + $0xa0] sm:$0xf] }
  0x17   :  { %5665 = vst [vmem:[#allocation16_spill] sm:$0xff] %v4083_v19  ;;  %v3556_v27 = vld [vmem:[#allocation2 + $0xac] sm:$0xf0]  ;;  %v4090_v28 = vor.u32 %v3558_v23, %v3205_v25  ;;  %v3195_v29 = vld [vmem:[#allocation2 + $0xa8] sm:$0xf]  ;;  %540 = vmatpush.bf16.msra.mxu0 %v4083_v19  ;;  %566 = vmatpush.bf16.msra.mxu2 %v4085_v20 }
  0x18   :  { %5666 = vst [vmem:[#allocation17_spill] sm:$0xff] %v4085_v20  ;;  %v3557_v30 = vld [vmem:[#allocation2 + $0xb4] sm:$0xf0]  ;;  %v3555_v31 = vld [vmem:[#allocation2 + $0xac] sm:$0xf]  ;;  %v4093_v32 = vor.u32 %v3556_v27, %v3187_v26  ;;  %579 = vmatpush.bf16.msra.mxu3 %v4088_v24 }
  0x19   :  { %5667 = vst [vmem:[#allocation18_spill] sm:$0xff] %v4088_v24  ;;  %v3197_v33 = vld [vmem:[#allocation2 + $0xb8] sm:$0xf0]  ;;  %199 = vperm.xlu0 %3640, %v184_v14   ;;  %v4096_v34 = vor.u32 %v3557_v30, %v3195_v29  ;;  %553 = vmatpush.bf16.msra.mxu1 %v4090_v28  ;;  %v3554_v37 = vld [vmem:[#allocation2 + $0xa4] sm:$0xf] }
  0x1a   :  { %5668 = vst [vmem:[#allocation19_spill] sm:$0xff] %v4090_v28  ;;  %v4100_v35 = vor.u32 %v3555_v31, %v3197_v33  ;;  %v3189_v38 = vld [vmem:[#allocation2 + $0xb0] sm:$0xf0]  ;;  %v3171_v40 = vld [vmem:[#allocation2 + $0x80] sm:$0xf] }
  0x1b   :  { %5669 = vst [vmem:[#allocation20_spill] sm:$0xff] %v4093_v32  ;;  %541 = vmatpush.bf16.msra.mxu0 %v4093_v32  ;;  %567 = vmatpush.bf16.msra.mxu2 %v4096_v34  ;;  %v4108_v39 = vor.u32 %v3554_v37, %v3189_v38  ;;  %v3552_v41 = vld [vmem:[#allocation2 + $0x8c] sm:$0xf0]  ;;  %v3179_v42 = vld [vmem:[#allocation2 + $0x88] sm:$0xf] }
  0x1c   :  { %5670 = vst [vmem:[#allocation21_spill] sm:$0xff] %v4096_v34  ;;  %580 = vmatpush.bf16.msra.mxu3 %v4100_v35  ;;  %v4111_v43 = vor.u32 %v3552_v41, %v3171_v40  ;;  %v3553_v44 = vld [vmem:[#allocation2 + $0x94] sm:$0xf0]  ;;  %v3551_v45 = vld [vmem:[#allocation2 + $0x8c] sm:$0xf] }
  0x1d   :  { %5671 = vst [vmem:[#allocation22_spill] sm:$0xff] %v4100_v35  ;;  %554 = vmatpush.bf16.msra.mxu1 %v4108_v39  ;;  %v3181_v46 = vld [vmem:[#allocation2 + $0x98] sm:$0xf0]  ;;  %v4113_v47 = vor.u32 %v3553_v44, %v3179_v42  ;;  %v3550_v49 = vld [vmem:[#allocation2 + $0x84] sm:$0xf] }
  0x1e   :  { %5672 = vst [vmem:[#allocation23_spill] sm:$0xff] %v4108_v39  ;;  %v4115_v48 = vor.u32 %v3551_v45, %v3181_v46  ;;  %v3173_v50 = vld [vmem:[#allocation2 + $0x90] sm:$0xf0]  ;;  %v3155_v52 = vld [vmem:[#allocation2 + $0x60] sm:$0xf] }
  0x1f   :  { %5673 = vst [vmem:[#allocation24_spill] sm:$0xff] %v4111_v43  ;;  %542 = vmatpush.bf16.msra.mxu0 %v4111_v43  ;;  %v4118_v51 = vor.u32 %v3550_v49, %v3173_v50  ;;  %568 = vmatpush.bf16.msra.mxu2 %v4113_v47  ;;  %v3548_v53 = vld [vmem:[#allocation2 + $0x6c] sm:$0xf0]  ;;  %v3163_v54 = vld [vmem:[#allocation2 + $0x68] sm:$0xf] }
  0x20   :  { %5674 = vst [vmem:[#allocation25_spill] sm:$0xff] %v4113_v47  ;;  %581 = vmatpush.bf16.msra.mxu3 %v4115_v48  ;;  %v4123_v55 = vor.u32 %v3548_v53, %v3155_v52  ;;  %v3549_v56 = vld [vmem:[#allocation2 + $0x74] sm:$0xf0]  ;;  %v3547_v57 = vld [vmem:[#allocation2 + $0x6c] sm:$0xf] }
  0x21   :  { %224 = vperm.xlu0 %3640, %v189_v36   ;;  %5675 = vst [vmem:[#allocation26_spill] sm:$0xff] %v4115_v48  ;;  %555 = vmatpush.bf16.msra.mxu1 %v4118_v51  ;;  %v3165_v58 = vld [vmem:[#allocation2 + $0x78] sm:$0xf0]  ;;  %v4125_v59 = vor.u32 %v3549_v56, %v3163_v54  ;;  %v3546_v61 = vld [vmem:[#allocation2 + $0x64] sm:$0xf] }
  0x22   :  { %5676 = vst [vmem:[#allocation27_spill] sm:$0xff] %v4118_v51  ;;  %v4127_v60 = vor.u32 %v3547_v57, %v3165_v58  ;;  %v3157_v62 = vld [vmem:[#allocation2 + $0x70] sm:$0xf0]  ;;  %v3139_v0 = vld [vmem:[#allocation2 + $0x40] sm:$0xf] }
  0x23   :  { %5677 = vst [vmem:[#allocation28_spill] sm:$0xff] %v4123_v55  ;;  %543 = vmatpush.bf16.msra.mxu0 %v4123_v55  ;;  %v4130_v63 = vor.u32 %v3546_v61, %v3157_v62  ;;  %569 = vmatpush.bf16.msra.mxu2 %v4125_v59  ;;  %v3544_v1 = vld [vmem:[#allocation2 + $0x4c] sm:$0xf0]  ;;  %v3147_v2 = vld [vmem:[#allocation2 + $0x48] sm:$0xf] }
  0x24   :  { %5678 = vst [vmem:[#allocation29_spill] sm:$0xff] %v4125_v59  ;;  %582 = vmatpush.bf16.msra.mxu3 %v4127_v60  ;;  %v4135_v3 = vor.u32 %v3544_v1, %v3139_v0  ;;  %v3545_v4 = vld [vmem:[#allocation2 + $0x54] sm:$0xf0]  ;;  %v3543_v6 = vld [vmem:[#allocation2 + $0x4c] sm:$0xf] }
  0x25   :  { %5679 = vst [vmem:[#allocation30_spill] sm:$0xff] %v4127_v60  ;;  %556 = vmatpush.bf16.msra.mxu1 %v4130_v63  ;;  %v3149_v7 = vld [vmem:[#allocation2 + $0x58] sm:$0xf0]  ;;  %v4137_v8 = vor.u32 %v3545_v4, %v3147_v2  ;;  %v3542_v12 = vld [vmem:[#allocation2 + $0x44] sm:$0xf] }
  0x26   :  { %5680 = vst [vmem:[#allocation31_spill] sm:$0xff] %v4130_v63  ;;  %v4139_v11 = vor.u32 %v3543_v6, %v3149_v7  ;;  %v3141_v13 = vld [vmem:[#allocation2 + $0x50] sm:$0xf0]  ;;  %v4144_v14 = vld [vmem:[%s5453_s1] sm:$0xf] }
  0x27   :  { %5681 = vst [vmem:[#allocation32_spill] sm:$0xff] %v4135_v3  ;;  %544 = vmatpush.bf16.msra.mxu0 %v4135_v3  ;;  %v4147_v16 = vor.u32 %v3542_v12, %v3141_v13  ;;  %570 = vmatpush.bf16.msra.mxu2 %v4137_v8  ;;  %v3123_v17 = vld [vmem:[#allocation2 + $0x20] sm:$0xf]  ;;  %v3540_v18 = vld [vmem:[#allocation2 + $0x2c] sm:$0xf0]  ;;  %v4159_v33 = vperm.slane %v4144_v14, 0 }
  0x28   :  { %5682 = vst [vmem:[#allocation33_spill] sm:$0xff] %v4137_v8  ;;  %583 = vmatpush.bf16.msra.mxu3 %v4139_v11  ;;  %v3131_v21 = vld [vmem:[#allocation2 + $0x28] sm:$0xf]  ;;  %v4152_v22 = vor.u32 %v3540_v18, %v3123_v17  ;;  %v3541_v23 = vld [vmem:[#allocation2 + $0x34] sm:$0xf0]  ;;  %v4162_v36 = vperm.slane %v4144_v14, 1 }
  0x29   :  { %5683 = vst [vmem:[#allocation34_spill] sm:$0xff] %v4139_v11  ;;  %557 = vmatpush.bf16.msra.mxu1 %v4147_v16  ;;  %v3539_v25 = vld [vmem:[#allocation2 + $0x2c] sm:$0xf]  ;;  %v3133_v26 = vld [vmem:[#allocation2 + $0x38] sm:$0xf0]  ;;  %v4154_v27 = vor.u32 %v3541_v23, %v3131_v21 }
  0x2a   :  { %5684 = vst [vmem:[#allocation35_spill] sm:$0xff] %v4147_v16  ;;  %v4156_v29 = vor.u32 %v3539_v25, %v3133_v26  ;;  %v3538_v30 = vld [vmem:[#allocation2 + $0x24] sm:$0xf]  ;;  %v3125_v31 = vld [vmem:[#allocation2 + $0x30] sm:$0xf0] }
  0x2b   :  { %5685 = vst [vmem:[#allocation36_spill] sm:$0xff] %v4152_v22  ;;  %545 = vmatpush.bf16.msra.mxu0 %v4152_v22  ;;  %v4165_v37 = vor.u32 %v3538_v30, %v3125_v31  ;;  %571 = vmatpush.bf16.msra.mxu2 %v4154_v27  ;;  %v3107_v38 = vld [vmem:[#allocation2] sm:$0xf]  ;;  %v3536_v40 = vld [vmem:[#allocation2 + $0xc] sm:$0xf0] }
  0x2c   :  { %5686 = vst [vmem:[#allocation37_spill] sm:$0xff] %v4154_v27  ;;  %584 = vmatpush.bf16.msra.mxu3 %v4156_v29  ;;  %v3115_v41 = vld [vmem:[#allocation2 + $0x8] sm:$0xf]  ;;  %v4170_v42 = vor.u32 %v3536_v40, %v3107_v38  ;;  %v3537_v44 = vld [vmem:[#allocation2 + $0x14] sm:$0xf0] }
  0x2d   :  { %5687 = vst [vmem:[#allocation38_spill] sm:$0xff] %v4156_v29  ;;  %558 = vmatpush.bf16.msra.mxu1 %v4165_v37  ;;  %v3535_v45 = vld [vmem:[#allocation2 + $0xc] sm:$0xf]  ;;  %v3117_v46 = vld [vmem:[#allocation2 + $0x18] sm:$0xf0]  ;;  %v4172_v49 = vor.u32 %v3537_v44, %v3115_v41  ;;  %v4203_v41 = vperm.slane %v4144_v14, 3 }
  0x2e   :  { %5688 = vst [vmem:[#allocation39_spill] sm:$0xff] %v4159_v33  ;;  %v4174_v50 = vor.u32 %v3535_v45, %v3117_v46  ;;  %v3347_v52 = vld [vmem:[#allocation5 + $0xe0] sm:$0xf]  ;;  %v3596_v53 = vld [vmem:[#allocation5 + $0xec] sm:$0xf0] }
  0x2f   :  { %5689 = vst [vmem:[#allocation40_spill] sm:$0xff] %v4162_v36  ;;  %v3594_v54 = vld [vmem:[#allocation5 + $0xe4] sm:$0xf]  ;;  %v4179_v56 = vld [vmem:[%s5454_s2] sm:$0xf]  ;;  %546 = vmatpush.bf16.msra.mxu0 %v4170_v42  ;;  %v4182_v57 = vor.u32 %v3596_v53, %v3347_v52  ;;  %572 = vmatpush.bf16.msra.mxu2 %v4172_v49 }
  0x30   :  { %5690 = vst [vmem:[#allocation41_spill] sm:$0xff] %v4165_v37  ;;  %v3349_v58 = vld [vmem:[#allocation5 + $0xf0] sm:$0xf0]  ;;  %v3626_v61 = vld [vmem:[#allocation5 + $0x1e4] sm:$0xf]  ;;  %585 = vmatpush.bf16.msra.mxu3 %v4174_v50  ;;  %v4206_v44 = vperm.slane %v4179_v56, 0 }
  0x31   :  { %5691 = vst [vmem:[#allocation42_spill] sm:$0xff] %v4170_v42  ;;  %v3477_v62 = vld [vmem:[#allocation5 + $0x1f0] sm:$0xf0]  ;;  %v4186_v0 = vor.u32 %v3594_v54, %v3349_v58  ;;  %v3534_v2 = vld [vmem:[#allocation2 + $0x4] sm:$0xf] }
  0x32   :  { %5692 = vst [vmem:[#allocation43_spill] sm:$0xff] %v4172_v49  ;;  %v4188_v1 = vor.u32 %v3626_v61, %v3477_v62  ;;  %v3109_v4 = vld [vmem:[#allocation2 + $0x10] sm:$0xf0]  ;;  %v3475_v6 = vld [vmem:[#allocation5 + $0x1e0] sm:$0xf] }
  0x33   :  { %5693 = vst [vmem:[#allocation44_spill] sm:$0xff] %v4174_v50  ;;  %916 = vmatpush.bf16.msrb.mxu0 %v4182_v57  ;;  %v4191_v7 = vor.u32 %v3534_v2, %v3109_v4  ;;  %v3628_v12 = vld [vmem:[#allocation5 + $0x1ec] sm:$0xf0]  ;;  %v3331_v13 = vld [vmem:[#allocation5 + $0xc0] sm:$0xf]  ;;  %942 = vmatpush.bf16.msrb.mxu2 %v4186_v0  ;;  %v4219_v4 = vperm.slane %v4179_v56, 1 }
  0x34   :  { %5694 = vst [vmem:[#allocation45_spill] sm:$0xff] %v4182_v57  ;;  %v3592_v17 = vld [vmem:[#allocation5 + $0xcc] sm:$0xf0]  ;;  %955 = vmatpush.bf16.msrb.mxu3 %v4188_v1  ;;  %v4195_v18 = vor.u32 %v3628_v12, %v3475_v6  ;;  %v3590_v23 = vld [vmem:[#allocation5 + $0xc4] sm:$0xf]  ;;  %v4222_v6 = vperm.slane %v4179_v56, 3 }
  0x35   :  { %5695 = vst [vmem:[#allocation46_spill] sm:$0xff] %v4186_v0  ;;  %v4197_v21 = vor.u32 %v3592_v17, %v3331_v13  ;;  %v3333_v25 = vld [vmem:[#allocation5 + $0xd0] sm:$0xf0]  ;;  %v3622_v26 = vld [vmem:[#allocation5 + $0x1c4] sm:$0xf]  ;;  %559 = vmatpush.bf16.msra.mxu1 %v4191_v7 }
  0x36   :  { %5696 = vst [vmem:[#allocation47_spill] sm:$0xff] %v4188_v1  ;;  %v4200_v30 = vor.u32 %v3590_v23, %v3333_v25  ;;  %v3461_v31 = vld [vmem:[#allocation5 + $0x1d0] sm:$0xf0]  ;;  %v3459_v38 = vld [vmem:[#allocation5 + $0x1c0] sm:$0xf] }
  0x37   :  { %5697 = vst [vmem:[#allocation48_spill] sm:$0xff] %v4191_v7  ;;  %v3624_v40 = vld [vmem:[#allocation5 + $0x1cc] sm:$0xf0]  ;;  %v4209_v45 = vor.u32 %v3622_v26, %v3461_v31  ;;  %917 = vmatpush.bf16.msrb.mxu0 %v4197_v21  ;;  %v3315_v52 = vld [vmem:[#allocation5 + $0xa0] sm:$0xf] }
  0x38   :  { %5698 = vst [vmem:[#allocation49_spill] sm:$0xff] %v4195_v18  ;;  %v4211_v46 = vor.u32 %v3624_v40, %v3459_v38  ;;  %v3588_v53 = vld [vmem:[#allocation5 + $0xac] sm:$0xf0]  ;;  %v3586_v54 = vld [vmem:[#allocation5 + $0xa4] sm:$0xf]  ;;  %943 = vmatpush.bf16.msrb.mxu2 %v4200_v30 }
  0x39   :  { %5699 = vst [vmem:[#allocation50_spill] sm:$0xff] %v4197_v21  ;;  %929 = vmatpush.bf16.msrb.mxu1 %v4195_v18  ;;  %956 = vmatpush.bf16.msrb.mxu3 %v4209_v45  ;;  %v4216_v58 = vor.u32 %v3588_v53, %v3315_v52  ;;  %v3317_v61 = vld [vmem:[#allocation5 + $0xb0] sm:$0xf0]  ;;  %v3618_v62 = vld [vmem:[#allocation5 + $0x1a4] sm:$0xf] }
  0x3a   :  { %5700 = vst [vmem:[#allocation51_spill] sm:$0xff] %v4200_v30  ;;  %v3445_v2 = vld [vmem:[#allocation5 + $0x1b0] sm:$0xf0]  ;;  %v4224_v12 = vor.u32 %v3586_v54, %v3317_v61  ;;  %v3443_v17 = vld [vmem:[#allocation5 + $0x1a0] sm:$0xf] }
  0x3b   :  { %5701 = vst [vmem:[#allocation52_spill] sm:$0xff] %v4203_v41  ;;  %v4226_v13 = vor.u32 %v3618_v62, %v3445_v2  ;;  %v3620_v23 = vld [vmem:[#allocation5 + $0x1ac] sm:$0xf0]  ;;  %918 = vmatpush.bf16.msrb.mxu0 %v4216_v58  ;;  %v3299_v52 = vld [vmem:[#allocation5 + $0x80] sm:$0xf] }
  0x3c   :  { %5702 = vst [vmem:[#allocation53_spill] sm:$0xff] %v4206_v44  ;;  %v4231_v26 = vor.u32 %v3620_v23, %v3443_v17  ;;  %v3584_v53 = vld [vmem:[#allocation5 + $0x8c] sm:$0xf0]  ;;  %v3582_v54 = vld [vmem:[#allocation5 + $0x84] sm:$0xf]  ;;  %944 = vmatpush.bf16.msrb.mxu2 %v4224_v12 }
  0x3d   :  { %5703 = vst [vmem:[#allocation54_spill] sm:$0xff] %v4209_v45  ;;  %930 = vmatpush.bf16.msrb.mxu1 %v4211_v46  ;;  %957 = vmatpush.bf16.msrb.mxu3 %v4226_v13  ;;  %v4242_v61 = vor.u32 %v3584_v53, %v3299_v52  ;;  %v3301_v62 = vld [vmem:[#allocation5 + $0x90] sm:$0xf0]  ;;  %v3614_v2 = vld [vmem:[#allocation5 + $0x184] sm:$0xf] }
  0x3e   :  { %5704 = vst [vmem:[#allocation55_spill] sm:$0xff] %v4211_v46  ;;  %v3429_v17 = vld [vmem:[#allocation5 + $0x190] sm:$0xf0]  ;;  %v4248_v45 = vor.u32 %v3582_v54, %v3301_v62  ;;  %v3610_v62 = vld [vmem:[#allocation5 + $0x164] sm:$0xf] }
  0x3f   :  { %5705 = vst [vmem:[#allocation56_spill] sm:$0xff] %v4216_v58  ;;  %v3616_v58 = vld [vmem:[#allocation5 + $0x18c] sm:$0xf0]  ;;  %919 = vmatpush.bf16.msrb.mxu0 %v4242_v61  ;;  %v3285_v54 = vld [vmem:[#allocation5 + $0x70] sm:$0xf0] }
  0x40   :  { %5706 = vst [vmem:[#allocation57_spill] sm:$0xff] %v4219_v4  ;;  %945 = vmatpush.bf16.msrb.mxu2 %v4248_v45 }
  0x41   :  { %5707 = vst [vmem:[#allocation58_spill] sm:$0xff] %v4222_v6  ;;  %931 = vmatpush.bf16.msrb.mxu1 %v4231_v26 }
  0x42   :  { %5708 = vst [vmem:[#allocation59_spill] sm:$0xff] %v4224_v12  ;;  %v4250_v12 = vor.u32 %v3614_v2, %v3429_v17  ;;  %v3413_v2 = vld [vmem:[#allocation5 + $0x170] sm:$0xf0] }
  0x43   :  { %5709 = vst [vmem:[#allocation60_spill] sm:$0xff] %v4226_v13 }
  0x44   :  { %5710 = vst [vmem:[#allocation61_spill] sm:$0xff] %v4231_v26  ;;  %958 = vmatpush.bf16.msrb.mxu3 %v4250_v12 }
  0x45   :  { %5711 = vst [vmem:[#allocation62_spill] sm:$0xff] %v4242_v61 }
  0x46   :  { %5712 = vst [vmem:[#allocation63_spill] sm:$0xff] %v4248_v45 }
  0x47   :  { %5713 = vst [vmem:[#allocation64_spill] sm:$0xff] %v4250_v12  ;;  %v3365_v12 = vld [vmem:[#allocation5 + $0x110] sm:$0xf0] }
  0x83   :  { %v4228_v25 = vpop.permute.xlu0 %194 }
  0x84   :  { %v241_v31 = vmul.f32 %v4159_v33, %v4228_v25  ;;  %v242_v38 = vmul.f32 %v4162_v36, %v4228_v25  ;;  %v244_v40 = vmul.f32 %v4203_v41, %v4228_v25  ;;  %v3427_v33 = vld [vmem:[#allocation5 + $0x180] sm:$0xf] }
  0x85   :  { %v4252_v13 = vor.u32 %v3616_v58, %v3427_v33  ;;  %v3612_v58 = vld [vmem:[#allocation5 + $0x16c] sm:$0xf0] }
  0x86   :  { %v283_v23 = vadd.f32 %v4206_v44, %v241_v31  ;;  %v284_v36 = vadd.f32 %v4219_v4, %v242_v38  ;;  %v286_v41 = vadd.f32 %v4222_v6, %v244_v40  ;;  %v3283_v31 = vld [vmem:[#allocation5 + $0x60] sm:$0xf]  ;;  %v3580_v38 = vld [vmem:[#allocation5 + $0x6c] sm:$0xf0]  ;;  %v3578_v40 = vld [vmem:[#allocation5 + $0x64] sm:$0xf] }
  0x87   :  { %5714 = vst [vmem:[#allocation65_spill] sm:$0xff] %v4252_v13  ;;  %v4257_v6 = vor.u32 %v3580_v38, %v3283_v31  ;;  %932 = vmatpush.bf16.msrb.mxu1 %v4252_v13  ;;  %v4260_v33 = vor.u32 %v3578_v40, %v3285_v54  ;;  %v3574_v31 = vld [vmem:[#allocation5 + $0x44] sm:$0xf]  ;;  %v3269_v38 = vld [vmem:[#allocation5 + $0x50] sm:$0xf0] }
  0x88   :  { %v3102_v52 = vmul.f32 -1.442695, %v283_v23  ;;  %v3103_v53 = vmul.f32 -1.442695, %v284_v36  ;;  %v3104_v46 = vmul.f32 -1.442695, %v286_v41  ;;  %v4262_v36 = vor.u32 %v3610_v62, %v3413_v2 }
  0x89   :  { %5715 = vst [vmem:[#allocation66_spill] sm:$0xff] %v4257_v6  ;;  %v3411_v41 = vld [vmem:[#allocation5 + $0x160] sm:$0xf]  ;;  %920 = vmatpush.bf16.msrb.mxu0 %v4257_v6  ;;  %946 = vmatpush.bf16.msrb.mxu2 %v4260_v33  ;;  %v3606_v40 = vld [vmem:[#allocation5 + $0x144] sm:$0xf]  ;;  %v4271_v62 = vor.u32 %v3574_v31, %v3269_v38 }
  0x8a   :  { %3644 = vpow2.f32 %v3102_v52  ;;  %5716 = vst [vmem:[#allocation67_spill] sm:$0xff] %v4260_v33  ;;  %v4265_v17 = vor.u32 %v3612_v58, %v3411_v41  ;;  %v3267_v23 = vld [vmem:[#allocation5 + $0x40] sm:$0xf]  ;;  %v3576_v52 = vld [vmem:[#allocation5 + $0x4c] sm:$0xf0]  ;;  %959 = vmatpush.bf16.msrb.mxu3 %v4262_v36  ;;  %v4280_v33 = vperm.slane %v4144_v14, 2 }
  0x8b   :  { %3646 = vpow2.f32 %v3103_v53  ;;  %5717 = vst [vmem:[#allocation68_spill] sm:$0xff] %v4262_v36  ;;  %v4269_v53 = vor.u32 %v3576_v52, %v3267_v23  ;;  %v3397_v54 = vld [vmem:[#allocation5 + $0x150] sm:$0xf0]  ;;  %v3608_v4 = vld [vmem:[#allocation5 + $0x14c] sm:$0xf0] }
  0x8c   :  { %3648 = vpow2.f32 %v3104_v46  ;;  %5718 = vst [vmem:[#allocation69_spill] sm:$0xff] %v4265_v17  ;;  %v4273_v2 = vor.u32 %v3606_v40, %v3397_v54  ;;  %v3395_v46 = vld [vmem:[#allocation5 + $0x140] sm:$0xf]  ;;  %933 = vmatpush.bf16.msrb.mxu1 %v4265_v17  ;;  %v3572_v36 = vld [vmem:[#allocation5 + $0x2c] sm:$0xf0] }
  0x8d   :  { %5719 = vst [vmem:[#allocation70_spill] sm:$0xff] %v4269_v53  ;;  %v4276_v41 = vor.u32 %v3608_v4, %v3395_v46  ;;  %921 = vmatpush.bf16.msrb.mxu0 %v4269_v53  ;;  %v3251_v44 = vld [vmem:[#allocation5 + $0x20] sm:$0xf]  ;;  %v3570_v23 = vld [vmem:[#allocation5 + $0x24] sm:$0xf]  ;;  %947 = vmatpush.bf16.msrb.mxu2 %v4271_v62 }
  0x8e   :  { %5720 = vst [vmem:[#allocation71_spill] sm:$0xff] %v4271_v62  ;;  %960 = vmatpush.bf16.msrb.mxu3 %v4273_v2  ;;  %v4286_v38 = vor.u32 %v3572_v36, %v3251_v44  ;;  %v3253_v4 = vld [vmem:[#allocation5 + $0x30] sm:$0xf0]  ;;  %v3602_v14 = vld [vmem:[#allocation5 + $0x124] sm:$0xf]  ;;  %v4297_v44 = vperm.slane %v4179_v56, 2  ;;  %v243_v36 = vmul.f32 %v4280_v33, %v4228_v25 }
  0x8f   :  { %5721 = vst [vmem:[#allocation72_spill] sm:$0xff] %v4273_v2  ;;  %v4290_v46 = vor.u32 %v3570_v23, %v3253_v4  ;;  %v3379_v62 = vld [vmem:[#allocation5 + $0x120] sm:$0xf]  ;;  %v3604_v2 = vld [vmem:[#allocation5 + $0x12c] sm:$0xf0] }
  0x90   :  { %5722 = vst [vmem:[#allocation73_spill] sm:$0xff] %v4276_v41  ;;  %v3645_v58 = vpop.eup %3644  ;;  %934 = vmatpush.bf16.msrb.mxu1 %v4276_v41  ;;  %v3568_v4 = vld [vmem:[#allocation5 + $0xc] sm:$0xf0]  ;;  %v3566_v41 = vld [vmem:[#allocation5 + $0x4] sm:$0xf]  ;;  %v4307_v6 = vor.u32 %v3604_v2, %v3379_v62  ;;  %v285_v25 = vadd.f32 %v4297_v44, %v243_v36 }
  0x91   :  { %v3647_v52 = vpop.eup %3646  ;;  %5723 = vst [vmem:[#allocation74_spill] sm:$0xff] %v4280_v33  ;;  %v4282_v31 = vadd.f32 1.0, %v3645_v58  ;;  %922 = vmatpush.bf16.msrb.mxu0 %v4286_v38  ;;  %v3381_v58 = vld [vmem:[#allocation5 + $0x130] sm:$0xf0]  ;;  %948 = vmatpush.bf16.msrb.mxu2 %v4290_v46  ;;  %v3600_v2 = vld [vmem:[#allocation5 + $0x10c] sm:$0xf0] }
  0x92   :  { %5724 = vst [vmem:[#allocation75_spill] sm:$0xff] %v4286_v38  ;;  %v3649_v40 = vpop.eup %3648  ;;  %v4288_v54 = vadd.f32 1.0, %v3647_v52  ;;  %v3235_v52 = vld [vmem:[#allocation5] sm:$0xf]  ;;  %v3237_v53 = vld [vmem:[#allocation5 + $0x10] sm:$0xf0]  ;;  %v4305_v17 = vor.u32 %v3602_v14, %v3381_v58 }
  0x93   :  { %5725 = vst [vmem:[#allocation76_spill] sm:$0xff] %v4290_v46  ;;  %3650 = vrcp.f32 %v4282_v31  ;;  %v4301_v23 = vadd.f32 1.0, %v3649_v40  ;;  %v3598_v38 = vld [vmem:[#allocation5 + $0x104] sm:$0xf]  ;;  %v4309_v56 = vor.u32 %v3568_v4, %v3235_v52  ;;  %v4312_v40 = vor.u32 %v3566_v41, %v3237_v53  ;;  %v3363_v14 = vld [vmem:[#allocation5 + $0x100] sm:$0xf] }
  0x94   :  { %3652 = vrcp.f32 %v4288_v54  ;;  %5726 = vst [vmem:[#allocation77_spill] sm:$0xff] %v4297_v44  ;;  %961 = vmatpush.bf16.msrb.mxu3 %v4305_v17  ;;  %935 = vmatpush.bf16.msrb.mxu1 %v4307_v6  ;;  %v4317_v45 = vor.u32 %v3598_v38, %v3365_v12  ;;  %v4322_v53 = vor.u32 %v3600_v2, %v3363_v14  ;;  %v328_v36 = vand.u32 2147483647, %v4282_v31 }
  0x95   :  { %3654 = vrcp.f32 %v4301_v23  ;;  %5727 = vst [vmem:[#allocation78_spill] sm:$0xff] %v4305_v17  ;;  %923 = vmatpush.bf16.msrb.mxu0 %v4309_v56  ;;  %949 = vmatpush.bf16.msrb.mxu2 %v4312_v40  ;;  %v330_v52 = vand.u32 2147483648, %v4282_v31  ;;  %v349_v38 = vand.u32 2147483648, %v4288_v54  ;;  %v347_v14 = vand.u32 2147483647, %v4288_v54 }
  0x96   :  { %5728 = vst [vmem:[#allocation79_spill] sm:$0xff] %v4307_v6  ;;  %3656 = vtanh.f32 %v285_v25  ;;  %vm324_vm2 = vweird.f32 %v4282_v31  ;;  %vm343_vm4 = vweird.f32 %v4288_v54  ;;  %vm329_vm5 = vcmp.eq.f32.partialorder %v328_v36, 8.507059e+37 }
  0x97   :  { %5729 = vst [vmem:[#allocation80_spill] sm:$0xff] %v4309_v56  ;;  %v331_v25 = vor.u32 1.1754944e-38, %v330_v52  ;;  %v350_v56 = vor.u32 1.1754944e-38, %v349_v38  ;;  %vm348_vm7 = vcmp.eq.f32.partialorder %v347_v14, 8.507059e+37  ;;  %vm363_vm9 = vweird.f32 %v4301_v23  ;;  %v3485_v52 = vld [vmem:[#allocation5 + $0x1f8] sm:$0xf0] }
  0x98   :  { %5730 = vst [vmem:[#allocation81_spill] sm:$0xff] %v4312_v40  ;;  %962 = vmatpush.bf16.msrb.mxu3 %v4317_v45  ;;  %936 = vmatpush.bf16.msrb.mxu1 %v4322_v53  ;;  %v3483_v38 = vld [vmem:[#allocation5 + $0x1e8] sm:$0xf] }
  0x99   :  { %v3651_v13 = vpop.eup %3650  ;;  %5731 = vst [vmem:[#allocation82_spill] sm:$0xff] %v4317_v45 }
  0x9a   :  { %v3653_v33 = vpop.eup %3652  ;;  %v320_v46 = vmul.f32 %v3651_v13, %v4282_v31  ;;  %5732 = vst [vmem:[#allocation83_spill] sm:$0xff] %v4322_v53  ;;  %vm325_vm0 = vweird.f32 %v3651_v13 }
  0x9b   :  { %v339_v62 = vmul.f32 %v3653_v33, %v4288_v54  ;;  %v3655_v41 = vpop.eup %3654  ;;  %vm344_vm1 = vweird.f32 %v3653_v33  ;;  %vm326_vm3 = vmor %vm324_vm2, %vm325_vm0 }
  0x9c   :  { %v321_v58 = vsub.f32 1.0, %v320_v46  ;;  %v359_v44 = vmul.f32 %v3655_v41, %v4301_v23  ;;  %vm345_vm6 = vmor %vm343_vm4, %vm344_vm1  ;;  %v3657_v45 = vpop.eup %3656  ;;  %vm364_vm8 = vweird.f32 %v3655_v41 }
  0x9d   :  { %v340_v4 = vsub.f32 1.0, %v339_v62  ;;  %vm365_vm10 = vmor %vm363_vm9, %vm364_vm8 }
  0x9e   :  { %v322_v12 = vmul.f32 %v3651_v13, %v321_v58  ;;  %v360_v40 = vsub.f32 1.0, %v359_v44  ;;  %v369_v44 = vand.u32 2147483648, %v4301_v23 }
  0x9f   :  { %v341_v46 = vmul.f32 %v3653_v33, %v340_v4 }
  0xa0   :  { %v323_v2 = vadd.f32 %v3651_v13, %v322_v12  ;;  %v361_v6 = vmul.f32 %v3655_v41, %v360_v40  ;;  %v3597_v40 = vld [vmem:[#allocation5 + $0xf4] sm:$0xf0] }
  0xa1   :  { %v342_v62 = vadd.f32 %v3653_v33, %v341_v46  ;;  %v3629_v46 = vld [vmem:[#allocation5 + $0x1f4] sm:$0xf0] }
  0xa2   :  { %v327_v58 = vsel %vm326_vm3, %v3651_v13, %v323_v2  ;;  %v362_v31 = vadd.f32 %v3655_v41, %v361_v6  ;;  %v367_v13 = vand.u32 2147483647, %v4301_v23  ;;  %v3627_v6 = vld [vmem:[#allocation5 + $0x1ec] sm:$0xf] }
  0xa3   :  { %v332_v17 = vsel %vm329_vm5, %v331_v25, %v327_v58  ;;  %v346_v53 = vsel %vm345_vm6, %v3653_v33, %v342_v62  ;;  %v370_v33 = vor.u32 1.1754944e-38, %v369_v44  ;;  %v3593_v25 = vld [vmem:[#allocation5 + $0xd4] sm:$0xf0]  ;;  %v4345_v62 = vor.u32 %v3627_v6, %v3485_v52  ;;  %v3469_v44 = vld [vmem:[#allocation5 + $0x1d8] sm:$0xf0] }
  0xa4   :  { %v351_v4 = vsel %vm348_vm7, %v350_v56, %v346_v53  ;;  %v374_v61 = vmul.f32 %v3657_v45, %v332_v17  ;;  %v366_v54 = vsel %vm365_vm10, %v3655_v41, %v362_v31  ;;  %vm368_vm11 = vcmp.eq.f32.partialorder %v367_v13, 8.507059e+37  ;;  %v3355_v56 = vld [vmem:[#allocation5 + $0xe8] sm:$0xf]  ;;  %v3357_v53 = vld [vmem:[#allocation5 + $0xf8] sm:$0xf0] }
  0xa5   :  { %v373_v12 = vmul.f32 0.0, %v351_v4  ;;  %v371_v17 = vsel %vm368_vm11, %v370_v33, %v366_v54  ;;  %v4341_v2 = vor.u32 %v3597_v40, %v3355_v56  ;;  %v3339_v41 = vld [vmem:[#allocation5 + $0xc8] sm:$0xf]  ;;  %5734 = vst [vmem:[#allocation85_spill] sm:$0xff] %v4345_v62  ;;  %v4347_v58 = vor.u32 %v3629_v46, %v3483_v38  ;;  %v3591_v4 = vld [vmem:[#allocation5 + $0xcc] sm:$0xf] }
  0xa6   :  { %v3623_v31 = vld [vmem:[#allocation5 + $0x1cc] sm:$0xf]  ;;  %v3467_v13 = vld [vmem:[#allocation5 + $0x1c8] sm:$0xf]  ;;  %v3625_v54 = vld [vmem:[#allocation5 + $0x1d4] sm:$0xf0]  ;;  %v4355_v33 = vor.u32 %v3593_v25, %v3339_v41 }
  0xa7   :  { %v4333_v26 = vadd.f32 %v374_v61, %v373_v12  ;;  %v3595_v61 = vld [vmem:[#allocation5 + $0xec] sm:$0xf]  ;;  %5735 = vst [vmem:[#allocation86_spill] sm:$0xff] %v4347_v58  ;;  %v3341_v12 = vld [vmem:[#allocation5 + $0xd8] sm:$0xf0] }
  0xa8   :  { %v4343_v23 = vor.u32 %v3595_v61, %v3357_v53  ;;  %5736 = vst [vmem:[#allocation87_spill] sm:$0xff] %v4355_v33  ;;  %v4357_v56 = vor.u32 %v3591_v4, %v3341_v12  ;;  %v3323_v40 = vld [vmem:[#allocation5 + $0xa8] sm:$0xf]  ;;  %v4363_v61 = vor.u32 %v3625_v54, %v3467_v13  ;;  %v3587_v53 = vld [vmem:[#allocation5 + $0xac] sm:$0xf] }
  0xa9   :  { %3658 = vtanh.f32 %v4333_v26  ;;  %v3325_v6 = vld [vmem:[#allocation5 + $0xb8] sm:$0xf0]  ;;  %v3451_v38 = vld [vmem:[#allocation5 + $0x1a8] sm:$0xf]  ;;  %v3621_v46 = vld [vmem:[#allocation5 + $0x1b4] sm:$0xf0] }
  0xaa   :  { %5733 = vst [vmem:[#allocation84_spill] sm:$0xff] %v4343_v23  ;;  %v3453_v52 = vld [vmem:[#allocation5 + $0x1b8] sm:$0xf0]  ;;  %v4369_v25 = vor.u32 %v3587_v53, %v3325_v6  ;;  %v3307_v4 = vld [vmem:[#allocation5 + $0x88] sm:$0xf] }
  0xab   :  { %5737 = vst [vmem:[#allocation88_spill] sm:$0xff] %v4357_v56  ;;  %v3585_v12 = vld [vmem:[#allocation5 + $0x94] sm:$0xf0]  ;;  %v3583_v13 = vld [vmem:[#allocation5 + $0x8c] sm:$0xf] }
  0xac   :  { %5739 = vst [vmem:[#allocation90_spill] sm:$0xff] %v4363_v61  ;;  %v3309_v54 = vld [vmem:[#allocation5 + $0x98] sm:$0xf0]  ;;  %v3291_v53 = vld [vmem:[#allocation5 + $0x68] sm:$0xf] }
  0xad   :  { %5741 = vst [vmem:[#allocation92_spill] sm:$0xff] %v4369_v25  ;;  %v3581_v6 = vld [vmem:[#allocation5 + $0x74] sm:$0xf0] }
  0xaf   :  { %v3659_v45 = vpop.eup %3658 }
  0xb0   :  { %v377_v36 = vmul.f32 %v3659_v45, %v371_v17  ;;  %v3589_v45 = vld [vmem:[#allocation5 + $0xb4] sm:$0xf0]  ;;  %v4361_v17 = vor.u32 %v3623_v31, %v3469_v44  ;;  %v4375_v44 = vor.u32 %v3621_v46, %v3451_v38  ;;  %v3579_v38 = vld [vmem:[#allocation5 + $0x6c] sm:$0xf]  ;;  %v3293_v46 = vld [vmem:[#allocation5 + $0x78] sm:$0xf0] }
  0xb1   :  { %v4367_v41 = vor.u32 %v3589_v45, %v3323_v40  ;;  %v4379_v40 = vor.u32 %v3585_v12, %v3307_v4  ;;  %v4381_v45 = vor.u32 %v3583_v13, %v3309_v54  ;;  %v4391_v4 = vor.u32 %v3581_v6, %v3291_v53  ;;  %v3275_v13 = vld [vmem:[#allocation5 + $0x48] sm:$0xf]  ;;  %v3577_v54 = vld [vmem:[#allocation5 + $0x54] sm:$0xf0]  ;;  %v3405_v53 = vld [vmem:[#allocation5 + $0x158] sm:$0xf0] }
  0xb2   :  { %v4339_v14 = vpack.c.bf16 %v377_v36, %v377_v36  ;;  %5738 = vst [vmem:[#allocation89_spill] sm:$0xff] %v4361_v17  ;;  %v3619_v36 = vld [vmem:[#allocation5 + $0x1ac] sm:$0xf]  ;;  %v4393_v12 = vor.u32 %v3579_v38, %v3293_v46  ;;  %v3403_v6 = vld [vmem:[#allocation5 + $0x148] sm:$0xf] }
  0xb3   :  { %5740 = vst [vmem:[#allocation91_spill] sm:$0xff] %v4367_v41  ;;  %v4373_v31 = vor.u32 %v3619_v36, %v3453_v52  ;;  %v3609_v38 = vld [vmem:[#allocation5 + $0x154] sm:$0xf0] }
  0xb4   :  { %547 = vmatmul.bf16.vlgmr.msra.gmra.mxu0 %v4339_v14  ;;  %560 = vmatmul.bf16.vlgmr.msra.gmra.mxu1 %v4339_v14  ;;  %5743 = vst [vmem:[#allocation94_spill] sm:$0xff] %v4375_v44 }
  0xb5   :  { %573 = vmatmul.bf16.vlgmr.msra.gmra.mxu2 %v4339_v14  ;;  %586 = vmatmul.bf16.vlgmr.msra.gmra.mxu3 %v4339_v14  ;;  %5742 = vst [vmem:[#allocation93_spill] sm:$0xff] %v4373_v31 }
  0xb6   :  { %968 = vmatpush.bf16.msra.mxu0 %v4341_v2  ;;  %994 = vmatpush.bf16.msra.mxu2 %v4343_v23  ;;  %5744 = vst [vmem:[#allocation95_spill] sm:$0xff] %v4379_v40  ;;  %v3387_v23 = vld [vmem:[#allocation5 + $0x128] sm:$0xf] }
  0xb7   :  { %1007 = vmatpush.bf16.msra.mxu3 %v4345_v62  ;;  %981 = vmatpush.bf16.msra.mxu1 %v4347_v58  ;;  %v3615_v62 = vld [vmem:[#allocation5 + $0x18c] sm:$0xf]  ;;  %v3435_v58 = vld [vmem:[#allocation5 + $0x188] sm:$0xf]  ;;  %5745 = vst [vmem:[#allocation96_spill] sm:$0xff] %v4381_v45 }
  0xb8   :  { %5748 = vst [vmem:[#allocation99_spill] sm:$0xff] %v4391_v4 }
  0xb9   :  { %5749 = vst [vmem:[#allocation100_spill] sm:$0xff] %v4393_v12 }
  0xba   :  { %969 = vmatpush.bf16.msra.mxu0 %v4355_v33  ;;  %995 = vmatpush.bf16.msra.mxu2 %v4357_v56  ;;  %v3437_v33 = vld [vmem:[#allocation5 + $0x198] sm:$0xf0]  ;;  %v3617_v56 = vld [vmem:[#allocation5 + $0x194] sm:$0xf0] }
  0xbb   :  { %1008 = vmatpush.bf16.msra.mxu3 %v4361_v17  ;;  %982 = vmatpush.bf16.msra.mxu1 %v4363_v61  ;;  %v4385_v36 = vor.u32 %v3615_v62, %v3437_v33  ;;  %v4387_v52 = vor.u32 %v3617_v56, %v3435_v58  ;;  %v3611_v17 = vld [vmem:[#allocation5 + $0x16c] sm:$0xf]  ;;  %v3419_v61 = vld [vmem:[#allocation5 + $0x168] sm:$0xf]  ;;  %v3277_v56 = vld [vmem:[#allocation5 + $0x58] sm:$0xf0] }
  0xbc   :  { %v3575_v33 = vld [vmem:[#allocation5 + $0x4c] sm:$0xf] }
  0xbd   :  { %5746 = vst [vmem:[#allocation97_spill] sm:$0xff] %v4385_v36 }
  0xbe   :  { %970 = vmatpush.bf16.msra.mxu0 %v4367_v41  ;;  %996 = vmatpush.bf16.msra.mxu2 %v4369_v25  ;;  %5747 = vst [vmem:[#allocation98_spill] sm:$0xff] %v4387_v52  ;;  %v3421_v41 = vld [vmem:[#allocation5 + $0x178] sm:$0xf0]  ;;  %v3613_v25 = vld [vmem:[#allocation5 + $0x174] sm:$0xf0] }
  0xbf   :  { %1009 = vmatpush.bf16.msra.mxu3 %v4373_v31  ;;  %983 = vmatpush.bf16.msra.mxu1 %v4375_v44  ;;  %v4397_v62 = vor.u32 %v3611_v17, %v3421_v41  ;;  %v4399_v58 = vor.u32 %v3613_v25, %v3419_v61  ;;  %v3607_v31 = vld [vmem:[#allocation5 + $0x14c] sm:$0xf]  ;;  %v4405_v17 = vor.u32 %v3577_v54, %v3275_v13  ;;  %v3259_v41 = vld [vmem:[#allocation5 + $0x28] sm:$0xf]  ;;  %v3573_v25 = vld [vmem:[#allocation5 + $0x34] sm:$0xf0] }
  0xc0   :  { %v4407_v61 = vor.u32 %v3575_v33, %v3277_v56  ;;  %v4411_v46 = vor.u32 %v3607_v31, %v3405_v53  ;;  %v3603_v44 = vld [vmem:[#allocation5 + $0x12c] sm:$0xf]  ;;  %v4417_v13 = vor.u32 %v3573_v25, %v3259_v41  ;;  %v3243_v33 = vld [vmem:[#allocation5 + $0x8] sm:$0xf]  ;;  %v3569_v56 = vld [vmem:[#allocation5 + $0x14] sm:$0xf0] }
  0xc1   :  { %5750 = vst [vmem:[#allocation101_spill] sm:$0xff] %v4397_v62  ;;  %v5763_v41 = vld [vmem:[#allocation65_spill] sm:$0xff]  ;;  %v5764_v25 = vld [vmem:[#allocation64_spill] sm:$0xff] }
  0xc2   :  { %971 = vmatpush.bf16.msra.mxu0 %v4379_v40  ;;  %997 = vmatpush.bf16.msra.mxu2 %v4381_v45  ;;  %5751 = vst [vmem:[#allocation102_spill] sm:$0xff] %v4399_v58  ;;  %v4010_v45 = vmov 0.0|0.0   ;;  %v3261_v40 = vld [vmem:[#allocation5 + $0x38] sm:$0xf0] }
  0xc3   :  { %1010 = vmatpush.bf16.msra.mxu3 %v4385_v36  ;;  %984 = vmatpush.bf16.msra.mxu1 %v4387_v52  ;;  %5752 = vst [vmem:[#allocation103_spill] sm:$0xff] %v4405_v17  ;;  %v4413_v36 = vor.u32 %v3609_v38, %v3403_v6  ;;  %v3571_v52 = vld [vmem:[#allocation5 + $0x2c] sm:$0xf]  ;;  %v3245_v38 = vld [vmem:[#allocation5 + $0x18] sm:$0xf0] }
  0xc4   :  { %924 = vmatmul.bf16.vlgmr.msrb.gmra.mxu0 %v4339_v14  ;;  %937 = vmatmul.bf16.vlgmr.msrb.gmra.mxu1 %v4010_v45  ;;  %5753 = vst [vmem:[#allocation104_spill] sm:$0xff] %v4407_v61  ;;  %v4419_v54 = vor.u32 %v3571_v52, %v3261_v40  ;;  %v3567_v6 = vld [vmem:[#allocation5 + $0xc] sm:$0xf]  ;;  %v4429_v40 = vor.u32 %v3569_v56, %v3243_v33  ;;  %v5765_v33 = vld [vmem:[#allocation66_spill] sm:$0xff]  ;;  %v5766_v56 = vld [vmem:[#allocation67_spill] sm:$0xff] }
  0xc5   :  { %950 = vmatmul.bf16.vlgmr.msrb.gmra.mxu2 %v4339_v14  ;;  %963 = vmatmul.bf16.vlgmr.msrb.gmra.mxu3 %v4010_v45  ;;  %v4431_v52 = vor.u32 %v3567_v6, %v3245_v38  ;;  %v5767_v6 = vld [vmem:[#allocation69_spill] sm:$0xff]  ;;  %v5768_v38 = vld [vmem:[#allocation68_spill] sm:$0xff] }
  0xc6   :  { %972 = vmatpush.bf16.msra.mxu0 %v4391_v4  ;;  %998 = vmatpush.bf16.msra.mxu2 %v4393_v12  ;;  %v3389_v4 = vld [vmem:[#allocation5 + $0x138] sm:$0xf0]  ;;  %v3605_v12 = vld [vmem:[#allocation5 + $0x134] sm:$0xf0] }
  0xc7   :  { %1011 = vmatpush.bf16.msra.mxu3 %v4397_v62  ;;  %985 = vmatpush.bf16.msra.mxu1 %v4399_v58  ;;  %v4423_v31 = vor.u32 %v3603_v44, %v3389_v4  ;;  %v4425_v53 = vor.u32 %v3605_v12, %v3387_v23  ;;  %v3599_v62 = vld [vmem:[#allocation5 + $0x10c] sm:$0xf]  ;;  %v3371_v58 = vld [vmem:[#allocation5 + $0x108] sm:$0xf]  ;;  %v5758_v12 = vld [vmem:[#allocation59_spill] sm:$0xff] }
  0xc8   :  { %v5757_v4 = vld [vmem:[#allocation56_spill] sm:$0xff] }
  0xca   :  { %973 = vmatpush.bf16.msra.mxu0 %v4405_v17  ;;  %999 = vmatpush.bf16.msra.mxu2 %v4407_v61  ;;  %v3373_v17 = vld [vmem:[#allocation5 + $0x118] sm:$0xf0]  ;;  %v3601_v61 = vld [vmem:[#allocation5 + $0x114] sm:$0xf0] }
  0xcb   :  { %1012 = vmatpush.bf16.msra.mxu3 %v4411_v46  ;;  %986 = vmatpush.bf16.msra.mxu1 %v4413_v36  ;;  %v4435_v23 = vor.u32 %v3599_v62, %v3373_v17  ;;  %v4437_v44 = vor.u32 %v3601_v61, %v3371_v58  ;;  %v5759_v62 = vld [vmem:[#allocation61_spill] sm:$0xff]  ;;  %v5760_v58 = vld [vmem:[#allocation60_spill] sm:$0xff]  ;;  %v5761_v17 = vld [vmem:[#allocation62_spill] sm:$0xff] }
  0xcc   :  { %v5762_v61 = vld [vmem:[#allocation63_spill] sm:$0xff] }
  0xcd   :  { %5754 = vst [vmem:[#allocation105_spill] sm:$0xff] %v4435_v23 }
  0xce   :  { %974 = vmatpush.bf16.msra.mxu0 %v4417_v13  ;;  %1000 = vmatpush.bf16.msra.mxu2 %v4419_v54 }
  0xcf   :  { %1013 = vmatpush.bf16.msra.mxu3 %v4423_v31  ;;  %987 = vmatpush.bf16.msra.mxu1 %v4425_v53 }
  0xd2   :  { %975 = vmatpush.bf16.msra.mxu0 %v4429_v40  ;;  %1001 = vmatpush.bf16.msra.mxu2 %v4431_v52 }
  0xd3   :  { %1014 = vmatpush.bf16.msra.mxu3 %v4435_v23  ;;  %988 = vmatpush.bf16.msra.mxu1 %v4437_v44 }
  0xd5   :  { %976 = vmatmul.bf16.vlgmr.msra.gmra.mxu0 %v4339_v14  ;;  %1002 = vmatmul.bf16.vlgmr.msra.gmra.mxu2 %v4339_v14  ;;  %v5755_v14 = vld [vmem:[#allocation55_spill] sm:$0xff] }
  0xd6   :  { %1147 = vmatpush.bf16.msrb.mxu0 %v4069_v5  ;;  %1173 = vmatpush.bf16.msrb.mxu2 %v4071_v9 }
  0xd7   :  { %1015 = vmatmul.bf16.vlgmr.msra.gmra.mxu3 %v4010_v45  ;;  %989 = vmatmul.bf16.vlgmr.msra.gmra.mxu1 %v4010_v45  ;;  %v5756_v45 = vld [vmem:[#allocation54_spill] sm:$0xff] }
  0xd8   :  { %1160 = vmatpush.bf16.msrb.mxu1 %v4079_v15  ;;  %1186 = vmatpush.bf16.msrb.mxu3 %v4073_v10 }
  0xda   :  { %1148 = vmatpush.bf16.msrb.mxu0 %v4083_v19  ;;  %1174 = vmatpush.bf16.msrb.mxu2 %v4085_v20 }
  0xdc   :  { %1161 = vmatpush.bf16.msrb.mxu1 %v4090_v28  ;;  %1187 = vmatpush.bf16.msrb.mxu3 %v4088_v24 }
  0xde   :  { %1149 = vmatpush.bf16.msrb.mxu0 %v4093_v32  ;;  %1175 = vmatpush.bf16.msrb.mxu2 %v4096_v34 }
  0xe0   :  { %1162 = vmatpush.bf16.msrb.mxu1 %v4108_v39  ;;  %1188 = vmatpush.bf16.msrb.mxu3 %v4100_v35 }
  0xe2   :  { %1150 = vmatpush.bf16.msrb.mxu0 %v4111_v43  ;;  %1176 = vmatpush.bf16.msrb.mxu2 %v4113_v47 }
  0xe4   :  { %1163 = vmatpush.bf16.msrb.mxu1 %v4118_v51  ;;  %1189 = vmatpush.bf16.msrb.mxu3 %v4115_v48 }
  0xe6   :  { %1151 = vmatpush.bf16.msrb.mxu0 %v4123_v55  ;;  %1177 = vmatpush.bf16.msrb.mxu2 %v4125_v59 }
  0xe8   :  { %1164 = vmatpush.bf16.msrb.mxu1 %v4130_v63  ;;  %1190 = vmatpush.bf16.msrb.mxu3 %v4127_v60 }
  0xea   :  { %1152 = vmatpush.bf16.msrb.mxu0 %v4135_v3  ;;  %1178 = vmatpush.bf16.msrb.mxu2 %v4137_v8 }
  0xec   :  { %1165 = vmatpush.bf16.msrb.mxu1 %v4147_v16  ;;  %1191 = vmatpush.bf16.msrb.mxu3 %v4139_v11 }
  0xee   :  { %1153 = vmatpush.bf16.msrb.mxu0 %v4152_v22  ;;  %1179 = vmatpush.bf16.msrb.mxu2 %v4154_v27 }
  0xf0   :  { %1166 = vmatpush.bf16.msrb.mxu1 %v4165_v37  ;;  %1192 = vmatpush.bf16.msrb.mxu3 %v4156_v29 }
  0xf2   :  { %1154 = vmatpush.bf16.msrb.mxu0 %v4170_v42  ;;  %1180 = vmatpush.bf16.msrb.mxu2 %v4172_v49 }
  0xf4   :  { %1167 = vmatpush.bf16.msrb.mxu1 %v4191_v7  ;;  %1193 = vmatpush.bf16.msrb.mxu3 %v4174_v50 }
  0xf6   :  { %1204 = vmatpush.bf16.msra.mxu0 %v4182_v57  ;;  %1230 = vmatpush.bf16.msra.mxu2 %v4186_v0 }
  0xf8   :  { %1217 = vmatpush.bf16.msra.mxu1 %v4195_v18  ;;  %1243 = vmatpush.bf16.msra.mxu3 %v4188_v1 }
  0xfa   :  { %1205 = vmatpush.bf16.msra.mxu0 %v4197_v21  ;;  %1231 = vmatpush.bf16.msra.mxu2 %v4200_v30 }
  0xfc   :  { %1218 = vmatpush.bf16.msra.mxu1 %v5755_v14  ;;  %1244 = vmatpush.bf16.msra.mxu3 %v5756_v45 }
  0xfe   :  { %1206 = vmatpush.bf16.msra.mxu0 %v5757_v4  ;;  %1232 = vmatpush.bf16.msra.mxu2 %v5758_v12  ;;  %v5769_v12 = vld [vmem:[#allocation70_spill] sm:$0xff] }
 0x100   :  { %1219 = vmatpush.bf16.msra.mxu1 %v5759_v62  ;;  %1245 = vmatpush.bf16.msra.mxu3 %v5760_v58  ;;  %v5770_v62 = vld [vmem:[#allocation71_spill] sm:$0xff]  ;;  %v5771_v58 = vld [vmem:[#allocation73_spill] sm:$0xff] }
 0x102   :  { %1207 = vmatpush.bf16.msra.mxu0 %v5761_v17  ;;  %1233 = vmatpush.bf16.msra.mxu2 %v5762_v61  ;;  %v5772_v17 = vld [vmem:[#allocation72_spill] sm:$0xff]  ;;  %v5773_v61 = vld [vmem:[#allocation75_spill] sm:$0xff] }
 0x104   :  { %1220 = vmatpush.bf16.msra.mxu1 %v5763_v41  ;;  %1246 = vmatpush.bf16.msra.mxu3 %v5764_v25  ;;  %v5774_v41 = vld [vmem:[#allocation76_spill] sm:$0xff]  ;;  %v5775_v25 = vld [vmem:[#allocation79_spill] sm:$0xff] }
 0x106   :  { %1208 = vmatpush.bf16.msra.mxu0 %v5765_v33  ;;  %1234 = vmatpush.bf16.msra.mxu2 %v5766_v56  ;;  %v5776_v33 = vld [vmem:[#allocation78_spill] sm:$0xff]  ;;  %v5777_v56 = vld [vmem:[#allocation80_spill] sm:$0xff] }
 0x108   :  { %1221 = vmatpush.bf16.msra.mxu1 %v5767_v6  ;;  %1247 = vmatpush.bf16.msra.mxu3 %v5768_v38  ;;  %v5778_v6 = vld [vmem:[#allocation81_spill] sm:$0xff]  ;;  %v5779_v38 = vld [vmem:[#allocation83_spill] sm:$0xff] }
 0x10a   :  { %1209 = vmatpush.bf16.msra.mxu0 %v5769_v12  ;;  %1235 = vmatpush.bf16.msra.mxu2 %v5770_v62  ;;  %v5780_v12 = vld [vmem:[#allocation82_spill] sm:$0xff]  ;;  %v200_v62 = vpop.permute.xlu0 %199 }
 0x10c   :  { %1222 = vmatpush.bf16.msra.mxu1 %v5771_v58  ;;  %1248 = vmatpush.bf16.msra.mxu3 %v5772_v17  ;;  %v5781_v58 = vld [vmem:[#allocation39_spill] sm:$0xff]  ;;  %v5782_v17 = vld [vmem:[#allocation40_spill] sm:$0xff] }
 0x10d   :  { %v245_v4 = vmul.f32 %v5781_v58, %v200_v62  ;;  %v246_v45 = vmul.f32 %v5782_v17, %v200_v62 }
 0x10e   :  { %1210 = vmatpush.bf16.msra.mxu0 %v5773_v61  ;;  %1236 = vmatpush.bf16.msra.mxu2 %v5774_v41  ;;  %v5783_v61 = vld [vmem:[#allocation53_spill] sm:$0xff] }
 0x10f   :  { %v287_v14 = vadd.f32 %v5783_v61, %v245_v4  ;;  %v5784_v41 = vld [vmem:[#allocation57_spill] sm:$0xff] }
 0x110   :  { %1223 = vmatpush.bf16.msra.mxu1 %v5775_v25  ;;  %1249 = vmatpush.bf16.msra.mxu3 %v5776_v33  ;;  %v288_v30 = vadd.f32 %v5784_v41, %v246_v45  ;;  %v4518_v45 = vld [vmem:[%s5457_s5] sm:$0xf] }
 0x112   :  { %1211 = vmatpush.bf16.msra.mxu0 %v5777_v56  ;;  %1237 = vmatpush.bf16.msra.mxu2 %v5778_v6  ;;  %v5785_v56 = vld [vmem:[#allocation52_spill] sm:$0xff] }
 0x113   :  { %v248_v18 = vmul.f32 %v5785_v56, %v200_v62 }
 0x114   :  { %1224 = vmatpush.bf16.msra.mxu1 %v5779_v38  ;;  %1250 = vmatpush.bf16.msra.mxu3 %v5780_v12  ;;  %v5786_v12 = vld [vmem:[#allocation58_spill] sm:$0xff] }
 0x115   :  { %v290_v38 = vadd.f32 %v5786_v12, %v248_v18  ;;  %v4522_v18 = vperm.slane %v4518_v45, 0 }
 0x117   :  { %5788 = vst [vmem:[#allocation106_spill] sm:$0xff] %v4522_v18 }
 0x131   :  { %v548_v25 = vpop.f32.mrf.mxu0  ;;  %v561_v21 = vpop.f32.mrf.mxu1 }
 0x132   :  { %v591_v33 = vadd.f32 %v548_v25, %v287_v14  ;;  %v592_v1 = vadd.f32 %v561_v21, %v288_v30  ;;  %v5787_v25 = vld [vmem:[#allocation74_spill] sm:$0xff] }
 0x134   :  { %v3489_v6 = vmul.f32 -1.442695, %v591_v33  ;;  %v3490_v50 = vmul.f32 -1.442695, %v592_v1  ;;  %v5789_v33 = vld [vmem:[#allocation77_spill] sm:$0xff] }
 0x136   :  { %3660 = vpow2.f32 %v3489_v6 }
 0x137   :  { %3662 = vpow2.f32 %v3490_v50  ;;  %v247_v50 = vmul.f32 %v5787_v25, %v200_v62  ;;  %v4529_v62 = vperm.slane %v4518_v45, 1 }
 0x138   :  { %v574_v7 = vpop.f32.mrf.mxu2  ;;  %v587_v58 = vpop.f32.mrf.mxu3 }
 0x139   :  { %v594_v0 = vadd.f32 %v587_v58, %v290_v38  ;;  %v550_v17 = vpop.f32.mrf.mxu0  ;;  %v563_v57 = vpop.f32.mrf.mxu1  ;;  %v289_v6 = vadd.f32 %v5789_v33, %v247_v50  ;;  %5790 = vst [vmem:[#allocation107_spill] sm:$0xff] %v4529_v62 }
 0x13b   :  { %v3491_v4 = vmul.f32 -1.442695, %v594_v0  ;;  %v593_v56 = vadd.f32 %v574_v7, %v289_v6  ;;  %v185_v7 = vld [vmem:[%s5452_s0 + $0x10] sm:$0xff] }
 0x13c   :  { %v3661_v21 = vpop.eup %3660  ;;  %204 = vperm.xlu1 %3641, %v185_v7  }
 0x13d   :  { %v3663_v30 = vpop.eup %3662  ;;  %v1023_v14 = vadd.f32 1.0, %v3661_v21  ;;  %3664 = vpow2.f32 %v3491_v4 }
 0x13e   :  { %v1042_v1 = vadd.f32 1.0, %v3663_v30 }
 0x13f   :  { %3666 = vrcp.f32 %v1023_v14  ;;  %v1033_v61 = vand.u32 2147483647, %v1023_v14  ;;  %v1035_v6 = vand.u32 2147483648, %v1023_v14  ;;  %vm1029_vm15 = vweird.f32 %v1023_v14 }
 0x140   :  { %3668 = vrcp.f32 %v1042_v1  ;;  %v576_v58 = vpop.f32.mrf.mxu2  ;;  %v589_v57 = vpop.f32.mrf.mxu3  ;;  %vm1048_vm14 = vweird.f32 %v1042_v1 }
 0x141   :  { %v925_v0 = vpop.f32.mrf.mxu0  ;;  %v938_v17 = vpop.f32.mrf.mxu1  ;;  %vm1034_vm2 = vcmp.eq.f32.partialorder %v1033_v61, 8.507059e+37 }
 0x142   :  { %v926_v38 = vadd.f32 %v925_v0, %v4522_v18 }
 0x143   :  { %v3665_v12 = vpop.eup %3664 }
 0x144   :  { %v4526_v21 = vadd.f32 1.0, %v3665_v12  ;;  %v939_v4 = vadd.f32 %v938_v17, %v926_v38  ;;  %v1054_v17 = vand.u32 2147483648, %v1042_v1 }
 0x145   :  { %v3667_v30 = vpop.eup %3666 }
 0x146   :  { %v3669_v25 = vpop.eup %3668  ;;  %v1025_v41 = vmul.f32 %v3667_v30, %v1023_v14  ;;  %3670 = vrcp.f32 %v4526_v21  ;;  %v3492_v50 = vmul.f32 -1.442695, %v939_v4  ;;  %vm1030_vm12 = vweird.f32 %v3667_v30 }
 0x147   :  { %v1044_v58 = vmul.f32 %v3669_v25, %v1042_v1  ;;  %3672 = vtanh.f32 %v593_v56  ;;  %vm1049_vm13 = vweird.f32 %v3669_v25  ;;  %vm1031_vm0 = vmor %vm1029_vm15, %vm1030_vm12  ;;  %vm1068_vm5 = vweird.f32 %v4526_v21 }
 0x148   :  { %v1026_v57 = vsub.f32 1.0, %v1025_v41  ;;  %v951_v33 = vpop.f32.mrf.mxu2  ;;  %v964_v0 = vpop.f32.mrf.mxu3  ;;  %v1052_v41 = vand.u32 2147483647, %v1042_v1  ;;  %3674 = vpow2.f32 %v3492_v50  ;;  %vm1050_vm1 = vmor %vm1048_vm14, %vm1049_vm13 }
 0x149   :  { %v1045_v12 = vsub.f32 1.0, %v1044_v58  ;;  %v952_v38 = vadd.f32 %v951_v33, %v4529_v62  ;;  %v927_v18 = vpop.f32.mrf.mxu0  ;;  %v940_v49 = vpop.f32.mrf.mxu1  ;;  %v1036_v58 = vor.u32 1.1754944e-38, %v1035_v6 }
 0x14a   :  { %v1027_v42 = vmul.f32 %v3667_v30, %v1026_v57  ;;  %v1055_v49 = vor.u32 1.1754944e-38, %v1054_v17  ;;  %vm1053_vm3 = vcmp.eq.f32.partialorder %v1052_v41, 8.507059e+37  ;;  %v1072_v17 = vand.u32 2147483647, %v4526_v21 }
 0x14b   :  { %v1046_v56 = vmul.f32 %v3669_v25, %v1045_v12  ;;  %v965_v4 = vadd.f32 %v964_v0, %v952_v38 }
 0x14c   :  { %v3671_v29 = vpop.eup %3670  ;;  %v1028_v37 = vadd.f32 %v3667_v30, %v1027_v42  ;;  %vm1073_vm7 = vcmp.eq.f32.partialorder %v1072_v17, 8.507059e+37 }
 0x14d   :  { %v1047_v27 = vadd.f32 %v3669_v25, %v1046_v56  ;;  %v1064_v22 = vmul.f32 %v3671_v29, %v4526_v21  ;;  %v3493_v33 = vmul.f32 -1.442695, %v965_v4  ;;  %v3673_v18 = vpop.eup %3672  ;;  %vm1069_vm4 = vweird.f32 %v3671_v29 }
 0x14e   :  { %v1032_v57 = vsel %vm1031_vm0, %v3667_v30, %v1028_v37  ;;  %v3675_v0 = vpop.eup %3674  ;;  %v186_v37 = vld [vmem:[%s5452_s0 + $0x18] sm:$0xff]  ;;  %v4549_v30 = vperm.slane %v4518_v45, 3  ;;  %vm1070_vm6 = vmor %vm1068_vm5, %vm1069_vm4 }
 0x14f   :  { %v1037_v50 = vsel %vm1034_vm2, %v1036_v58, %v1032_v57  ;;  %v1051_v7 = vsel %vm1050_vm1, %v3669_v25, %v1047_v27  ;;  %v1065_v12 = vsub.f32 1.0, %v1064_v22  ;;  %3676 = vpow2.f32 %v3493_v33  ;;  %209 = vperm.xlu1 %3641, %v186_v37  }
 0x150   :  { %v1056_v1 = vsel %vm1053_vm3, %v1055_v49, %v1051_v7  ;;  %v1079_v42 = vmul.f32 %v3673_v18, %v1037_v50  ;;  %v953_v14 = vpop.f32.mrf.mxu2  ;;  %v966_v38 = vpop.f32.mrf.mxu3  ;;  %v4538_v62 = vadd.f32 1.0, %v3675_v0  ;;  %5791 = vst [vmem:[#allocation108_spill] sm:$0xff] %v4549_v30  ;;  %v4559_v57 = vperm.slane %v4518_v45, 2 }
 0x151   :  { %v1078_v6 = vmul.f32 %v1056_v1, %v4333_v26  ;;  %v1066_v56 = vmul.f32 %v3671_v29, %v1065_v12  ;;  %v1074_v26 = vand.u32 2147483648, %v4526_v21 }
 0x152   :  { %v977_v4 = vpop.f32.mrf.mxu0  ;;  %3678 = vrcp.f32 %v4538_v62  ;;  %5792 = vst [vmem:[#allocation109_spill] sm:$0xff] %v4559_v57  ;;  %vm1092_vm10 = vweird.f32 %v4538_v62 }
 0x153   :  { %v4543_v61 = vadd.f32 %v1079_v42, %v1078_v6  ;;  %v1067_v27 = vadd.f32 %v3671_v29, %v1066_v56  ;;  %v1075_v49 = vor.u32 1.1754944e-38, %v1074_v26  ;;  %v978_v6 = vadd.f32 %v977_v4, %v4559_v57 }
 0x154   :  { %v990_v22 = vpop.f32.mrf.mxu1 }
 0x155   :  { %v3677_v25 = vpop.eup %3676  ;;  %3680 = vtanh.f32 %v4543_v61  ;;  %v1071_v58 = vsel %vm1070_vm6, %v3671_v29, %v1067_v27  ;;  %v190_v29 = vld [vmem:[%s5452_s0 + $0x38] sm:$0xff] }
 0x156   :  { %v4553_v41 = vadd.f32 1.0, %v3677_v25  ;;  %v1076_v1 = vsel %vm1073_vm7, %v1075_v49, %v1071_v58 }
 0x157   :  { %229 = vperm.xlu1 %3641, %v190_v29   ;;  %v5794_v29 = vld [vmem:[#allocation86_spill] sm:$0xff] }
 0x158   :  { %3682 = vrcp.f32 %v4553_v41  ;;  %v1003_v33 = vpop.f32.mrf.mxu2  ;;  %v4556_v18 = vpop.eup %3678  ;;  %v1117_v4 = vand.u32 2147483648, %v4553_v41  ;;  %vm1111_vm11 = vweird.f32 %v4553_v41 }
 0x159   :  { %v1004_v50 = vadd.f32 %v1003_v33, %v4549_v30  ;;  %v1088_v21 = vmul.f32 %v4556_v18, %v4538_v62  ;;  %v991_v33 = vadd.f32 %v990_v22, %v978_v6  ;;  %vm1093_vm8 = vweird.f32 %v4556_v18 }
 0x15a   :  { %v1016_v7 = vpop.f32.mrf.mxu3  ;;  %v979_v12 = vpop.f32.mrf.mxu0  ;;  %v1115_v22 = vand.u32 2147483647, %v4553_v41  ;;  %vm4588_vm12 = vmor %vm1092_vm10, %vm1093_vm8 }
 0x15b   :  { %v3681_v0 = vpop.eup %3680  ;;  %v1017_v42 = vadd.f32 %v1016_v7, %v1004_v50  ;;  %v1089_v45 = vsub.f32 1.0, %v1088_v21  ;;  %v5793_v7 = vld [vmem:[#allocation84_spill] sm:$0xff]  ;;  %v1098_v12 = vand.u32 2147483648, %v4538_v62 }
 0x15c   :  { %v992_v14 = vpop.f32.mrf.mxu1  ;;  %v1082_v38 = vmul.f32 %v3681_v0, %v1076_v1  ;;  %v5795_v0 = vld [vmem:[#allocation85_spill] sm:$0xff]  ;;  %v1096_v1 = vand.u32 2147483647, %v4538_v62  ;;  %vm1116_vm14 = vcmp.eq.f32.partialorder %v1115_v22, 8.507059e+37 }
 0x15d   :  { %v3494_v56 = vmul.f32 -1.442695, %v1017_v42  ;;  %v1090_v25 = vmul.f32 %v4556_v18, %v1089_v45  ;;  %v1118_v45 = vor.u32 1.1754944e-38, %v1117_v4  ;;  %v1099_v62 = vor.u32 1.1754944e-38, %v1098_v12  ;;  %v5805_v14 = vld [vmem:[#allocation93_spill] sm:$0xff] }
 0x15e   :  { %v3683_v37 = vpop.eup %3682  ;;  %v4568_v27 = vpack.c.bf16 %v1082_v38, %v1082_v38  ;;  %vm1097_vm15 = vcmp.eq.f32.partialorder %v1096_v1, 8.507059e+37  ;;  %v5808_v1 = vld [vmem:[#allocation96_spill] sm:$0xff] }
 0x15f   :  { %v1107_v26 = vmul.f32 %v3683_v37, %v4553_v41  ;;  %3684 = vpow2.f32 %v3494_v56  ;;  %v1091_v50 = vadd.f32 %v4556_v18, %v1090_v25  ;;  %vm1112_vm9 = vweird.f32 %v3683_v37  ;;  %v5798_v25 = vld [vmem:[#allocation87_spill] sm:$0xff]  ;;  %v5800_v41 = vld [vmem:[#allocation90_spill] sm:$0xff] }
 0x160   :  { %v1005_v17 = vpop.f32.mrf.mxu2  ;;  %1155 = vmatmul.bf16.vlgmr.msrb.gmra.mxu0 %v4568_v27  ;;  %1168 = vmatmul.bf16.vlgmr.msrb.gmra.mxu1 %v4568_v27  ;;  %3686 = vtanh.f32 %v991_v33  ;;  %vm1113_vm13 = vmor %vm1111_vm11, %vm1112_vm9 }
 0x161   :  { %v1108_v58 = vsub.f32 1.0, %v1107_v26  ;;  %1181 = vmatmul.bf16.vlgmr.msrb.gmra.mxu2 %v4568_v27  ;;  %1194 = vmatmul.bf16.vlgmr.msrb.gmra.mxu3 %v4568_v27  ;;  %v1095_v6 = vsel %vm4588_vm12, %v4556_v18, %v1091_v50  ;;  %v5799_v26 = vld [vmem:[#allocation88_spill] sm:$0xff] }
 0x162   :  { %v1018_v49 = vpop.f32.mrf.mxu3  ;;  %1256 = vmatpush.bf16.msrb.mxu0 %v4341_v2  ;;  %1282 = vmatpush.bf16.msrb.mxu2 %v5793_v7  ;;  %v5803_v18 = vld [vmem:[#allocation92_spill] sm:$0xff] }
 0x163   :  { %v1109_v21 = vmul.f32 %v3683_v37, %v1108_v58  ;;  %1269 = vmatpush.bf16.msrb.mxu1 %v5794_v29  ;;  %1295 = vmatpush.bf16.msrb.mxu3 %v5795_v0  ;;  %v5801_v58 = vld [vmem:[#allocation89_spill] sm:$0xff]  ;;  %v1100_v49 = vsel %vm1097_vm15, %v1099_v62, %v1095_v6  ;;  %v5809_v6 = vld [vmem:[#allocation98_spill] sm:$0xff] }
 0x164   :  { %v5810_v62 = vld [vmem:[#allocation97_spill] sm:$0xff] }
 0x165   :  { %v3685_v42 = vpop.eup %3684  ;;  %v1110_v38 = vadd.f32 %v3683_v37, %v1109_v21  ;;  %v5802_v21 = vld [vmem:[#allocation91_spill] sm:$0xff] }
 0x166   :  { %v1125_v56 = vadd.f32 1.0, %v3685_v42  ;;  %1257 = vmatpush.bf16.msrb.mxu0 %v5798_v25  ;;  %1283 = vmatpush.bf16.msrb.mxu2 %v5799_v26  ;;  %v3687_v50 = vpop.eup %3686  ;;  %v5804_v42 = vld [vmem:[#allocation94_spill] sm:$0xff] }
 0x167   :  { %v1114_v17 = vsel %vm1113_vm13, %v3683_v37, %v1110_v38  ;;  %1270 = vmatpush.bf16.msrb.mxu1 %v5800_v41  ;;  %1296 = vmatpush.bf16.msrb.mxu3 %v5801_v58  ;;  %v1142_v37 = vmul.f32 %v3687_v50, %v1100_v49  ;;  %v5807_v38 = vld [vmem:[#allocation95_spill] sm:$0xff]  ;;  %v5812_v49 = vld [vmem:[#allocation100_spill] sm:$0xff] }
 0x168   :  { %v1119_v33 = vsel %vm1116_vm14, %v1118_v45, %v1114_v17  ;;  %3688 = vrcp.f32 %v1125_v56  ;;  %vm1131_vm1 = vweird.f32 %v1125_v56 }
 0x169   :  { %v1141_v4 = vmul.f32 0.0, %v1119_v33  ;;  %v5811_v33 = vld [vmem:[#allocation99_spill] sm:$0xff] }
 0x16a   :  { %1258 = vmatpush.bf16.msrb.mxu0 %v5802_v21  ;;  %1284 = vmatpush.bf16.msrb.mxu2 %v5803_v18 }
 0x16b   :  { %1271 = vmatpush.bf16.msrb.mxu1 %v5804_v42  ;;  %1297 = vmatpush.bf16.msrb.mxu3 %v5805_v14  ;;  %v4603_v22 = vadd.f32 %v1142_v37, %v1141_v4  ;;  %v1137_v4 = vand.u32 2147483648, %v1125_v56  ;;  %v1135_v37 = vand.u32 2147483647, %v1125_v56 }
 0x16d   :  { %5806 = vst [vmem:[#allocation84_spill] sm:$0xff] %v4603_v22  ;;  %3690 = vtanh.f32 %v4603_v22  ;;  %v1138_v22 = vor.u32 1.1754944e-38, %v1137_v4  ;;  %vm1136_vm3 = vcmp.eq.f32.partialorder %v1135_v37, 8.507059e+37  ;;  %v5824_v4 = vld [vmem:[#allocation46_spill] sm:$0xff]  ;;  %v5826_v37 = vld [vmem:[#allocation44_spill] sm:$0xff] }
 0x16e   :  { %v3689_v12 = vpop.eup %3688  ;;  %1259 = vmatpush.bf16.msrb.mxu0 %v5807_v38  ;;  %1285 = vmatpush.bf16.msrb.mxu2 %v5808_v1  ;;  %v5813_v1 = vld [vmem:[#allocation102_spill] sm:$0xff]  ;;  %v5815_v38 = vld [vmem:[#allocation103_spill] sm:$0xff] }
 0x16f   :  { %v1127_v45 = vmul.f32 %v3689_v12, %v1125_v56  ;;  %1272 = vmatpush.bf16.msrb.mxu1 %v5809_v6  ;;  %1298 = vmatpush.bf16.msrb.mxu3 %v5810_v62  ;;  %vm1132_vm0 = vweird.f32 %v3689_v12  ;;  %v5814_v6 = vld [vmem:[#allocation101_spill] sm:$0xff] }
 0x170   :  { %1212 = vmatmul.bf16.vlgmr.msra.gmra.mxu0 %v4568_v27  ;;  %vm1133_vm2 = vmor %vm1131_vm1, %vm1132_vm0 }
 0x171   :  { %v1128_v17 = vsub.f32 1.0, %v1127_v45  ;;  %1238 = vmatmul.bf16.vlgmr.msra.gmra.mxu2 %v4568_v27  ;;  %v5816_v45 = vld [vmem:[#allocation104_spill] sm:$0xff] }
 0x172   :  { %1260 = vmatpush.bf16.msrb.mxu0 %v5811_v33  ;;  %1286 = vmatpush.bf16.msrb.mxu2 %v5812_v49 }
 0x173   :  { %v1129_v50 = vmul.f32 %v3689_v12, %v1128_v17  ;;  %1273 = vmatpush.bf16.msrb.mxu1 %v5813_v1  ;;  %1299 = vmatpush.bf16.msrb.mxu3 %v5814_v6  ;;  %v3691_v17 = vpop.eup %3690 }
 0x175   :  { %v1130_v62 = vadd.f32 %v3689_v12, %v1129_v50  ;;  %v5825_v50 = vld [vmem:[#allocation48_spill] sm:$0xff] }
 0x176   :  { %1261 = vmatpush.bf16.msrb.mxu0 %v5815_v38  ;;  %1287 = vmatpush.bf16.msrb.mxu2 %v5816_v45 }
 0x177   :  { %v1134_v14 = vsel %vm1133_vm2, %v3689_v12, %v1130_v62  ;;  %1274 = vmatpush.bf16.msrb.mxu1 %v4413_v36  ;;  %1300 = vmatpush.bf16.msrb.mxu3 %v4411_v46  ;;  %v5819_v12 = vld [vmem:[#allocation41_spill] sm:$0xff]  ;;  %v5821_v62 = vld [vmem:[#allocation42_spill] sm:$0xff] }
 0x178   :  { %v1139_v49 = vsel %vm1136_vm3, %v1138_v22, %v1134_v14  ;;  %v5818_v14 = vld [vmem:[#allocation37_spill] sm:$0xff]  ;;  %v5820_v22 = vld [vmem:[#allocation38_spill] sm:$0xff] }
 0x179   :  { %v1145_v33 = vmul.f32 %v3691_v17, %v1139_v49  ;;  %v5823_v49 = vld [vmem:[#allocation45_spill] sm:$0xff] }
 0x17a   :  { %1262 = vmatpush.bf16.msrb.mxu0 %v4417_v13  ;;  %1288 = vmatpush.bf16.msrb.mxu2 %v4419_v54  ;;  %v5827_v17 = vld [vmem:[#allocation49_spill] sm:$0xff] }
 0x17b   :  { %v1203_v56 = vpack.c.bf16 %v1145_v33, %v1145_v33  ;;  %1275 = vmatpush.bf16.msrb.mxu1 %v4425_v53  ;;  %1301 = vmatpush.bf16.msrb.mxu3 %v4423_v31  ;;  %v5822_v33 = vld [vmem:[#allocation43_spill] sm:$0xff] }
 0x17d   :  { %1225 = vmatmul.bf16.vlgmr.msra.gmra.mxu1 %v1203_v56  ;;  %1251 = vmatmul.bf16.vlgmr.msra.gmra.mxu3 %v1203_v56 }
 0x17e   :  { %1263 = vmatpush.bf16.msrb.mxu0 %v4429_v40  ;;  %1289 = vmatpush.bf16.msrb.mxu2 %v4431_v52 }
 0x17f   :  { %1276 = vmatpush.bf16.msrb.mxu1 %v4437_v44  ;;  %1302 = vmatpush.bf16.msrb.mxu3 %v4435_v23 }
 0x181   :  { %1264 = vmatmul.bf16.vlgmr.msrb.gmra.mxu0 %v4568_v27  ;;  %1290 = vmatmul.bf16.vlgmr.msrb.gmra.mxu2 %v4568_v27  ;;  %v5817_v27 = vld [vmem:[#allocation36_spill] sm:$0xff] }
 0x182   :  { %1435 = vmatpush.bf16.msra.mxu0 %v4069_v5  ;;  %1461 = vmatpush.bf16.msra.mxu2 %v4071_v9 }
 0x183   :  { %1448 = vmatpush.bf16.msra.mxu1 %v4079_v15  ;;  %1474 = vmatpush.bf16.msra.mxu3 %v4073_v10 }
 0x186   :  { %1436 = vmatpush.bf16.msra.mxu0 %v4083_v19  ;;  %1462 = vmatpush.bf16.msra.mxu2 %v4085_v20 }
 0x187   :  { %1449 = vmatpush.bf16.msra.mxu1 %v4090_v28  ;;  %1475 = vmatpush.bf16.msra.mxu3 %v4088_v24 }
 0x18a   :  { %1437 = vmatpush.bf16.msra.mxu0 %v4093_v32  ;;  %1463 = vmatpush.bf16.msra.mxu2 %v4096_v34 }
 0x18b   :  { %1450 = vmatpush.bf16.msra.mxu1 %v4108_v39  ;;  %1476 = vmatpush.bf16.msra.mxu3 %v4100_v35 }
 0x18d   :  { %1277 = vmatmul.bf16.vlgmr.msrb.gmra.mxu1 %v1203_v56  ;;  %1303 = vmatmul.bf16.vlgmr.msrb.gmra.mxu3 %v1203_v56  ;;  %v5828_v56 = vld [vmem:[#allocation47_spill] sm:$0xff] }
 0x18e   :  { %1438 = vmatpush.bf16.msra.mxu0 %v4111_v43  ;;  %1464 = vmatpush.bf16.msra.mxu2 %v4113_v47 }
 0x18f   :  { %1451 = vmatpush.bf16.msra.mxu1 %v4118_v51  ;;  %1477 = vmatpush.bf16.msra.mxu3 %v4115_v48 }
 0x192   :  { %1439 = vmatpush.bf16.msra.mxu0 %v4123_v55  ;;  %1465 = vmatpush.bf16.msra.mxu2 %v4125_v59  ;;  %v5863_v59 = vld [vmem:[#allocation74_spill] sm:$0xff] }
 0x193   :  { %1452 = vmatpush.bf16.msra.mxu1 %v4130_v63  ;;  %1478 = vmatpush.bf16.msra.mxu3 %v4127_v60 }
 0x196   :  { %1440 = vmatpush.bf16.msra.mxu0 %v4135_v3  ;;  %1466 = vmatpush.bf16.msra.mxu2 %v4137_v8 }
 0x197   :  { %1453 = vmatpush.bf16.msra.mxu1 %v4147_v16  ;;  %1479 = vmatpush.bf16.msra.mxu3 %v4139_v11  ;;  %v5829_v11 = vld [vmem:[#allocation50_spill] sm:$0xff] }
 0x198   :  { %v5832_v16 = vld [vmem:[#allocation54_spill] sm:$0xff] }
 0x19a   :  { %1441 = vmatpush.bf16.msra.mxu0 %v5817_v27  ;;  %1467 = vmatpush.bf16.msra.mxu2 %v5818_v14 }
 0x19b   :  { %1454 = vmatpush.bf16.msra.mxu1 %v5819_v12  ;;  %1480 = vmatpush.bf16.msra.mxu3 %v5820_v22  ;;  %v5830_v12 = vld [vmem:[#allocation51_spill] sm:$0xff] }
 0x19c   :  { %v5831_v22 = vld [vmem:[#allocation55_spill] sm:$0xff] }
 0x19e   :  { %1442 = vmatpush.bf16.msra.mxu0 %v5821_v62  ;;  %1468 = vmatpush.bf16.msra.mxu2 %v5822_v33  ;;  %v5833_v33 = vld [vmem:[#allocation56_spill] sm:$0xff] }
 0x19f   :  { %1455 = vmatpush.bf16.msra.mxu1 %v5825_v50  ;;  %1481 = vmatpush.bf16.msra.mxu3 %v5826_v37  ;;  %v5836_v50 = vld [vmem:[#allocation60_spill] sm:$0xff]  ;;  %v5837_v37 = vld [vmem:[#allocation62_spill] sm:$0xff] }
 0x1a2   :  { %1492 = vmatpush.bf16.msrb.mxu0 %v5823_v49  ;;  %1518 = vmatpush.bf16.msrb.mxu2 %v5824_v4  ;;  %v5834_v49 = vld [vmem:[#allocation59_spill] sm:$0xff]  ;;  %v5835_v4 = vld [vmem:[#allocation61_spill] sm:$0xff] }
 0x1a3   :  { %1505 = vmatpush.bf16.msrb.mxu1 %v5827_v17  ;;  %1531 = vmatpush.bf16.msrb.mxu3 %v5828_v56  ;;  %v5838_v17 = vld [vmem:[#allocation63_spill] sm:$0xff]  ;;  %v5839_v56 = vld [vmem:[#allocation65_spill] sm:$0xff] }
 0x1a6   :  { %1493 = vmatpush.bf16.msrb.mxu0 %v5829_v11  ;;  %1519 = vmatpush.bf16.msrb.mxu2 %v5830_v12  ;;  %v5840_v11 = vld [vmem:[#allocation64_spill] sm:$0xff]  ;;  %v5841_v12 = vld [vmem:[#allocation66_spill] sm:$0xff] }
 0x1a7   :  { %1506 = vmatpush.bf16.msrb.mxu1 %v5831_v22  ;;  %1532 = vmatpush.bf16.msrb.mxu3 %v5832_v16  ;;  %v5842_v22 = vld [vmem:[#allocation67_spill] sm:$0xff]  ;;  %v5843_v16 = vld [vmem:[#allocation69_spill] sm:$0xff] }
 0x1aa   :  { %1494 = vmatpush.bf16.msrb.mxu0 %v5833_v33  ;;  %1520 = vmatpush.bf16.msrb.mxu2 %v5834_v49  ;;  %v5844_v33 = vld [vmem:[#allocation68_spill] sm:$0xff]  ;;  %v5845_v49 = vld [vmem:[#allocation70_spill] sm:$0xff] }
 0x1ab   :  { %1507 = vmatpush.bf16.msrb.mxu1 %v5835_v4  ;;  %1533 = vmatpush.bf16.msrb.mxu3 %v5836_v50  ;;  %v5846_v4 = vld [vmem:[#allocation71_spill] sm:$0xff]  ;;  %v5847_v50 = vld [vmem:[#allocation73_spill] sm:$0xff] }
 0x1ae   :  { %1495 = vmatpush.bf16.msrb.mxu0 %v5837_v37  ;;  %1521 = vmatpush.bf16.msrb.mxu2 %v5838_v17  ;;  %v5848_v37 = vld [vmem:[#allocation72_spill] sm:$0xff]  ;;  %v5849_v17 = vld [vmem:[#allocation75_spill] sm:$0xff] }
 0x1af   :  { %1508 = vmatpush.bf16.msrb.mxu1 %v5839_v56  ;;  %1534 = vmatpush.bf16.msrb.mxu3 %v5840_v11  ;;  %v5850_v56 = vld [vmem:[#allocation76_spill] sm:$0xff]  ;;  %v5851_v11 = vld [vmem:[#allocation79_spill] sm:$0xff] }
 0x1b2   :  { %1496 = vmatpush.bf16.msrb.mxu0 %v5841_v12  ;;  %1522 = vmatpush.bf16.msrb.mxu2 %v5842_v22  ;;  %v5852_v12 = vld [vmem:[#allocation78_spill] sm:$0xff]  ;;  %v5853_v22 = vld [vmem:[#allocation80_spill] sm:$0xff] }
 0x1b3   :  { %1509 = vmatpush.bf16.msrb.mxu1 %v5843_v16  ;;  %1535 = vmatpush.bf16.msrb.mxu3 %v5844_v33  ;;  %v5854_v16 = vld [vmem:[#allocation81_spill] sm:$0xff]  ;;  %v5855_v33 = vld [vmem:[#allocation83_spill] sm:$0xff] }
 0x1b6   :  { %1497 = vmatpush.bf16.msrb.mxu0 %v5845_v49  ;;  %1523 = vmatpush.bf16.msrb.mxu2 %v5846_v4  ;;  %v5856_v49 = vld [vmem:[#allocation82_spill] sm:$0xff]  ;;  %v205_v4 = vpop.permute.xlu1 %204 }
 0x1b7   :  { %1510 = vmatpush.bf16.msrb.mxu1 %v5847_v50  ;;  %1536 = vmatpush.bf16.msrb.mxu3 %v5848_v37  ;;  %v5857_v50 = vld [vmem:[#allocation39_spill] sm:$0xff]  ;;  %v5858_v37 = vld [vmem:[#allocation40_spill] sm:$0xff]  ;;  %v251_v55 = vmul.f32 %v5863_v59, %v205_v4 }
 0x1b8   :  { %v249_v62 = vmul.f32 %v5857_v50, %v205_v4  ;;  %v250_v60 = vmul.f32 %v5858_v37, %v205_v4 }
 0x1ba   :  { %1498 = vmatpush.bf16.msrb.mxu0 %v5849_v17  ;;  %1524 = vmatpush.bf16.msrb.mxu2 %v5850_v56  ;;  %v5859_v17 = vld [vmem:[#allocation53_spill] sm:$0xff] }
 0x1bb   :  { %1511 = vmatpush.bf16.msrb.mxu1 %v5851_v11  ;;  %1537 = vmatpush.bf16.msrb.mxu3 %v5852_v12  ;;  %v291_v63 = vadd.f32 %v5859_v17, %v249_v62  ;;  %v5860_v56 = vld [vmem:[#allocation57_spill] sm:$0xff]  ;;  %v5861_v12 = vld [vmem:[#allocation52_spill] sm:$0xff] }
 0x1bc   :  { %v292_v14 = vadd.f32 %v5860_v56, %v250_v60  ;;  %v252_v48 = vmul.f32 %v5861_v12, %v205_v4 }
 0x1be   :  { %1499 = vmatpush.bf16.msrb.mxu0 %v5853_v22  ;;  %1525 = vmatpush.bf16.msrb.mxu2 %v5854_v16 }
 0x1bf   :  { %1512 = vmatpush.bf16.msrb.mxu1 %v5855_v33  ;;  %1538 = vmatpush.bf16.msrb.mxu3 %v5856_v49  ;;  %v5862_v33 = vld [vmem:[#allocation58_spill] sm:$0xff] }
 0x1c0   :  { %v294_v3 = vadd.f32 %v5862_v33, %v252_v48  ;;  %v5864_v48 = vld [vmem:[#allocation77_spill] sm:$0xff] }
 0x1dd   :  { %v1156_v11 = vpop.f32.mrf.mxu0  ;;  %v1169_v27 = vpop.f32.mrf.mxu1 }
 0x1de   :  { %v1199_v22 = vadd.f32 %v1156_v11, %v291_v63  ;;  %v1200_v51 = vadd.f32 %v1169_v27, %v292_v14 }
 0x1e0   :  { %v3495_v16 = vmul.f32 -1.442695, %v1199_v22  ;;  %v3496_v8 = vmul.f32 -1.442695, %v1200_v51 }
 0x1e2   :  { %3692 = vpow2.f32 %v3495_v16  ;;  %v293_v16 = vadd.f32 %v5864_v48, %v251_v55 }
 0x1e3   :  { %3694 = vpow2.f32 %v3496_v8 }
 0x1e4   :  { %v1182_v49 = vpop.f32.mrf.mxu2  ;;  %v1195_v50 = vpop.f32.mrf.mxu3 }
 0x1e5   :  { %v1202_v35 = vadd.f32 %v1195_v50, %v294_v3  ;;  %v1158_v37 = vpop.f32.mrf.mxu0  ;;  %v1171_v39 = vpop.f32.mrf.mxu1 }
 0x1e6   :  { %v1201_v39 = vadd.f32 %v1182_v49, %v293_v16 }
 0x1e7   :  { %v3497_v62 = vmul.f32 -1.442695, %v1202_v35 }
 0x1e8   :  { %v3693_v17 = vpop.eup %3692 }
 0x1e9   :  { %v3695_v60 = vpop.eup %3694  ;;  %v1311_v56 = vadd.f32 1.0, %v3693_v17  ;;  %3696 = vpow2.f32 %v3497_v62 }
 0x1ea   :  { %v1330_v63 = vadd.f32 1.0, %v3695_v60 }
 0x1eb   :  { %3698 = vrcp.f32 %v1311_v56  ;;  %v1321_v62 = vand.u32 2147483647, %v1311_v56  ;;  %v1323_v60 = vand.u32 2147483648, %v1311_v56  ;;  %vm1317_vm7 = vweird.f32 %v1311_v56 }
 0x1ec   :  { %3700 = vrcp.f32 %v1330_v63  ;;  %v1184_v51 = vpop.f32.mrf.mxu2  ;;  %v1197_v11 = vpop.f32.mrf.mxu3  ;;  %v1340_v48 = vand.u32 2147483647, %v1330_v63  ;;  %vm1336_vm6 = vweird.f32 %v1330_v63 }
 0x1ed   :  { %v1213_v8 = vpop.f32.mrf.mxu0  ;;  %v1342_v11 = vand.u32 2147483648, %v1330_v63  ;;  %v1324_v16 = vor.u32 1.1754944e-38, %v1323_v60  ;;  %vm1322_vm10 = vcmp.eq.f32.partialorder %v1321_v62, 8.507059e+37 }
 0x1ee   :  { %vm1341_vm11 = vcmp.eq.f32.partialorder %v1340_v48, 8.507059e+37 }
 0x1ef   :  { %v3697_v27 = vpop.eup %3696 }
 0x1f0   :  { %v4702_v14 = vadd.f32 1.0, %v3697_v27 }
 0x1f1   :  { %v3699_v3 = vpop.eup %3698 }
 0x1f2   :  { %v3701_v35 = vpop.eup %3700  ;;  %v1313_v22 = vmul.f32 %v3699_v3, %v1311_v56  ;;  %3702 = vrcp.f32 %v4702_v14  ;;  %vm1318_vm4 = vweird.f32 %v3699_v3  ;;  %vm1356_vm13 = vweird.f32 %v4702_v14 }
 0x1f3   :  { %v1332_v50 = vmul.f32 %v3701_v35, %v1330_v63  ;;  %3704 = vtanh.f32 %v1201_v39  ;;  %vm1337_vm5 = vweird.f32 %v3701_v35  ;;  %vm1319_vm8 = vmor %vm1317_vm7, %vm1318_vm4  ;;  %v1343_v39 = vor.u32 1.1754944e-38, %v1342_v11  ;;  %v5866_v11 = vld [vmem:[#allocation107_spill] sm:$0xff] }
 0x1f4   :  { %v1314_v4 = vsub.f32 1.0, %v1313_v22  ;;  %v1239_v37 = vpop.f32.mrf.mxu2  ;;  %vm1338_vm9 = vmor %vm1336_vm6, %vm1337_vm5 }
 0x1f5   :  { %v1333_v17 = vsub.f32 1.0, %v1332_v50  ;;  %v1215_v51 = vpop.f32.mrf.mxu0  ;;  %v5865_v50 = vld [vmem:[#allocation106_spill] sm:$0xff] }
 0x1f6   :  { %v1315_v55 = vmul.f32 %v3699_v3, %v1314_v4  ;;  %v1214_v12 = vadd.f32 %v1213_v8, %v5865_v50 }
 0x1f7   :  { %v1334_v27 = vmul.f32 %v3701_v35, %v1333_v17 }
 0x1f8   :  { %v3703_v59 = vpop.eup %3702  ;;  %v1316_v49 = vadd.f32 %v3699_v3, %v1315_v55 }
 0x1f9   :  { %v1335_v33 = vadd.f32 %v3701_v35, %v1334_v27  ;;  %v1352_v22 = vmul.f32 %v3703_v59, %v4702_v14  ;;  %v3705_v24 = vpop.eup %3704  ;;  %vm1357_vm12 = vweird.f32 %v3703_v59 }
 0x1fa   :  { %v1320_v51 = vsel %vm1319_vm8, %v3699_v3, %v1316_v49  ;;  %v1226_v4 = vpop.f32.mrf.mxu1  ;;  %v1240_v3 = vadd.f32 %v1239_v37, %v5866_v11  ;;  %vm1358_vm14 = vmor %vm1356_vm13, %vm1357_vm12 }
 0x1fb   :  { %v1325_v17 = vsel %vm1322_vm10, %v1324_v16, %v1320_v51  ;;  %v1339_v28 = vsel %vm1338_vm9, %v3701_v35, %v1335_v33  ;;  %v1353_v47 = vsub.f32 1.0, %v1352_v22  ;;  %v1227_v63 = vadd.f32 %v1226_v4, %v1214_v12 }
 0x1fc   :  { %v1344_v55 = vsel %vm1341_vm11, %v1343_v39, %v1339_v28  ;;  %v1367_v56 = vmul.f32 %v3705_v24, %v1325_v17  ;;  %v1241_v43 = vpop.f32.mrf.mxu2  ;;  %v1362_v12 = vand.u32 2147483648, %v4702_v14  ;;  %v1360_v24 = vand.u32 2147483647, %v4702_v14 }
 0x1fd   :  { %v1366_v60 = vmul.f32 %v1344_v55, %v4543_v61  ;;  %v1354_v27 = vmul.f32 %v3703_v59, %v1353_v47  ;;  %v3498_v10 = vmul.f32 -1.442695, %v1227_v63 }
 0x1fe   :  { %v1265_v15 = vpop.f32.mrf.mxu0  ;;  %v1363_v37 = vor.u32 1.1754944e-38, %v1362_v12  ;;  %vm1361_vm15 = vcmp.eq.f32.partialorder %v1360_v24, 8.507059e+37 }
 0x1ff   :  { %v4708_v8 = vadd.f32 %v1367_v56, %v1366_v60  ;;  %3706 = vpow2.f32 %v3498_v10  ;;  %v1355_v48 = vadd.f32 %v3703_v59, %v1354_v27 }
 0x200   :  { %v1252_v62 = vpop.f32.mrf.mxu3 }
 0x201   :  { %3708 = vtanh.f32 %v4708_v8  ;;  %v1253_v28 = vadd.f32 %v1252_v62, %v1240_v3  ;;  %v1359_v61 = vsel %vm1358_vm14, %v3703_v59, %v1355_v48 }
 0x202   :  { %v1228_v43 = vpop.f32.mrf.mxu1  ;;  %v1364_v22 = vsel %vm1361_vm15, %v1363_v37, %v1359_v61 }
 0x203   :  { %v3499_v47 = vmul.f32 -1.442695, %v1253_v28  ;;  %v1266_v43 = vadd.f32 %v1265_v15, %v4559_v57 }
 0x204   :  { %v1291_v33 = vpop.f32.mrf.mxu2 }
 0x205   :  { %v3707_v35 = vpop.eup %3706  ;;  %3710 = vpow2.f32 %v3499_v47  ;;  %v1292_v60 = vadd.f32 %v1291_v33, %v4549_v30 }
 0x206   :  { %v4715_v10 = vadd.f32 1.0, %v3707_v35  ;;  %v1267_v49 = vpop.f32.mrf.mxu0  ;;  %v5867_v35 = vld [vmem:[#allocation93_spill] sm:$0xff] }
 0x207   :  { %v3709_v16 = vpop.eup %3708 }
 0x208   :  { %v1370_v39 = vmul.f32 %v3709_v16, %v1364_v22  ;;  %3712 = vrcp.f32 %v4715_v10  ;;  %v1254_v51 = vpop.f32.mrf.mxu3  ;;  %v1386_v15 = vand.u32 2147483648, %v4715_v10  ;;  %vm1380_vm2 = vweird.f32 %v4715_v10 }
 0x209   :  { %v1384_v51 = vand.u32 2147483647, %v4715_v10 }
 0x20a   :  { %v4718_v4 = vpack.c.bf16 %v1370_v39, %v1370_v39  ;;  %v1278_v14 = vpop.f32.mrf.mxu1 }
 0x20b   :  { %v3711_v17 = vpop.eup %3710  ;;  %v1279_v33 = vadd.f32 %v1278_v14, %v1266_v43  ;;  %v5868_v14 = vld [vmem:[#allocation95_spill] sm:$0xff]  ;;  %vm1385_vm7 = vcmp.eq.f32.partialorder %v1384_v51, 8.507059e+37 }
 0x20c   :  { %v1393_v63 = vadd.f32 1.0, %v3711_v17  ;;  %v1293_v59 = vpop.f32.mrf.mxu2  ;;  %1443 = vmatmul.bf16.vlgmr.msra.gmra.mxu0 %v4718_v4  ;;  %1456 = vmatmul.bf16.vlgmr.msra.gmra.mxu1 %v4718_v4  ;;  %v5869_v17 = vld [vmem:[#allocation96_spill] sm:$0xff]  ;;  %v5874_v43 = vld [vmem:[#allocation99_spill] sm:$0xff] }
 0x20d   :  { %1469 = vmatmul.bf16.vlgmr.msra.gmra.mxu2 %v4718_v4  ;;  %1482 = vmatmul.bf16.vlgmr.msra.gmra.mxu3 %v4718_v4 }
 0x20e   :  { %v4724_v55 = vpop.eup %3712  ;;  %3714 = vrcp.f32 %v1393_v63  ;;  %1544 = vmatpush.bf16.msra.mxu0 %v4341_v2  ;;  %1570 = vmatpush.bf16.msra.mxu2 %v5793_v7  ;;  %v1405_v37 = vand.u32 2147483648, %v1393_v63  ;;  %v1403_v39 = vand.u32 2147483647, %v1393_v63  ;;  %vm1399_vm3 = vweird.f32 %v1393_v63 }
 0x20f   :  { %v1376_v56 = vmul.f32 %v4724_v55, %v4715_v10  ;;  %1557 = vmatpush.bf16.msra.mxu1 %v5794_v29  ;;  %1583 = vmatpush.bf16.msra.mxu3 %v5795_v0  ;;  %vm1381_vm0 = vweird.f32 %v4724_v55 }
 0x210   :  { %v1304_v27 = vpop.f32.mrf.mxu3  ;;  %vm4750_vm4 = vmor %vm1380_vm2, %vm1381_vm0  ;;  %vm1404_vm6 = vcmp.eq.f32.partialorder %v1403_v39, 8.507059e+37 }
 0x211   :  { %v1377_v3 = vsub.f32 1.0, %v1376_v56  ;;  %v1305_v48 = vadd.f32 %v1304_v27, %v1292_v60  ;;  %v5872_v27 = vld [vmem:[#allocation98_spill] sm:$0xff] }
 0x212   :  { %1545 = vmatpush.bf16.msra.mxu0 %v5798_v25  ;;  %1571 = vmatpush.bf16.msra.mxu2 %v5799_v26  ;;  %v1280_v62 = vpop.f32.mrf.mxu1 }
 0x213   :  { %v3500_v12 = vmul.f32 -1.442695, %v1305_v48  ;;  %1558 = vmatpush.bf16.msra.mxu1 %v5800_v41  ;;  %1584 = vmatpush.bf16.msra.mxu3 %v5801_v58  ;;  %v1378_v24 = vmul.f32 %v4724_v55, %v1377_v3  ;;  %v5873_v3 = vld [vmem:[#allocation97_spill] sm:$0xff]  ;;  %v1406_v48 = vor.u32 1.1754944e-38, %v1405_v37 }
 0x214   :  { %v3715_v28 = vpop.eup %3714 }
 0x215   :  { %v1395_v47 = vmul.f32 %v3715_v28, %v1393_v63  ;;  %3716 = vpow2.f32 %v3500_v12  ;;  %v1379_v49 = vadd.f32 %v4724_v55, %v1378_v24  ;;  %vm1400_vm1 = vweird.f32 %v3715_v28 }
 0x216   :  { %1546 = vmatpush.bf16.msra.mxu0 %v5802_v21  ;;  %1572 = vmatpush.bf16.msra.mxu2 %v5803_v18  ;;  %3718 = vtanh.f32 %v1279_v33  ;;  %vm1401_vm5 = vmor %vm1399_vm3, %vm1400_vm1  ;;  %v1387_v63 = vor.u32 1.1754944e-38, %v1386_v15 }
 0x217   :  { %v1396_v61 = vsub.f32 1.0, %v1395_v47  ;;  %1559 = vmatpush.bf16.msra.mxu1 %v5804_v42  ;;  %1585 = vmatpush.bf16.msra.mxu3 %v5867_v35  ;;  %v1383_v10 = vsel %vm4750_vm4, %v4724_v55, %v1379_v49  ;;  %v5875_v47 = vld [vmem:[#allocation100_spill] sm:$0xff] }
 0x218   :  { %v1306_v16 = vpop.f32.mrf.mxu3  ;;  %v5876_v55 = vld [vmem:[#allocation84_spill] sm:$0xff] }
 0x219   :  { %v1397_v22 = vmul.f32 %v3715_v28, %v1396_v61  ;;  %v1388_v61 = vsel %vm1385_vm7, %v1387_v63, %v1383_v10 }
 0x21a   :  { %1547 = vmatpush.bf16.msra.mxu0 %v5868_v14  ;;  %1573 = vmatpush.bf16.msra.mxu2 %v5869_v17 }
 0x21b   :  { %v3717_v59 = vpop.eup %3716  ;;  %v1398_v60 = vadd.f32 %v3715_v28, %v1397_v22  ;;  %1560 = vmatpush.bf16.msra.mxu1 %v5872_v27  ;;  %1586 = vmatpush.bf16.msra.mxu3 %v5873_v3 }
 0x21c   :  { %v1413_v62 = vadd.f32 1.0, %v3717_v59  ;;  %1500 = vmatmul.bf16.vlgmr.msrb.gmra.mxu0 %v4718_v4  ;;  %v3719_v37 = vpop.eup %3718 }
 0x21d   :  { %v1402_v12 = vsel %vm1401_vm5, %v3715_v28, %v1398_v60  ;;  %1526 = vmatmul.bf16.vlgmr.msrb.gmra.mxu2 %v4718_v4  ;;  %v1430_v49 = vmul.f32 %v3719_v37, %v1388_v61  ;;  %v5878_v61 = vld [vmem:[#allocation14_spill] sm:$0xff] }
 0x21e   :  { %v1407_v24 = vsel %vm1404_vm6, %v1406_v48, %v1402_v12  ;;  %3720 = vrcp.f32 %v1413_v62  ;;  %1548 = vmatpush.bf16.msra.mxu0 %v5874_v43  ;;  %1574 = vmatpush.bf16.msra.mxu2 %v5875_v47  ;;  %v1425_v39 = vand.u32 2147483648, %v1413_v62  ;;  %v1423_v59 = vand.u32 2147483647, %v1413_v62  ;;  %v5882_v37 = vld [vmem:[#allocation18_spill] sm:$0xff] }
 0x21f   :  { %1561 = vmatpush.bf16.msra.mxu1 %v5813_v1  ;;  %1587 = vmatpush.bf16.msra.mxu3 %v5814_v6  ;;  %v1429_v33 = vmul.f32 %v1407_v24, %v5876_v55  ;;  %vm1419_vm9 = vweird.f32 %v1413_v62  ;;  %v5877_v24 = vld [vmem:[#allocation15_spill] sm:$0xff]  ;;  %v5880_v55 = vld [vmem:[#allocation25_spill] sm:$0xff] }
 0x220   :  { %v1426_v60 = vor.u32 1.1754944e-38, %v1425_v39  ;;  %vm1424_vm11 = vcmp.eq.f32.partialorder %v1423_v59, 8.507059e+37  ;;  %v5887_v39 = vld [vmem:[#allocation32_spill] sm:$0xff]  ;;  %v5889_v59 = vld [vmem:[#allocation27_spill] sm:$0xff] }
 0x221   :  { %v4770_v16 = vadd.f32 %v1430_v49, %v1429_v33  ;;  %v5881_v33 = vld [vmem:[#allocation19_spill] sm:$0xff]  ;;  %v5883_v49 = vld [vmem:[#allocation28_spill] sm:$0xff] }
 0x222   :  { %1549 = vmatpush.bf16.msra.mxu0 %v5815_v38  ;;  %1575 = vmatpush.bf16.msra.mxu2 %v5816_v45 }
 0x223   :  { %1562 = vmatpush.bf16.msra.mxu1 %v4413_v36  ;;  %1588 = vmatpush.bf16.msra.mxu3 %v4411_v46  ;;  %3722 = vtanh.f32 %v4770_v16 }
 0x224   :  { %v3721_v28 = vpop.eup %3720 }
 0x225   :  { %v1415_v22 = vmul.f32 %v3721_v28, %v1413_v62  ;;  %vm1420_vm8 = vweird.f32 %v3721_v28 }
 0x226   :  { %1550 = vmatpush.bf16.msra.mxu0 %v4417_v13  ;;  %1576 = vmatpush.bf16.msra.mxu2 %v4419_v54  ;;  %vm1421_vm10 = vmor %vm1419_vm9, %vm1420_vm8 }
 0x227   :  { %v1416_v15 = vsub.f32 1.0, %v1415_v22  ;;  %1563 = vmatpush.bf16.msra.mxu1 %v4425_v53  ;;  %1589 = vmatpush.bf16.msra.mxu3 %v4423_v31  ;;  %v5885_v22 = vld [vmem:[#allocation23_spill] sm:$0xff] }
 0x229   :  { %v1417_v51 = vmul.f32 %v3721_v28, %v1416_v15  ;;  %v3723_v10 = vpop.eup %3722  ;;  %v5886_v15 = vld [vmem:[#allocation22_spill] sm:$0xff] }
 0x22a   :  { %1551 = vmatpush.bf16.msra.mxu0 %v4429_v40  ;;  %1577 = vmatpush.bf16.msra.mxu2 %v4431_v52 }
 0x22b   :  { %v1418_v56 = vadd.f32 %v3721_v28, %v1417_v51  ;;  %1564 = vmatpush.bf16.msra.mxu1 %v4437_v44  ;;  %1590 = vmatpush.bf16.msra.mxu3 %v4435_v23  ;;  %v5888_v51 = vld [vmem:[#allocation33_spill] sm:$0xff] }
 0x22d   :  { %1552 = vmatmul.bf16.vlgmr.msra.gmra.mxu0 %v4718_v4  ;;  %1578 = vmatmul.bf16.vlgmr.msra.gmra.mxu2 %v4718_v4  ;;  %v1422_v48 = vsel %vm1421_vm10, %v3721_v28, %v1418_v56  ;;  %v5879_v4 = vld [vmem:[#allocation24_spill] sm:$0xff]  ;;  %v5884_v28 = vld [vmem:[#allocation29_spill] sm:$0xff]  ;;  %v5890_v56 = vld [vmem:[#allocation26_spill] sm:$0xff] }
 0x22e   :  { %1723 = vmatpush.bf16.msrb.mxu0 %v4069_v5  ;;  %1749 = vmatpush.bf16.msrb.mxu2 %v4071_v9  ;;  %v1427_v63 = vsel %vm1424_vm11, %v1426_v60, %v1422_v48  ;;  %v5891_v60 = vld [vmem:[#allocation36_spill] sm:$0xff]  ;;  %v5892_v48 = vld [vmem:[#allocation37_spill] sm:$0xff] }
 0x22f   :  { %v1433_v12 = vmul.f32 %v3723_v10, %v1427_v63  ;;  %v5893_v10 = vld [vmem:[#allocation31_spill] sm:$0xff]  ;;  %v5894_v63 = vld [vmem:[#allocation30_spill] sm:$0xff] }
 0x231   :  { %v1491_v62 = vpack.c.bf16 %v1433_v12, %v1433_v12  ;;  %v5895_v12 = vld [vmem:[#allocation42_spill] sm:$0xff] }
 0x232   :  { %1724 = vmatpush.bf16.msrb.mxu0 %v4083_v19  ;;  %1750 = vmatpush.bf16.msrb.mxu2 %v4085_v20 }
 0x233   :  { %1513 = vmatmul.bf16.vlgmr.msrb.gmra.mxu1 %v1491_v62  ;;  %1539 = vmatmul.bf16.vlgmr.msrb.gmra.mxu3 %v1491_v62 }
 0x234   :  { %1736 = vmatpush.bf16.msrb.mxu1 %v5877_v24  ;;  %1762 = vmatpush.bf16.msrb.mxu3 %v5878_v61 }
 0x236   :  { %1725 = vmatpush.bf16.msrb.mxu0 %v4093_v32  ;;  %1751 = vmatpush.bf16.msrb.mxu2 %v4096_v34 }
 0x238   :  { %1737 = vmatpush.bf16.msrb.mxu1 %v5881_v33  ;;  %1763 = vmatpush.bf16.msrb.mxu3 %v5882_v37  ;;  %v5898_v37 = vld [vmem:[#allocation46_spill] sm:$0xff] }
 0x23a   :  { %1726 = vmatpush.bf16.msrb.mxu0 %v5879_v4  ;;  %1752 = vmatpush.bf16.msrb.mxu2 %v5880_v55 }
 0x23c   :  { %1738 = vmatpush.bf16.msrb.mxu1 %v5885_v22  ;;  %1764 = vmatpush.bf16.msrb.mxu3 %v5886_v15  ;;  %v5896_v15 = vld [vmem:[#allocation43_spill] sm:$0xff]  ;;  %v5897_v22 = vld [vmem:[#allocation45_spill] sm:$0xff] }
 0x23e   :  { %1727 = vmatpush.bf16.msrb.mxu0 %v5883_v49  ;;  %1753 = vmatpush.bf16.msrb.mxu2 %v5884_v28 }
 0x240   :  { %1739 = vmatpush.bf16.msrb.mxu1 %v5889_v59  ;;  %1765 = vmatpush.bf16.msrb.mxu3 %v5890_v56  ;;  %v5899_v59 = vld [vmem:[#allocation35_spill] sm:$0xff]  ;;  %v5900_v56 = vld [vmem:[#allocation34_spill] sm:$0xff] }
 0x242   :  { %1728 = vmatpush.bf16.msrb.mxu0 %v5887_v39  ;;  %1754 = vmatpush.bf16.msrb.mxu2 %v5888_v51 }
 0x243   :  { %1565 = vmatmul.bf16.vlgmr.msra.gmra.mxu1 %v1491_v62  ;;  %1591 = vmatmul.bf16.vlgmr.msra.gmra.mxu3 %v1491_v62  ;;  %v5901_v62 = vld [vmem:[#allocation50_spill] sm:$0xff] }
 0x244   :  { %1740 = vmatpush.bf16.msrb.mxu1 %v5893_v10  ;;  %1766 = vmatpush.bf16.msrb.mxu3 %v5894_v63  ;;  %v5904_v10 = vld [vmem:[#allocation38_spill] sm:$0xff]  ;;  %v5905_v63 = vld [vmem:[#allocation56_spill] sm:$0xff] }
 0x246   :  { %1729 = vmatpush.bf16.msrb.mxu0 %v5891_v60  ;;  %1755 = vmatpush.bf16.msrb.mxu2 %v5892_v48  ;;  %v5902_v60 = vld [vmem:[#allocation51_spill] sm:$0xff]  ;;  %v5903_v48 = vld [vmem:[#allocation41_spill] sm:$0xff] }
 0x248   :  { %1741 = vmatpush.bf16.msrb.mxu1 %v5899_v59  ;;  %1767 = vmatpush.bf16.msrb.mxu3 %v5900_v56  ;;  %v5910_v59 = vld [vmem:[#allocation47_spill] sm:$0xff]  ;;  %v5911_v56 = vld [vmem:[#allocation62_spill] sm:$0xff] }
 0x24a   :  { %1730 = vmatpush.bf16.msrb.mxu0 %v5895_v12  ;;  %1756 = vmatpush.bf16.msrb.mxu2 %v5896_v15  ;;  %v5906_v12 = vld [vmem:[#allocation59_spill] sm:$0xff]  ;;  %v5907_v15 = vld [vmem:[#allocation48_spill] sm:$0xff] }
 0x24c   :  { %1742 = vmatpush.bf16.msrb.mxu1 %v5903_v48  ;;  %1768 = vmatpush.bf16.msrb.mxu3 %v5904_v10  ;;  %v5914_v48 = vld [vmem:[#allocation54_spill] sm:$0xff] }
 0x24d   :  { %v5915_v10 = vld [vmem:[#allocation66_spill] sm:$0xff] }
 0x24e   :  { %1780 = vmatpush.bf16.msra.mxu0 %v5897_v22  ;;  %1806 = vmatpush.bf16.msra.mxu2 %v5898_v37  ;;  %v5908_v22 = vld [vmem:[#allocation44_spill] sm:$0xff]  ;;  %v5909_v37 = vld [vmem:[#allocation49_spill] sm:$0xff] }
 0x250   :  { %1743 = vmatpush.bf16.msrb.mxu1 %v5907_v15  ;;  %1769 = vmatpush.bf16.msrb.mxu3 %v5908_v22  ;;  %v5918_v15 = vld [vmem:[#allocation60_spill] sm:$0xff]  ;;  %v5919_v22 = vld [vmem:[#allocation70_spill] sm:$0xff] }
 0x252   :  { %1781 = vmatpush.bf16.msra.mxu0 %v5901_v62  ;;  %1807 = vmatpush.bf16.msra.mxu2 %v5902_v60  ;;  %v5912_v62 = vld [vmem:[#allocation63_spill] sm:$0xff] }
 0x253   :  { %v5913_v60 = vld [vmem:[#allocation55_spill] sm:$0xff] }
 0x254   :  { %1793 = vmatpush.bf16.msra.mxu1 %v5909_v37  ;;  %1819 = vmatpush.bf16.msra.mxu3 %v5910_v59  ;;  %v5920_v37 = vld [vmem:[#allocation71_spill] sm:$0xff]  ;;  %v5921_v59 = vld [vmem:[#allocation65_spill] sm:$0xff] }
 0x256   :  { %1782 = vmatpush.bf16.msra.mxu0 %v5905_v63  ;;  %1808 = vmatpush.bf16.msra.mxu2 %v5906_v12  ;;  %v5916_v63 = vld [vmem:[#allocation67_spill] sm:$0xff]  ;;  %v5917_v12 = vld [vmem:[#allocation61_spill] sm:$0xff] }
 0x258   :  { %1794 = vmatpush.bf16.msra.mxu1 %v5913_v60  ;;  %1820 = vmatpush.bf16.msra.mxu3 %v5914_v48  ;;  %v5924_v60 = vld [vmem:[#allocation76_spill] sm:$0xff]  ;;  %v5925_v48 = vld [vmem:[#allocation69_spill] sm:$0xff] }
 0x25a   :  { %1783 = vmatpush.bf16.msra.mxu0 %v5911_v56  ;;  %1809 = vmatpush.bf16.msra.mxu2 %v5912_v62  ;;  %v5922_v56 = vld [vmem:[#allocation64_spill] sm:$0xff]  ;;  %v5923_v62 = vld [vmem:[#allocation75_spill] sm:$0xff] }
 0x25c   :  { %1795 = vmatpush.bf16.msra.mxu1 %v5917_v12  ;;  %1821 = vmatpush.bf16.msra.mxu3 %v5918_v15  ;;  %v5928_v12 = vld [vmem:[#allocation81_spill] sm:$0xff] }
 0x25d   :  { %v5929_v15 = vld [vmem:[#allocation73_spill] sm:$0xff] }
 0x25e   :  { %1784 = vmatpush.bf16.msra.mxu0 %v5915_v10  ;;  %1810 = vmatpush.bf16.msra.mxu2 %v5916_v63  ;;  %v5926_v10 = vld [vmem:[#allocation68_spill] sm:$0xff] }
 0x25f   :  { %v5927_v63 = vld [vmem:[#allocation80_spill] sm:$0xff] }
 0x260   :  { %1796 = vmatpush.bf16.msra.mxu1 %v5921_v59  ;;  %1822 = vmatpush.bf16.msra.mxu3 %v5922_v56  ;;  %v5932_v59 = vld [vmem:[#allocation78_spill] sm:$0xff]  ;;  %v5933_v56 = vld [vmem:[#allocation83_spill] sm:$0xff] }
 0x262   :  { %1785 = vmatpush.bf16.msra.mxu0 %v5919_v22  ;;  %1811 = vmatpush.bf16.msra.mxu2 %v5920_v37  ;;  %v5930_v22 = vld [vmem:[#allocation72_spill] sm:$0xff]  ;;  %v5931_v37 = vld [vmem:[#allocation79_spill] sm:$0xff] }
 0x264   :  { %1797 = vmatpush.bf16.msra.mxu1 %v5925_v48  ;;  %1823 = vmatpush.bf16.msra.mxu3 %v5926_v10  ;;  %v5935_v48 = vld [vmem:[#allocation39_spill] sm:$0xff]  ;;  %v5936_v10 = vld [vmem:[#allocation40_spill] sm:$0xff] }
 0x266   :  { %1786 = vmatpush.bf16.msra.mxu0 %v5923_v62  ;;  %1812 = vmatpush.bf16.msra.mxu2 %v5924_v60  ;;  %v5934_v62 = vld [vmem:[#allocation82_spill] sm:$0xff]  ;;  %v210_v60 = vpop.permute.xlu1 %209 }
 0x267   :  { %v253_v33 = vmul.f32 %v5935_v48, %v210_v60  ;;  %v254_v51 = vmul.f32 %v5936_v10, %v210_v60 }
 0x268   :  { %1798 = vmatpush.bf16.msra.mxu1 %v5929_v15  ;;  %1824 = vmatpush.bf16.msra.mxu3 %v5930_v22 }
 0x26a   :  { %1787 = vmatpush.bf16.msra.mxu0 %v5927_v63  ;;  %1813 = vmatpush.bf16.msra.mxu2 %v5928_v12  ;;  %v5937_v63 = vld [vmem:[#allocation53_spill] sm:$0xff] }
 0x26b   :  { %v295_v39 = vadd.f32 %v5937_v63, %v253_v33  ;;  %v5938_v12 = vld [vmem:[#allocation57_spill] sm:$0xff] }
 0x26c   :  { %1799 = vmatpush.bf16.msra.mxu1 %v5931_v37  ;;  %1825 = vmatpush.bf16.msra.mxu3 %v5932_v59  ;;  %v296_v61 = vadd.f32 %v5938_v12, %v254_v51  ;;  %v5939_v37 = vld [vmem:[#allocation52_spill] sm:$0xff] }
 0x26d   :  { %v256_v49 = vmul.f32 %v5939_v37, %v210_v60 }
 0x270   :  { %1800 = vmatpush.bf16.msra.mxu1 %v5933_v56  ;;  %1826 = vmatpush.bf16.msra.mxu3 %v5934_v62  ;;  %v5940_v62 = vld [vmem:[#allocation58_spill] sm:$0xff] }
 0x271   :  { %v298_v56 = vadd.f32 %v5940_v62, %v256_v49  ;;  %v5942_v49 = vld [vmem:[#allocation77_spill] sm:$0xff] }
 0x289   :  { %v1444_v15 = vpop.f32.mrf.mxu0  ;;  %v1457_v24 = vpop.f32.mrf.mxu1 }
 0x28a   :  { %v1487_v22 = vadd.f32 %v1444_v15, %v295_v39  ;;  %v1488_v28 = vadd.f32 %v1457_v24, %v296_v61  ;;  %v5941_v24 = vld [vmem:[#allocation74_spill] sm:$0xff] }
 0x28b   :  { %v255_v61 = vmul.f32 %v5941_v24, %v210_v60 }
 0x28c   :  { %v3501_v59 = vmul.f32 -1.442695, %v1487_v22  ;;  %v3502_v55 = vmul.f32 -1.442695, %v1488_v28 }
 0x28e   :  { %3724 = vpow2.f32 %v3501_v59  ;;  %v297_v59 = vadd.f32 %v5942_v49, %v255_v61 }
 0x28f   :  { %3726 = vpow2.f32 %v3502_v55 }
 0x290   :  { %v1470_v4 = vpop.f32.mrf.mxu2  ;;  %v1483_v48 = vpop.f32.mrf.mxu3 }
 0x291   :  { %v1490_v34 = vadd.f32 %v1483_v48, %v298_v56  ;;  %v1446_v10 = vpop.f32.mrf.mxu0  ;;  %v1459_v32 = vpop.f32.mrf.mxu1  ;;  %v1489_v48 = vadd.f32 %v1470_v4, %v297_v59 }
 0x293   :  { %v3503_v33 = vmul.f32 -1.442695, %v1490_v34 }
 0x294   :  { %v3725_v63 = vpop.eup %3724 }
 0x295   :  { %v3727_v51 = vpop.eup %3726  ;;  %v1599_v12 = vadd.f32 1.0, %v3725_v63  ;;  %3728 = vpow2.f32 %v3503_v33 }
 0x296   :  { %v1618_v15 = vadd.f32 1.0, %v3727_v51 }
 0x297   :  { %3730 = vrcp.f32 %v1599_v12  ;;  %v1611_v37 = vand.u32 2147483648, %v1599_v12  ;;  %vm1605_vm14 = vweird.f32 %v1599_v12 }
 0x298   :  { %3732 = vrcp.f32 %v1618_v15  ;;  %v1472_v28 = vpop.f32.mrf.mxu2  ;;  %v1485_v22 = vpop.f32.mrf.mxu3  ;;  %v1630_v24 = vand.u32 2147483648, %v1618_v15  ;;  %v1628_v61 = vand.u32 2147483647, %v1618_v15  ;;  %vm1624_vm15 = vweird.f32 %v1618_v15 }
 0x299   :  { %v1501_v55 = vpop.f32.mrf.mxu0  ;;  %v1609_v22 = vand.u32 2147483647, %v1599_v12  ;;  %v1612_v4 = vor.u32 1.1754944e-38, %v1611_v37 }
 0x29a   :  { %vm1629_vm3 = vcmp.eq.f32.partialorder %v1628_v61, 8.507059e+37 }
 0x29b   :  { %v3729_v39 = vpop.eup %3728  ;;  %vm1610_vm2 = vcmp.eq.f32.partialorder %v1609_v22, 8.507059e+37 }
 0x29c   :  { %v1638_v62 = vadd.f32 1.0, %v3729_v39 }
 0x29d   :  { %v3731_v56 = vpop.eup %3730 }
 0x29e   :  { %v3733_v32 = vpop.eup %3732  ;;  %v1601_v34 = vmul.f32 %v3731_v56, %v1599_v12  ;;  %3734 = vrcp.f32 %v1638_v62  ;;  %vm1606_vm12 = vweird.f32 %v3731_v56  ;;  %vm1644_vm5 = vweird.f32 %v1638_v62 }
 0x29f   :  { %v1620_v10 = vmul.f32 %v3733_v32, %v1618_v15  ;;  %3736 = vtanh.f32 %v1489_v48  ;;  %vm1625_vm13 = vweird.f32 %v3733_v32  ;;  %vm1607_vm0 = vmor %vm1605_vm14, %vm1606_vm12 }
 0x2a0   :  { %v1602_v63 = vsub.f32 1.0, %v1601_v34  ;;  %v1527_v33 = vpop.f32.mrf.mxu2  ;;  %vm1626_vm1 = vmor %vm1624_vm15, %vm1625_vm13 }
 0x2a1   :  { %v1621_v51 = vsub.f32 1.0, %v1620_v10  ;;  %v1503_v60 = vpop.f32.mrf.mxu0  ;;  %v1631_v10 = vor.u32 1.1754944e-38, %v1630_v24  ;;  %v1650_v24 = vand.u32 2147483648, %v1638_v62 }
 0x2a2   :  { %v1603_v28 = vmul.f32 %v3731_v56, %v1602_v63 }
 0x2a3   :  { %v1622_v20 = vmul.f32 %v3733_v32, %v1621_v51  ;;  %v1651_v22 = vor.u32 1.1754944e-38, %v1650_v24 }
 0x2a4   :  { %v3735_v39 = vpop.eup %3734  ;;  %v1604_v49 = vadd.f32 %v3731_v56, %v1603_v28 }
 0x2a5   :  { %v1623_v59 = vadd.f32 %v3733_v32, %v1622_v20  ;;  %v1640_v34 = vmul.f32 %v3735_v39, %v1638_v62  ;;  %v3737_v48 = vpop.eup %3736  ;;  %vm1645_vm4 = vweird.f32 %v3735_v39 }
 0x2a6   :  { %v1608_v19 = vsel %vm1607_vm0, %v3731_v56, %v1604_v49  ;;  %vm1646_vm6 = vmor %vm1644_vm5, %vm1645_vm4  ;;  %v1502_v49 = vadd.f32 %v1501_v55, %v5865_v50 }
 0x2a7   :  { %v1613_v60 = vsel %vm1610_vm2, %v1612_v4, %v1608_v19  ;;  %v1627_v63 = vsel %vm1626_vm1, %v3733_v32, %v1623_v59  ;;  %v1641_v9 = vsub.f32 1.0, %v1640_v34  ;;  %v1648_v19 = vand.u32 2147483647, %v1638_v62 }
 0x2a8   :  { %v1632_v51 = vsel %vm1629_vm3, %v1631_v10, %v1627_v63  ;;  %v1655_v23 = vmul.f32 %v3737_v48, %v1613_v60  ;;  %v1529_v5 = vpop.f32.mrf.mxu2  ;;  %v1528_v34 = vadd.f32 %v1527_v33, %v5866_v11 }
 0x2a9   :  { %v1654_v28 = vmul.f32 %v1632_v51, %v4708_v8  ;;  %v1642_v12 = vmul.f32 %v3735_v39, %v1641_v9  ;;  %vm1649_vm7 = vcmp.eq.f32.partialorder %v1648_v19, 8.507059e+37 }
 0x2aa   :  { %v4856_v15 = vpop.f32.mrf.mxu0 }
 0x2ab   :  { %v4858_v37 = vadd.f32 %v1655_v23, %v1654_v28  ;;  %v1643_v20 = vadd.f32 %v3735_v39, %v1642_v12 }
 0x2ad   :  { %3738 = vtanh.f32 %v4858_v37  ;;  %v1647_v56 = vsel %vm1646_vm6, %v3735_v39, %v1643_v20  ;;  %v187_v39 = vld [vmem:[%s5452_s0 + $0x20] sm:$0xff] }
 0x2ae   :  { %v1652_v23 = vsel %vm1649_vm7, %v1651_v22, %v1647_v56  ;;  %214 = vperm.xlu2 %3642, %v187_v39  }
 0x2b0   :  { %v1579_v32 = vpop.f32.mrf.mxu2  ;;  %v1514_v5 = vpop.f32.mrf.mxu1 }
 0x2b1   :  { %v1515_v8 = vadd.f32 %v1514_v5, %v1502_v49  ;;  %v1580_v49 = vadd.f32 %v1579_v32, %v4549_v30 }
 0x2b2   :  { %v1555_v9 = vpop.f32.mrf.mxu0 }
 0x2b3   :  { %v3739_v61 = vpop.eup %3738  ;;  %v3504_v4 = vmul.f32 -1.442695, %v1515_v8 }
 0x2b4   :  { %v1658_v59 = vmul.f32 %v3739_v61, %v1652_v23 }
 0x2b5   :  { %3740 = vpow2.f32 %v3504_v4  ;;  %v1554_v4 = vadd.f32 %v4856_v15, %v4559_v57 }
 0x2b6   :  { %v4863_v10 = vpack.c.bf16 %v1658_v59, %v1658_v59  ;;  %v1540_v62 = vpop.f32.mrf.mxu3 }
 0x2b7   :  { %v1541_v48 = vadd.f32 %v1540_v62, %v1528_v34 }
 0x2b8   :  { %v1581_v60 = vpop.f32.mrf.mxu2  ;;  %1731 = vmatmul.bf16.vlgmr.msrb.gmra.mxu0 %v4863_v10  ;;  %1744 = vmatmul.bf16.vlgmr.msrb.gmra.mxu1 %v4863_v10  ;;  %v1516_v55 = vpop.f32.mrf.mxu1 }
 0x2b9   :  { %v3505_v63 = vmul.f32 -1.442695, %v1541_v48  ;;  %1757 = vmatmul.bf16.vlgmr.msrb.gmra.mxu2 %v4863_v10  ;;  %1770 = vmatmul.bf16.vlgmr.msrb.gmra.mxu3 %v4863_v10 }
 0x2ba   :  { %1832 = vmatpush.bf16.msrb.mxu0 %v4341_v2  ;;  %1858 = vmatpush.bf16.msrb.mxu2 %v5793_v7 }
 0x2bb   :  { %v3741_v33 = vpop.eup %3740  ;;  %3742 = vpow2.f32 %v3505_v63  ;;  %1845 = vmatpush.bf16.msrb.mxu1 %v5794_v29  ;;  %1871 = vmatpush.bf16.msrb.mxu3 %v5795_v0 }
 0x2bc   :  { %v4875_v51 = vadd.f32 1.0, %v3741_v33 }
 0x2be   :  { %3744 = vrcp.f32 %v4875_v51  ;;  %1833 = vmatpush.bf16.msrb.mxu0 %v5798_v25  ;;  %1859 = vmatpush.bf16.msrb.mxu2 %v5799_v26  ;;  %v1542_v28 = vpop.f32.mrf.mxu3  ;;  %v1674_v15 = vand.u32 2147483648, %v4875_v51  ;;  %vm1668_vm10 = vweird.f32 %v4875_v51  ;;  %v1672_v33 = vand.u32 2147483647, %v4875_v51 }
 0x2bf   :  { %1846 = vmatpush.bf16.msrb.mxu1 %v5800_v41  ;;  %1872 = vmatpush.bf16.msrb.mxu3 %v5801_v58 }
 0x2c0   :  { %v1566_v12 = vpop.f32.mrf.mxu1  ;;  %vm1673_vm15 = vcmp.eq.f32.partialorder %v1672_v33, 8.507059e+37  ;;  %v5952_v33 = vld [vmem:[#allocation21_spill] sm:$0xff] }
 0x2c1   :  { %v3743_v20 = vpop.eup %3742  ;;  %v1567_v62 = vadd.f32 %v1566_v12, %v1554_v4  ;;  %v5947_v4 = vld [vmem:[#allocation13_spill] sm:$0xff] }
 0x2c2   :  { %v1681_v24 = vadd.f32 1.0, %v3743_v20  ;;  %1834 = vmatpush.bf16.msrb.mxu0 %v5802_v21  ;;  %1860 = vmatpush.bf16.msrb.mxu2 %v5803_v18 }
 0x2c3   :  { %1847 = vmatpush.bf16.msrb.mxu1 %v5804_v42  ;;  %1873 = vmatpush.bf16.msrb.mxu3 %v5867_v35 }
 0x2c4   :  { %v3745_v19 = vpop.eup %3744  ;;  %3746 = vrcp.f32 %v1681_v24  ;;  %v1693_v48 = vand.u32 2147483648, %v1681_v24  ;;  %v1691_v63 = vand.u32 2147483647, %v1681_v24  ;;  %vm1687_vm11 = vweird.f32 %v1681_v24 }
 0x2c5   :  { %v1664_v56 = vmul.f32 %v3745_v19, %v4875_v51  ;;  %vm1669_vm8 = vweird.f32 %v3745_v19  ;;  %v1675_v51 = vor.u32 1.1754944e-38, %v1674_v15 }
 0x2c6   :  { %1835 = vmatpush.bf16.msrb.mxu0 %v5868_v14  ;;  %1861 = vmatpush.bf16.msrb.mxu2 %v5869_v17  ;;  %v1592_v5 = vpop.f32.mrf.mxu3  ;;  %vm4908_vm12 = vmor %vm1668_vm10, %vm1669_vm8  ;;  %vm1692_vm14 = vcmp.eq.f32.partialorder %v1691_v63, 8.507059e+37  ;;  %v5951_v63 = vld [vmem:[#allocation20_spill] sm:$0xff] }
 0x2c7   :  { %v1665_v22 = vsub.f32 1.0, %v1664_v56  ;;  %v1593_v8 = vadd.f32 %v1592_v5, %v1580_v49  ;;  %1848 = vmatpush.bf16.msrb.mxu1 %v5872_v27  ;;  %1874 = vmatpush.bf16.msrb.mxu3 %v5873_v3  ;;  %v1694_v49 = vor.u32 1.1754944e-38, %v1693_v48  ;;  %v5949_v48 = vld [vmem:[#allocation16_spill] sm:$0xff] }
 0x2c8   :  { %1788 = vmatmul.bf16.vlgmr.msra.gmra.mxu0 %v4863_v10  ;;  %v1568_v9 = vpop.f32.mrf.mxu1 }
 0x2c9   :  { %v3506_v61 = vmul.f32 -1.442695, %v1593_v8  ;;  %1814 = vmatmul.bf16.vlgmr.msra.gmra.mxu2 %v4863_v10  ;;  %v1666_v23 = vmul.f32 %v3745_v19, %v1665_v22 }
 0x2ca   :  { %v3747_v32 = vpop.eup %3746  ;;  %1836 = vmatpush.bf16.msrb.mxu0 %v5874_v43  ;;  %1862 = vmatpush.bf16.msrb.mxu2 %v5875_v47 }
 0x2cb   :  { %v1683_v59 = vmul.f32 %v3747_v32, %v1681_v24  ;;  %3748 = vpow2.f32 %v3506_v61  ;;  %1849 = vmatpush.bf16.msrb.mxu1 %v5813_v1  ;;  %1875 = vmatpush.bf16.msrb.mxu3 %v5814_v6  ;;  %v1667_v60 = vadd.f32 %v3745_v19, %v1666_v23  ;;  %vm1688_vm9 = vweird.f32 %v3747_v32  ;;  %v5945_v61 = vld [vmem:[#allocation12_spill] sm:$0xff]  ;;  %v5946_v23 = vld [vmem:[#allocation105_spill] sm:$0xff] }
 0x2cc   :  { %3750 = vtanh.f32 %v1567_v62  ;;  %vm1689_vm13 = vmor %vm1687_vm11, %vm1688_vm9 }
 0x2cd   :  { %v1684_v34 = vsub.f32 1.0, %v1683_v59  ;;  %v1671_v56 = vsel %vm4908_vm12, %v3745_v19, %v1667_v60  ;;  %v5950_v60 = vld [vmem:[#allocation17_spill] sm:$0xff] }
 0x2ce   :  { %1837 = vmatpush.bf16.msrb.mxu0 %v5815_v38  ;;  %1863 = vmatpush.bf16.msrb.mxu2 %v5816_v45  ;;  %v1594_v55 = vpop.f32.mrf.mxu3  ;;  %v1676_v8 = vsel %vm1673_vm15, %v1675_v51, %v1671_v56 }
 0x2cf   :  { %v1685_v39 = vmul.f32 %v3747_v32, %v1684_v34  ;;  %1850 = vmatpush.bf16.msrb.mxu1 %v4413_v36  ;;  %1876 = vmatpush.bf16.msrb.mxu3 %v4411_v46 }
 0x2d1   :  { %v3749_v28 = vpop.eup %3748  ;;  %v1686_v20 = vadd.f32 %v3747_v32, %v1685_v39 }
 0x2d2   :  { %v1701_v5 = vadd.f32 1.0, %v3749_v28  ;;  %1838 = vmatpush.bf16.msrb.mxu0 %v4417_v13  ;;  %1864 = vmatpush.bf16.msrb.mxu2 %v4419_v54  ;;  %v3751_v19 = vpop.eup %3750 }
 0x2d3   :  { %v1690_v22 = vsel %vm1689_vm13, %v3747_v32, %v1686_v20  ;;  %1851 = vmatpush.bf16.msrb.mxu1 %v4425_v53  ;;  %1877 = vmatpush.bf16.msrb.mxu3 %v4423_v31  ;;  %v1718_v32 = vmul.f32 %v3751_v19, %v1676_v8  ;;  %v5956_v19 = vld [vmem:[#allocation29_spill] sm:$0xff] }
 0x2d4   :  { %v1695_v24 = vsel %vm1692_vm14, %v1694_v49, %v1690_v22  ;;  %3752 = vrcp.f32 %v1701_v5  ;;  %v1713_v39 = vand.u32 2147483648, %v1701_v5  ;;  %vm1707_vm1 = vweird.f32 %v1701_v5  ;;  %v5953_v49 = vld [vmem:[#allocation24_spill] sm:$0xff]  ;;  %v5954_v22 = vld [vmem:[#allocation25_spill] sm:$0xff] }
 0x2d5   :  { %v1717_v9 = vmul.f32 %v1695_v24, %v4770_v16  ;;  %v188_v16 = vld [vmem:[%s5452_s0 + $0x28] sm:$0xff] }
 0x2d6   :  { %1839 = vmatpush.bf16.msrb.mxu0 %v4429_v40  ;;  %1865 = vmatpush.bf16.msrb.mxu2 %v4431_v52  ;;  %v1714_v12 = vor.u32 1.1754944e-38, %v1713_v39  ;;  %v5963_v39 = vld [vmem:[#allocation36_spill] sm:$0xff] }
 0x2d7   :  { %1852 = vmatpush.bf16.msrb.mxu1 %v4437_v44  ;;  %1878 = vmatpush.bf16.msrb.mxu3 %v5946_v23  ;;  %v4930_v34 = vadd.f32 %v1718_v32, %v1717_v9  ;;  %v5955_v9 = vld [vmem:[#allocation28_spill] sm:$0xff]  ;;  %v5957_v32 = vld [vmem:[#allocation15_spill] sm:$0xff] }
 0x2d8   :  { %219 = vperm.xlu2 %3642, %v188_v16   ;;  %v5959_v16 = vld [vmem:[#allocation32_spill] sm:$0xff] }
 0x2d9   :  { %1840 = vmatmul.bf16.vlgmr.msrb.gmra.mxu0 %v4863_v10  ;;  %1866 = vmatmul.bf16.vlgmr.msrb.gmra.mxu2 %v4863_v10  ;;  %5948 = vst [vmem:[#allocation86_spill] sm:$0xff] %v4930_v34  ;;  %3754 = vtanh.f32 %v4930_v34  ;;  %v1711_v10 = vand.u32 2147483647, %v1701_v5  ;;  %v6017_v34 = vld [vmem:[#allocation74_spill] sm:$0xff] }
 0x2da   :  { %2011 = vmatpush.bf16.msra.mxu0 %v5945_v61  ;;  %2037 = vmatpush.bf16.msra.mxu2 %v5947_v4  ;;  %v3753_v59 = vpop.eup %3752 }
 0x2db   :  { %v1703_v62 = vmul.f32 %v3753_v59, %v1701_v5  ;;  %vm1708_vm0 = vweird.f32 %v3753_v59  ;;  %vm1712_vm3 = vcmp.eq.f32.partialorder %v1711_v10, 8.507059e+37  ;;  %v5958_v5 = vld [vmem:[#allocation14_spill] sm:$0xff]  ;;  %v5965_v10 = vld [vmem:[#allocation23_spill] sm:$0xff] }
 0x2dc   :  { %vm1709_vm2 = vmor %vm1707_vm1, %vm1708_vm0 }
 0x2dd   :  { %v1704_v55 = vsub.f32 1.0, %v1703_v62  ;;  %v5961_v62 = vld [vmem:[#allocation19_spill] sm:$0xff] }
 0x2de   :  { %2012 = vmatpush.bf16.msra.mxu0 %v5949_v48  ;;  %2038 = vmatpush.bf16.msra.mxu2 %v5950_v60 }
 0x2df   :  { %v1705_v15 = vmul.f32 %v3753_v59, %v1704_v55  ;;  %v3755_v56 = vpop.eup %3754  ;;  %v5962_v55 = vld [vmem:[#allocation18_spill] sm:$0xff] }
 0x2e1   :  { %v1706_v28 = vadd.f32 %v3753_v59, %v1705_v15  ;;  %v5964_v15 = vld [vmem:[#allocation37_spill] sm:$0xff] }
 0x2e2   :  { %2013 = vmatpush.bf16.msra.mxu0 %v5951_v63  ;;  %2039 = vmatpush.bf16.msra.mxu2 %v5952_v33 }
 0x2e3   :  { %v1710_v20 = vsel %vm1709_vm2, %v3753_v59, %v1706_v28  ;;  %v5960_v59 = vld [vmem:[#allocation33_spill] sm:$0xff]  ;;  %v5966_v28 = vld [vmem:[#allocation22_spill] sm:$0xff] }
 0x2e4   :  { %v1715_v51 = vsel %vm1712_vm3, %v1714_v12, %v1710_v20  ;;  %v5967_v12 = vld [vmem:[#allocation42_spill] sm:$0xff]  ;;  %v5968_v20 = vld [vmem:[#allocation43_spill] sm:$0xff] }
 0x2e5   :  { %v1721_v24 = vmul.f32 %v3755_v56, %v1715_v51  ;;  %v5969_v56 = vld [vmem:[#allocation45_spill] sm:$0xff]  ;;  %v5970_v51 = vld [vmem:[#allocation46_spill] sm:$0xff] }
 0x2e6   :  { %2014 = vmatpush.bf16.msra.mxu0 %v5953_v49  ;;  %2040 = vmatpush.bf16.msra.mxu2 %v5954_v22 }
 0x2e7   :  { %v1779_v8 = vpack.c.bf16 %v1721_v24, %v1721_v24  ;;  %v5971_v24 = vld [vmem:[#allocation27_spill] sm:$0xff] }
 0x2e9   :  { %1801 = vmatmul.bf16.vlgmr.msra.gmra.mxu1 %v1779_v8  ;;  %1827 = vmatmul.bf16.vlgmr.msra.gmra.mxu3 %v1779_v8 }
 0x2ea   :  { %2015 = vmatpush.bf16.msra.mxu0 %v5955_v9  ;;  %2041 = vmatpush.bf16.msra.mxu2 %v5956_v19 }
 0x2eb   :  { %2024 = vmatpush.bf16.msra.mxu1 %v5957_v32  ;;  %2050 = vmatpush.bf16.msra.mxu3 %v5958_v5  ;;  %v5974_v5 = vld [vmem:[#allocation51_spill] sm:$0xff] }
 0x2ee   :  { %2016 = vmatpush.bf16.msra.mxu0 %v5959_v16  ;;  %2042 = vmatpush.bf16.msra.mxu2 %v5960_v59 }
 0x2ef   :  { %2025 = vmatpush.bf16.msra.mxu1 %v5961_v62  ;;  %2051 = vmatpush.bf16.msra.mxu3 %v5962_v55  ;;  %v5972_v62 = vld [vmem:[#allocation26_spill] sm:$0xff] }
 0x2f0   :  { %v5973_v55 = vld [vmem:[#allocation50_spill] sm:$0xff] }
 0x2f2   :  { %2017 = vmatpush.bf16.msra.mxu0 %v5963_v39  ;;  %2043 = vmatpush.bf16.msra.mxu2 %v5964_v15 }
 0x2f3   :  { %2026 = vmatpush.bf16.msra.mxu1 %v5965_v10  ;;  %2052 = vmatpush.bf16.msra.mxu3 %v5966_v28  ;;  %v5975_v10 = vld [vmem:[#allocation31_spill] sm:$0xff]  ;;  %v5976_v28 = vld [vmem:[#allocation30_spill] sm:$0xff] }
 0x2f6   :  { %2018 = vmatpush.bf16.msra.mxu0 %v5967_v12  ;;  %2044 = vmatpush.bf16.msra.mxu2 %v5968_v20  ;;  %v5977_v12 = vld [vmem:[#allocation56_spill] sm:$0xff]  ;;  %v5978_v20 = vld [vmem:[#allocation59_spill] sm:$0xff] }
 0x2f7   :  { %2027 = vmatpush.bf16.msra.mxu1 %v5971_v24  ;;  %2053 = vmatpush.bf16.msra.mxu3 %v5972_v62  ;;  %v5981_v24 = vld [vmem:[#allocation62_spill] sm:$0xff]  ;;  %v5982_v62 = vld [vmem:[#allocation63_spill] sm:$0xff] }
 0x2f9   :  { %1853 = vmatmul.bf16.vlgmr.msrb.gmra.mxu1 %v1779_v8  ;;  %1879 = vmatmul.bf16.vlgmr.msrb.gmra.mxu3 %v1779_v8  ;;  %v5984_v8 = vld [vmem:[#allocation38_spill] sm:$0xff] }
 0x2fa   :  { %2068 = vmatpush.bf16.msrb.mxu0 %v5969_v56  ;;  %2094 = vmatpush.bf16.msrb.mxu2 %v5970_v51  ;;  %v5979_v56 = vld [vmem:[#allocation35_spill] sm:$0xff]  ;;  %v5980_v51 = vld [vmem:[#allocation34_spill] sm:$0xff] }
 0x2fb   :  { %2028 = vmatpush.bf16.msra.mxu1 %v5975_v10  ;;  %2054 = vmatpush.bf16.msra.mxu3 %v5976_v28  ;;  %v5986_v10 = vld [vmem:[#allocation67_spill] sm:$0xff]  ;;  %v5987_v28 = vld [vmem:[#allocation48_spill] sm:$0xff] }
 0x2fe   :  { %2069 = vmatpush.bf16.msrb.mxu0 %v5973_v55  ;;  %2095 = vmatpush.bf16.msrb.mxu2 %v5974_v5  ;;  %v5983_v55 = vld [vmem:[#allocation41_spill] sm:$0xff]  ;;  %v5985_v5 = vld [vmem:[#allocation66_spill] sm:$0xff] }
 0x2ff   :  { %2029 = vmatpush.bf16.msra.mxu1 %v5979_v56  ;;  %2055 = vmatpush.bf16.msra.mxu3 %v5980_v51  ;;  %v5990_v56 = vld [vmem:[#allocation70_spill] sm:$0xff]  ;;  %v5991_v51 = vld [vmem:[#allocation47_spill] sm:$0xff] }
 0x302   :  { %2070 = vmatpush.bf16.msrb.mxu0 %v5977_v12  ;;  %2096 = vmatpush.bf16.msrb.mxu2 %v5978_v20  ;;  %v5988_v12 = vld [vmem:[#allocation44_spill] sm:$0xff]  ;;  %v5989_v20 = vld [vmem:[#allocation49_spill] sm:$0xff] }
 0x303   :  { %2030 = vmatpush.bf16.msra.mxu1 %v5983_v55  ;;  %2056 = vmatpush.bf16.msra.mxu3 %v5984_v8  ;;  %v5994_v55 = vld [vmem:[#allocation75_spill] sm:$0xff]  ;;  %v5995_v8 = vld [vmem:[#allocation54_spill] sm:$0xff] }
 0x306   :  { %2071 = vmatpush.bf16.msrb.mxu0 %v5981_v24  ;;  %2097 = vmatpush.bf16.msrb.mxu2 %v5982_v62  ;;  %v5992_v24 = vld [vmem:[#allocation71_spill] sm:$0xff] }
 0x307   :  { %2031 = vmatpush.bf16.msra.mxu1 %v5987_v28  ;;  %2057 = vmatpush.bf16.msra.mxu3 %v5988_v12  ;;  %v5993_v62 = vld [vmem:[#allocation55_spill] sm:$0xff]  ;;  %v5998_v28 = vld [vmem:[#allocation80_spill] sm:$0xff] }
 0x308   :  { %v5999_v12 = vld [vmem:[#allocation60_spill] sm:$0xff] }
 0x30a   :  { %2072 = vmatpush.bf16.msrb.mxu0 %v5985_v5  ;;  %2098 = vmatpush.bf16.msrb.mxu2 %v5986_v10  ;;  %v5996_v5 = vld [vmem:[#allocation76_spill] sm:$0xff]  ;;  %v5997_v10 = vld [vmem:[#allocation61_spill] sm:$0xff] }
 0x30b   :  { %2081 = vmatpush.bf16.msrb.mxu1 %v5989_v20  ;;  %2107 = vmatpush.bf16.msrb.mxu3 %v5991_v51  ;;  %v6000_v20 = vld [vmem:[#allocation81_spill] sm:$0xff]  ;;  %v6002_v51 = vld [vmem:[#allocation64_spill] sm:$0xff] }
 0x30e   :  { %2073 = vmatpush.bf16.msrb.mxu0 %v5990_v56  ;;  %2099 = vmatpush.bf16.msrb.mxu2 %v5992_v24  ;;  %v6001_v56 = vld [vmem:[#allocation65_spill] sm:$0xff] }
 0x30f   :  { %2082 = vmatpush.bf16.msrb.mxu1 %v5993_v62  ;;  %2108 = vmatpush.bf16.msrb.mxu3 %v5995_v8  ;;  %v6003_v24 = vld [vmem:[#allocation69_spill] sm:$0xff]  ;;  %v6004_v62 = vld [vmem:[#allocation68_spill] sm:$0xff] }
 0x310   :  { %v6006_v8 = vld [vmem:[#allocation72_spill] sm:$0xff] }
 0x312   :  { %2074 = vmatpush.bf16.msrb.mxu0 %v5994_v55  ;;  %2100 = vmatpush.bf16.msrb.mxu2 %v5996_v5  ;;  %v6005_v55 = vld [vmem:[#allocation73_spill] sm:$0xff]  ;;  %v6007_v5 = vld [vmem:[#allocation79_spill] sm:$0xff] }
 0x313   :  { %2083 = vmatpush.bf16.msrb.mxu1 %v5997_v10  ;;  %2109 = vmatpush.bf16.msrb.mxu3 %v5999_v12  ;;  %v6008_v10 = vld [vmem:[#allocation78_spill] sm:$0xff] }
 0x314   :  { %v6010_v12 = vld [vmem:[#allocation82_spill] sm:$0xff] }
 0x316   :  { %2075 = vmatpush.bf16.msrb.mxu0 %v5998_v28  ;;  %2101 = vmatpush.bf16.msrb.mxu2 %v6000_v20  ;;  %v6009_v28 = vld [vmem:[#allocation83_spill] sm:$0xff]  ;;  %v215_v20 = vpop.permute.xlu2 %214 }
 0x317   :  { %2084 = vmatpush.bf16.msrb.mxu1 %v6001_v56  ;;  %2110 = vmatpush.bf16.msrb.mxu3 %v6002_v51  ;;  %v6011_v56 = vld [vmem:[#allocation39_spill] sm:$0xff]  ;;  %v6012_v51 = vld [vmem:[#allocation40_spill] sm:$0xff]  ;;  %v259_v60 = vmul.f32 %v6017_v34, %v215_v20 }
 0x318   :  { %v257_v32 = vmul.f32 %v6011_v56, %v215_v20  ;;  %v258_v15 = vmul.f32 %v6012_v51, %v215_v20 }
 0x31b   :  { %2085 = vmatpush.bf16.msrb.mxu1 %v6003_v24  ;;  %2111 = vmatpush.bf16.msrb.mxu3 %v6004_v62  ;;  %v6013_v24 = vld [vmem:[#allocation53_spill] sm:$0xff] }
 0x31c   :  { %v299_v39 = vadd.f32 %v6013_v24, %v257_v32  ;;  %v6014_v62 = vld [vmem:[#allocation57_spill] sm:$0xff] }
 0x31d   :  { %v300_v59 = vadd.f32 %v6014_v62, %v258_v15 }
 0x31f   :  { %2086 = vmatpush.bf16.msrb.mxu1 %v6005_v55  ;;  %2112 = vmatpush.bf16.msrb.mxu3 %v6006_v8  ;;  %v6015_v8 = vld [vmem:[#allocation52_spill] sm:$0xff] }
 0x320   :  { %v260_v19 = vmul.f32 %v6015_v8, %v215_v20 }
 0x323   :  { %2087 = vmatpush.bf16.msrb.mxu1 %v6007_v5  ;;  %2113 = vmatpush.bf16.msrb.mxu3 %v6008_v10 }
 0x327   :  { %2088 = vmatpush.bf16.msrb.mxu1 %v6009_v28  ;;  %2114 = vmatpush.bf16.msrb.mxu3 %v6010_v12  ;;  %v6016_v28 = vld [vmem:[#allocation58_spill] sm:$0xff] }
 0x328   :  { %v302_v49 = vadd.f32 %v6016_v28, %v260_v19  ;;  %v6018_v19 = vld [vmem:[#allocation77_spill] sm:$0xff] }
 0x335   :  { %v1732_v55 = vpop.f32.mrf.mxu0  ;;  %v1745_v16 = vpop.f32.mrf.mxu1 }
 0x336   :  { %v1775_v5 = vadd.f32 %v1732_v55, %v299_v39  ;;  %v1776_v9 = vadd.f32 %v1745_v16, %v300_v59  ;;  %v301_v16 = vadd.f32 %v6018_v19, %v259_v60 }
 0x338   :  { %v3507_v10 = vmul.f32 -1.442695, %v1775_v5  ;;  %v3508_v22 = vmul.f32 -1.442695, %v1776_v9 }
 0x33a   :  { %3756 = vpow2.f32 %v3507_v10 }
 0x33b   :  { %3758 = vpow2.f32 %v3508_v22 }
 0x33c   :  { %v1758_v12 = vpop.f32.mrf.mxu2  ;;  %v1771_v56 = vpop.f32.mrf.mxu3 }
 0x33d   :  { %v1778_v33 = vadd.f32 %v1771_v56, %v302_v49  ;;  %v1734_v51 = vpop.f32.mrf.mxu0  ;;  %v1747_v63 = vpop.f32.mrf.mxu1 }
 0x33e   :  { %v1777_v63 = vadd.f32 %v1758_v12, %v301_v16 }
 0x33f   :  { %v3509_v32 = vmul.f32 -1.442695, %v1778_v33 }
 0x340   :  { %v3757_v24 = vpop.eup %3756 }
 0x341   :  { %v3759_v15 = vpop.eup %3758  ;;  %v1887_v62 = vadd.f32 1.0, %v3757_v24  ;;  %3760 = vpow2.f32 %v3509_v32 }
 0x342   :  { %v1906_v55 = vadd.f32 1.0, %v3759_v15 }
 0x343   :  { %3762 = vrcp.f32 %v1887_v62  ;;  %v1899_v32 = vand.u32 2147483648, %v1887_v62  ;;  %v1897_v60 = vand.u32 2147483647, %v1887_v62  ;;  %vm1893_vm6 = vweird.f32 %v1887_v62 }
 0x344   :  { %3764 = vrcp.f32 %v1906_v55  ;;  %v1760_v9 = vpop.f32.mrf.mxu2  ;;  %v1773_v5 = vpop.f32.mrf.mxu3  ;;  %vm1912_vm7 = vweird.f32 %v1906_v55 }
 0x345   :  { %v5003_v22 = vpop.f32.mrf.mxu0  ;;  %v1918_v9 = vand.u32 2147483648, %v1906_v55  ;;  %v1900_v16 = vor.u32 1.1754944e-38, %v1899_v32  ;;  %vm1898_vm10 = vcmp.eq.f32.partialorder %v1897_v60, 8.507059e+37 }
 0x347   :  { %v3761_v59 = vpop.eup %3760 }
 0x348   :  { %v1926_v49 = vadd.f32 1.0, %v3761_v59  ;;  %v1916_v59 = vand.u32 2147483647, %v1906_v55 }
 0x349   :  { %v3763_v39 = vpop.eup %3762 }
 0x34a   :  { %v3765_v33 = vpop.eup %3764  ;;  %v1889_v10 = vmul.f32 %v3763_v39, %v1887_v62  ;;  %3766 = vrcp.f32 %v1926_v49  ;;  %vm1894_vm4 = vweird.f32 %v3763_v39  ;;  %vm1917_vm11 = vcmp.eq.f32.partialorder %v1916_v59, 8.507059e+37 }
 0x34b   :  { %v1908_v56 = vmul.f32 %v3765_v33, %v1906_v55  ;;  %3768 = vtanh.f32 %v1777_v63  ;;  %vm1913_vm5 = vweird.f32 %v3765_v33  ;;  %vm1895_vm8 = vmor %vm1893_vm6, %vm1894_vm4  ;;  %vm1932_vm13 = vweird.f32 %v1926_v49 }
 0x34c   :  { %v1890_v51 = vsub.f32 1.0, %v1889_v10  ;;  %v5005_v20 = vpop.f32.mrf.mxu2  ;;  %vm1914_vm9 = vmor %vm1912_vm7, %vm1913_vm5 }
 0x34d   :  { %v1909_v24 = vsub.f32 1.0, %v1908_v56  ;;  %v1791_v15 = vpop.f32.mrf.mxu0  ;;  %v1919_v56 = vor.u32 1.1754944e-38, %v1918_v9 }
 0x34e   :  { %v1891_v5 = vmul.f32 %v3763_v39, %v1890_v51 }
 0x34f   :  { %v1910_v19 = vmul.f32 %v3765_v33, %v1909_v24 }
 0x350   :  { %v3767_v34 = vpop.eup %3766  ;;  %v1892_v12 = vadd.f32 %v3763_v39, %v1891_v5 }
 0x351   :  { %v1911_v10 = vadd.f32 %v3765_v33, %v1910_v19  ;;  %v1928_v28 = vmul.f32 %v3767_v34, %v1926_v49  ;;  %v3769_v63 = vpop.eup %3768  ;;  %vm1933_vm12 = vweird.f32 %v3767_v34 }
 0x352   :  { %v1896_v8 = vsel %vm1895_vm8, %v3763_v39, %v1892_v12  ;;  %v1938_v39 = vand.u32 2147483648, %v1926_v49  ;;  %vm1934_vm14 = vmor %vm1932_vm13, %vm1933_vm12  ;;  %v1790_v12 = vadd.f32 %v5003_v22, %v5865_v50  ;;  %v1816_v22 = vadd.f32 %v5005_v20, %v5866_v11 }
 0x353   :  { %v1901_v15 = vsel %vm1898_vm10, %v1900_v16, %v1896_v8  ;;  %v1915_v51 = vsel %vm1914_vm9, %v3765_v33, %v1911_v10  ;;  %v1929_v48 = vsub.f32 1.0, %v1928_v28  ;;  %v1936_v8 = vand.u32 2147483647, %v1926_v49 }
 0x354   :  { %v1920_v24 = vsel %vm1917_vm11, %v1919_v56, %v1915_v51  ;;  %v1943_v4 = vmul.f32 %v3769_v63, %v1901_v15  ;;  %v1817_v61 = vpop.f32.mrf.mxu2  ;;  %v1939_v9 = vor.u32 1.1754944e-38, %v1938_v39 }
 0x355   :  { %v1942_v5 = vmul.f32 %v1920_v24, %v4858_v37  ;;  %v1930_v62 = vmul.f32 %v3767_v34, %v1929_v48  ;;  %vm1937_vm15 = vcmp.eq.f32.partialorder %v1936_v8, 8.507059e+37 }
 0x356   :  { %v5008_v55 = vpop.f32.mrf.mxu0 }
 0x357   :  { %v5010_v32 = vadd.f32 %v1943_v4, %v1942_v5  ;;  %v1931_v19 = vadd.f32 %v3767_v34, %v1930_v62 }
 0x359   :  { %3770 = vtanh.f32 %v5010_v32  ;;  %v1935_v33 = vsel %vm1934_vm14, %v3767_v34, %v1931_v19 }
 0x35a   :  { %v1940_v37 = vsel %vm1937_vm15, %v1939_v9, %v1935_v33 }
 0x35c   :  { %v1867_v28 = vpop.f32.mrf.mxu2 }
 0x35d   :  { %v1868_v8 = vadd.f32 %v1867_v28, %v4549_v30 }
 0x35e   :  { %v1843_v61 = vpop.f32.mrf.mxu0 }
 0x35f   :  { %v3771_v60 = vpop.eup %3770 }
 0x360   :  { %v1946_v48 = vmul.f32 %v3771_v60, %v1940_v37 }
 0x362   :  { %v5013_v59 = vpack.c.bf16 %v1946_v48, %v1946_v48 }
 0x364   :  { %v1869_v4 = vpop.f32.mrf.mxu2  ;;  %2019 = vmatmul.bf16.vlgmr.msra.gmra.mxu0 %v5013_v59  ;;  %2032 = vmatmul.bf16.vlgmr.msra.gmra.mxu1 %v5013_v59 }
 0x365   :  { %2045 = vmatmul.bf16.vlgmr.msra.gmra.mxu2 %v5013_v59  ;;  %2058 = vmatmul.bf16.vlgmr.msra.gmra.mxu3 %v5013_v59 }
 0x366   :  { %2120 = vmatpush.bf16.msra.mxu0 %v4341_v2  ;;  %2146 = vmatpush.bf16.msra.mxu2 %v5793_v7  ;;  %v1802_v34 = vpop.f32.mrf.mxu1 }
 0x367   :  { %v1803_v49 = vadd.f32 %v1802_v34, %v1790_v12  ;;  %2133 = vmatpush.bf16.msra.mxu1 %v5794_v29  ;;  %2159 = vmatpush.bf16.msra.mxu3 %v5795_v0  ;;  %v1842_v12 = vadd.f32 %v5008_v55, %v4559_v57 }
 0x369   :  { %v3510_v16 = vmul.f32 -1.442695, %v1803_v49 }
 0x36a   :  { %2121 = vmatpush.bf16.msra.mxu0 %v5798_v25  ;;  %2147 = vmatpush.bf16.msra.mxu2 %v5799_v26 }
 0x36b   :  { %3772 = vpow2.f32 %v3510_v16  ;;  %2134 = vmatpush.bf16.msra.mxu1 %v5800_v41  ;;  %2160 = vmatpush.bf16.msra.mxu3 %v5801_v58 }
 0x36c   :  { %v1828_v10 = vpop.f32.mrf.mxu3 }
 0x36d   :  { %v1829_v56 = vadd.f32 %v1828_v10, %v1816_v22 }
 0x36e   :  { %2122 = vmatpush.bf16.msra.mxu0 %v5802_v21  ;;  %2148 = vmatpush.bf16.msra.mxu2 %v5803_v18  ;;  %v1804_v63 = vpop.f32.mrf.mxu1 }
 0x36f   :  { %v3511_v15 = vmul.f32 -1.442695, %v1829_v56  ;;  %2135 = vmatpush.bf16.msra.mxu1 %v5804_v42  ;;  %2161 = vmatpush.bf16.msra.mxu3 %v5867_v35  ;;  %v6019_v63 = vld [vmem:[#allocation12_spill] sm:$0xff] }
 0x371   :  { %v3773_v51 = vpop.eup %3772  ;;  %3774 = vpow2.f32 %v3511_v15  ;;  %v6020_v15 = vld [vmem:[#allocation13_spill] sm:$0xff] }
 0x372   :  { %v5035_v20 = vadd.f32 1.0, %v3773_v51  ;;  %2123 = vmatpush.bf16.msra.mxu0 %v5868_v14  ;;  %2149 = vmatpush.bf16.msra.mxu2 %v5869_v17 }
 0x373   :  { %2136 = vmatpush.bf16.msra.mxu1 %v5872_v27  ;;  %2162 = vmatpush.bf16.msra.mxu3 %v5873_v3 }
 0x374   :  { %3776 = vrcp.f32 %v5035_v20  ;;  %2076 = vmatmul.bf16.vlgmr.msrb.gmra.mxu0 %v5013_v59  ;;  %v1830_v24 = vpop.f32.mrf.mxu3  ;;  %v1962_v51 = vand.u32 2147483648, %v5035_v20  ;;  %vm1956_vm2 = vweird.f32 %v5035_v20 }
 0x375   :  { %2102 = vmatmul.bf16.vlgmr.msrb.gmra.mxu2 %v5013_v59 }
 0x376   :  { %2124 = vmatpush.bf16.msra.mxu0 %v5874_v43  ;;  %2150 = vmatpush.bf16.msra.mxu2 %v5875_v47  ;;  %v1854_v5 = vpop.f32.mrf.mxu1 }
 0x377   :  { %v3775_v62 = vpop.eup %3774  ;;  %2137 = vmatpush.bf16.msra.mxu1 %v5813_v1  ;;  %2163 = vmatpush.bf16.msra.mxu3 %v5814_v6  ;;  %v1855_v16 = vadd.f32 %v1854_v5, %v1842_v12  ;;  %v1960_v5 = vand.u32 2147483647, %v5035_v20  ;;  %v6025_v12 = vld [vmem:[#allocation86_spill] sm:$0xff] }
 0x378   :  { %v1969_v19 = vadd.f32 1.0, %v3775_v62 }
 0x379   :  { %vm1961_vm7 = vcmp.eq.f32.partialorder %v1960_v5, 8.507059e+37 }
 0x37a   :  { %v3777_v39 = vpop.eup %3776  ;;  %3778 = vrcp.f32 %v1969_v19  ;;  %2125 = vmatpush.bf16.msra.mxu0 %v5815_v38  ;;  %2151 = vmatpush.bf16.msra.mxu2 %v5816_v45  ;;  %v1981_v22 = vand.u32 2147483648, %v1969_v19  ;;  %v1979_v24 = vand.u32 2147483647, %v1969_v19  ;;  %vm1975_vm3 = vweird.f32 %v1969_v19 }
 0x37b   :  { %v1952_v33 = vmul.f32 %v3777_v39, %v5035_v20  ;;  %2138 = vmatpush.bf16.msra.mxu1 %v4413_v36  ;;  %2164 = vmatpush.bf16.msra.mxu3 %v4411_v46  ;;  %vm1957_vm0 = vweird.f32 %v3777_v39 }
 0x37c   :  { %v1880_v9 = vpop.f32.mrf.mxu3  ;;  %vm5071_vm4 = vmor %vm1956_vm2, %vm1957_vm0  ;;  %vm1980_vm6 = vcmp.eq.f32.partialorder %v1979_v24, 8.507059e+37 }
 0x37d   :  { %v1953_v61 = vsub.f32 1.0, %v1952_v33  ;;  %v1881_v60 = vadd.f32 %v1880_v9, %v1868_v8  ;;  %v1982_v9 = vor.u32 1.1754944e-38, %v1981_v22  ;;  %v6032_v8 = vld [vmem:[#allocation29_spill] sm:$0xff] }
 0x37e   :  { %2126 = vmatpush.bf16.msra.mxu0 %v4417_v13  ;;  %2152 = vmatpush.bf16.msra.mxu2 %v4419_v54  ;;  %v1856_v37 = vpop.f32.mrf.mxu1 }
 0x37f   :  { %v3512_v48 = vmul.f32 -1.442695, %v1881_v60  ;;  %2139 = vmatpush.bf16.msra.mxu1 %v4425_v53  ;;  %2165 = vmatpush.bf16.msra.mxu3 %v4423_v31  ;;  %v1954_v4 = vmul.f32 %v3777_v39, %v1953_v61  ;;  %v6023_v37 = vld [vmem:[#allocation16_spill] sm:$0xff] }
 0x380   :  { %v3779_v28 = vpop.eup %3778 }
 0x381   :  { %v1971_v34 = vmul.f32 %v3779_v28, %v1969_v19  ;;  %3780 = vpow2.f32 %v3512_v48  ;;  %v1955_v10 = vadd.f32 %v3777_v39, %v1954_v4  ;;  %vm1976_vm1 = vweird.f32 %v3779_v28 }
 0x382   :  { %2127 = vmatpush.bf16.msra.mxu0 %v4429_v40  ;;  %2153 = vmatpush.bf16.msra.mxu2 %v4431_v52  ;;  %3782 = vtanh.f32 %v1855_v16  ;;  %vm1977_vm5 = vmor %vm1975_vm3, %vm1976_vm1  ;;  %v1963_v48 = vor.u32 1.1754944e-38, %v1962_v51  ;;  %v6027_v16 = vld [vmem:[#allocation21_spill] sm:$0xff] }
 0x383   :  { %v1972_v49 = vsub.f32 1.0, %v1971_v34  ;;  %2140 = vmatpush.bf16.msra.mxu1 %v4437_v44  ;;  %2166 = vmatpush.bf16.msra.mxu3 %v5946_v23  ;;  %v1959_v61 = vsel %vm5071_vm4, %v3777_v39, %v1955_v10  ;;  %v6030_v51 = vld [vmem:[#allocation25_spill] sm:$0xff] }
 0x384   :  { %v1882_v56 = vpop.f32.mrf.mxu3  ;;  %v1964_v4 = vsel %vm1961_vm7, %v1963_v48, %v1959_v61 }
 0x385   :  { %v1973_v55 = vmul.f32 %v3779_v28, %v1972_v49  ;;  %2128 = vmatmul.bf16.vlgmr.msra.gmra.mxu0 %v5013_v59  ;;  %2154 = vmatmul.bf16.vlgmr.msra.gmra.mxu2 %v5013_v59  ;;  %v6024_v59 = vld [vmem:[#allocation17_spill] sm:$0xff]  ;;  %v6026_v49 = vld [vmem:[#allocation20_spill] sm:$0xff] }
 0x386   :  { %2299 = vmatpush.bf16.msrb.mxu0 %v6019_v63  ;;  %2325 = vmatpush.bf16.msrb.mxu2 %v6020_v15 }
 0x387   :  { %v3781_v62 = vpop.eup %3780  ;;  %v1974_v33 = vadd.f32 %v3779_v28, %v1973_v55  ;;  %v6029_v55 = vld [vmem:[#allocation24_spill] sm:$0xff] }
 0x388   :  { %v1989_v60 = vadd.f32 1.0, %v3781_v62  ;;  %v3783_v22 = vpop.eup %3782  ;;  %v6031_v62 = vld [vmem:[#allocation28_spill] sm:$0xff] }
 0x389   :  { %v1978_v20 = vsel %vm1977_vm5, %v3779_v28, %v1974_v33  ;;  %v2006_v39 = vmul.f32 %v3783_v22, %v1964_v4 }
 0x38a   :  { %2300 = vmatpush.bf16.msrb.mxu0 %v6023_v37  ;;  %2326 = vmatpush.bf16.msrb.mxu2 %v6024_v59  ;;  %v1983_v19 = vsel %vm1980_vm6, %v1982_v9, %v1978_v20  ;;  %3784 = vrcp.f32 %v1989_v60  ;;  %v2001_v5 = vand.u32 2147483648, %v1989_v60  ;;  %v1999_v9 = vand.u32 2147483647, %v1989_v60  ;;  %v6033_v20 = vld [vmem:[#allocation32_spill] sm:$0xff] }
 0x38b   :  { %v2005_v34 = vmul.f32 %v1983_v19, %v6025_v12  ;;  %vm1995_vm9 = vweird.f32 %v1989_v60  ;;  %v6034_v19 = vld [vmem:[#allocation33_spill] sm:$0xff] }
 0x38c   :  { %v2002_v48 = vor.u32 1.1754944e-38, %v2001_v5  ;;  %vm2000_vm11 = vcmp.eq.f32.partialorder %v1999_v9, 8.507059e+37  ;;  %v6039_v5 = vld [vmem:[#allocation42_spill] sm:$0xff] }
 0x38d   :  { %v5082_v56 = vadd.f32 %v2006_v39, %v2005_v34  ;;  %v6035_v39 = vld [vmem:[#allocation36_spill] sm:$0xff]  ;;  %v6042_v9 = vld [vmem:[#allocation46_spill] sm:$0xff] }
 0x38e   :  { %2301 = vmatpush.bf16.msrb.mxu0 %v6026_v49  ;;  %2327 = vmatpush.bf16.msrb.mxu2 %v6027_v16 }
 0x38f   :  { %6028 = vst [vmem:[#allocation85_spill] sm:$0xff] %v5082_v56  ;;  %3786 = vtanh.f32 %v5082_v56 }
 0x390   :  { %v3785_v10 = vpop.eup %3784 }
 0x391   :  { %v1991_v28 = vmul.f32 %v3785_v10, %v1989_v60  ;;  %vm1996_vm8 = vweird.f32 %v3785_v10  ;;  %v6037_v60 = vld [vmem:[#allocation15_spill] sm:$0xff] }
 0x392   :  { %2302 = vmatpush.bf16.msrb.mxu0 %v6029_v55  ;;  %2328 = vmatpush.bf16.msrb.mxu2 %v6030_v51  ;;  %vm1997_vm10 = vmor %vm1995_vm9, %vm1996_vm8 }
 0x393   :  { %v1992_v24 = vsub.f32 1.0, %v1991_v28  ;;  %v6036_v28 = vld [vmem:[#allocation37_spill] sm:$0xff] }
 0x395   :  { %v1993_v33 = vmul.f32 %v3785_v10, %v1992_v24  ;;  %v3787_v12 = vpop.eup %3786 }
 0x396   :  { %2303 = vmatpush.bf16.msrb.mxu0 %v6031_v62  ;;  %2329 = vmatpush.bf16.msrb.mxu2 %v6032_v8 }
 0x397   :  { %v1994_v61 = vadd.f32 %v3785_v10, %v1993_v33  ;;  %v6038_v33 = vld [vmem:[#allocation14_spill] sm:$0xff] }
 0x399   :  { %v1998_v4 = vsel %vm1997_vm10, %v3785_v10, %v1994_v61  ;;  %v6041_v10 = vld [vmem:[#allocation45_spill] sm:$0xff]  ;;  %v6043_v61 = vld [vmem:[#allocation19_spill] sm:$0xff] }
 0x39a   :  { %2304 = vmatpush.bf16.msrb.mxu0 %v6033_v20  ;;  %2330 = vmatpush.bf16.msrb.mxu2 %v6034_v19  ;;  %v2003_v34 = vsel %vm2000_vm11, %v2002_v48, %v1998_v4  ;;  %v6040_v20 = vld [vmem:[#allocation43_spill] sm:$0xff]  ;;  %v6044_v48 = vld [vmem:[#allocation18_spill] sm:$0xff] }
 0x39b   :  { %v2009_v22 = vmul.f32 %v3787_v12, %v2003_v34  ;;  %v6045_v4 = vld [vmem:[#allocation50_spill] sm:$0xff]  ;;  %v6046_v12 = vld [vmem:[#allocation51_spill] sm:$0xff] }
 0x39c   :  { %v6047_v34 = vld [vmem:[#allocation23_spill] sm:$0xff] }
 0x39d   :  { %v2067_v24 = vpack.c.bf16 %v2009_v22, %v2009_v22  ;;  %v6048_v22 = vld [vmem:[#allocation22_spill] sm:$0xff] }
 0x39e   :  { %2305 = vmatpush.bf16.msrb.mxu0 %v6035_v39  ;;  %2331 = vmatpush.bf16.msrb.mxu2 %v6036_v28 }
 0x39f   :  { %2089 = vmatmul.bf16.vlgmr.msrb.gmra.mxu1 %v2067_v24  ;;  %2115 = vmatmul.bf16.vlgmr.msrb.gmra.mxu3 %v2067_v24 }
 0x3a0   :  { %2312 = vmatpush.bf16.msrb.mxu1 %v6037_v60  ;;  %2338 = vmatpush.bf16.msrb.mxu3 %v6038_v33  ;;  %v6049_v33 = vld [vmem:[#allocation56_spill] sm:$0xff]  ;;  %v6050_v60 = vld [vmem:[#allocation59_spill] sm:$0xff] }
 0x3a2   :  { %2306 = vmatpush.bf16.msrb.mxu0 %v6039_v5  ;;  %2332 = vmatpush.bf16.msrb.mxu2 %v6040_v20  ;;  %v6051_v20 = vld [vmem:[#allocation27_spill] sm:$0xff] }
 0x3a4   :  { %2313 = vmatpush.bf16.msrb.mxu1 %v6043_v61  ;;  %2339 = vmatpush.bf16.msrb.mxu3 %v6044_v48  ;;  %v6054_v61 = vld [vmem:[#allocation63_spill] sm:$0xff] }
 0x3a5   :  { %v6055_v48 = vld [vmem:[#allocation31_spill] sm:$0xff] }
 0x3a6   :  { %2356 = vmatpush.bf16.msra.mxu0 %v6041_v10  ;;  %2382 = vmatpush.bf16.msra.mxu2 %v6042_v9  ;;  %v6052_v10 = vld [vmem:[#allocation26_spill] sm:$0xff] }
 0x3a7   :  { %v6053_v9 = vld [vmem:[#allocation62_spill] sm:$0xff] }
 0x3a8   :  { %2314 = vmatpush.bf16.msrb.mxu1 %v6047_v34  ;;  %2340 = vmatpush.bf16.msrb.mxu3 %v6048_v22  ;;  %v6057_v34 = vld [vmem:[#allocation66_spill] sm:$0xff]  ;;  %v6058_v22 = vld [vmem:[#allocation67_spill] sm:$0xff] }
 0x3aa   :  { %2357 = vmatpush.bf16.msra.mxu0 %v6045_v4  ;;  %2383 = vmatpush.bf16.msra.mxu2 %v6046_v12  ;;  %v6056_v12 = vld [vmem:[#allocation30_spill] sm:$0xff] }
 0x3ac   :  { %2315 = vmatpush.bf16.msrb.mxu1 %v6051_v20  ;;  %2341 = vmatpush.bf16.msrb.mxu3 %v6052_v10  ;;  %v6061_v20 = vld [vmem:[#allocation70_spill] sm:$0xff]  ;;  %v6062_v10 = vld [vmem:[#allocation71_spill] sm:$0xff] }
 0x3ae   :  { %2358 = vmatpush.bf16.msra.mxu0 %v6049_v33  ;;  %2384 = vmatpush.bf16.msra.mxu2 %v6050_v60  ;;  %v6059_v33 = vld [vmem:[#allocation35_spill] sm:$0xff]  ;;  %v6060_v60 = vld [vmem:[#allocation34_spill] sm:$0xff] }
 0x3af   :  { %2141 = vmatmul.bf16.vlgmr.msra.gmra.mxu1 %v2067_v24  ;;  %2167 = vmatmul.bf16.vlgmr.msra.gmra.mxu3 %v2067_v24  ;;  %v6065_v24 = vld [vmem:[#allocation75_spill] sm:$0xff] }
 0x3b0   :  { %2316 = vmatpush.bf16.msrb.mxu1 %v6055_v48  ;;  %2342 = vmatpush.bf16.msrb.mxu3 %v6056_v12  ;;  %v6066_v48 = vld [vmem:[#allocation76_spill] sm:$0xff] }
 0x3b1   :  { %v6067_v12 = vld [vmem:[#allocation48_spill] sm:$0xff] }
 0x3b2   :  { %2359 = vmatpush.bf16.msra.mxu0 %v6053_v9  ;;  %2385 = vmatpush.bf16.msra.mxu2 %v6054_v61  ;;  %v6063_v9 = vld [vmem:[#allocation41_spill] sm:$0xff]  ;;  %v6064_v61 = vld [vmem:[#allocation38_spill] sm:$0xff] }
 0x3b4   :  { %2317 = vmatpush.bf16.msrb.mxu1 %v6059_v33  ;;  %2343 = vmatpush.bf16.msrb.mxu3 %v6060_v60  ;;  %v6070_v33 = vld [vmem:[#allocation47_spill] sm:$0xff]  ;;  %v6071_v60 = vld [vmem:[#allocation80_spill] sm:$0xff] }
 0x3b6   :  { %2360 = vmatpush.bf16.msra.mxu0 %v6057_v34  ;;  %2386 = vmatpush.bf16.msra.mxu2 %v6058_v22  ;;  %v6068_v34 = vld [vmem:[#allocation44_spill] sm:$0xff]  ;;  %v6069_v22 = vld [vmem:[#allocation49_spill] sm:$0xff] }
 0x3b8   :  { %2318 = vmatpush.bf16.msrb.mxu1 %v6063_v9  ;;  %2344 = vmatpush.bf16.msrb.mxu3 %v6064_v61  ;;  %v6074_v9 = vld [vmem:[#allocation54_spill] sm:$0xff]  ;;  %v6075_v61 = vld [vmem:[#allocation61_spill] sm:$0xff] }
 0x3ba   :  { %2361 = vmatpush.bf16.msra.mxu0 %v6061_v20  ;;  %2387 = vmatpush.bf16.msra.mxu2 %v6062_v10  ;;  %v6072_v20 = vld [vmem:[#allocation81_spill] sm:$0xff]  ;;  %v6073_v10 = vld [vmem:[#allocation55_spill] sm:$0xff] }
 0x3bc   :  { %2319 = vmatpush.bf16.msrb.mxu1 %v6067_v12  ;;  %2345 = vmatpush.bf16.msrb.mxu3 %v6068_v34  ;;  %v6078_v12 = vld [vmem:[#allocation64_spill] sm:$0xff]  ;;  %v6079_v34 = vld [vmem:[#allocation69_spill] sm:$0xff] }
 0x3be   :  { %2362 = vmatpush.bf16.msra.mxu0 %v6065_v24  ;;  %2388 = vmatpush.bf16.msra.mxu2 %v6066_v48  ;;  %v6076_v24 = vld [vmem:[#allocation60_spill] sm:$0xff]  ;;  %v6077_v48 = vld [vmem:[#allocation65_spill] sm:$0xff] }
 0x3c0   :  { %2369 = vmatpush.bf16.msra.mxu1 %v6069_v22  ;;  %2395 = vmatpush.bf16.msra.mxu3 %v6070_v33  ;;  %v6080_v22 = vld [vmem:[#allocation68_spill] sm:$0xff]  ;;  %v6081_v33 = vld [vmem:[#allocation73_spill] sm:$0xff] }
 0x3c2   :  { %2363 = vmatpush.bf16.msra.mxu0 %v6071_v60  ;;  %2389 = vmatpush.bf16.msra.mxu2 %v6072_v20  ;;  %v6082_v60 = vld [vmem:[#allocation72_spill] sm:$0xff]  ;;  %v6083_v20 = vld [vmem:[#allocation79_spill] sm:$0xff] }
 0x3c4   :  { %2370 = vmatpush.bf16.msra.mxu1 %v6073_v10  ;;  %2396 = vmatpush.bf16.msra.mxu3 %v6074_v9  ;;  %v6084_v10 = vld [vmem:[#allocation78_spill] sm:$0xff]  ;;  %v220_v9 = vpop.permute.xlu2 %219 }
 0x3c8   :  { %2371 = vmatpush.bf16.msra.mxu1 %v6075_v61  ;;  %2397 = vmatpush.bf16.msra.mxu3 %v6076_v24  ;;  %v6085_v61 = vld [vmem:[#allocation83_spill] sm:$0xff]  ;;  %v6086_v24 = vld [vmem:[#allocation82_spill] sm:$0xff] }
 0x3cc   :  { %2372 = vmatpush.bf16.msra.mxu1 %v6077_v48  ;;  %2398 = vmatpush.bf16.msra.mxu3 %v6078_v12  ;;  %v6087_v48 = vld [vmem:[#allocation39_spill] sm:$0xff]  ;;  %v6088_v12 = vld [vmem:[#allocation40_spill] sm:$0xff] }
 0x3cd   :  { %v261_v4 = vmul.f32 %v6087_v48, %v220_v9  ;;  %v262_v5 = vmul.f32 %v6088_v12, %v220_v9 }
 0x3d0   :  { %2373 = vmatpush.bf16.msra.mxu1 %v6079_v34  ;;  %2399 = vmatpush.bf16.msra.mxu3 %v6080_v22  ;;  %v6089_v34 = vld [vmem:[#allocation53_spill] sm:$0xff] }
 0x3d1   :  { %v303_v28 = vadd.f32 %v6089_v34, %v261_v4  ;;  %v6090_v22 = vld [vmem:[#allocation57_spill] sm:$0xff] }
 0x3d2   :  { %v304_v39 = vadd.f32 %v6090_v22, %v262_v5 }
 0x3d4   :  { %2374 = vmatpush.bf16.msra.mxu1 %v6081_v33  ;;  %2400 = vmatpush.bf16.msra.mxu3 %v6082_v60 }
 0x3d8   :  { %2375 = vmatpush.bf16.msra.mxu1 %v6083_v20  ;;  %2401 = vmatpush.bf16.msra.mxu3 %v6084_v10  ;;  %v6091_v20 = vld [vmem:[#allocation52_spill] sm:$0xff] }
 0x3d9   :  { %v264_v8 = vmul.f32 %v6091_v20, %v220_v9 }
 0x3dc   :  { %2376 = vmatpush.bf16.msra.mxu1 %v6085_v61  ;;  %2402 = vmatpush.bf16.msra.mxu3 %v6086_v24  ;;  %v6092_v61 = vld [vmem:[#allocation58_spill] sm:$0xff] }
 0x3dd   :  { %v306_v24 = vadd.f32 %v6092_v61, %v264_v8 }
 0x3e1   :  { %v2020_v33 = vpop.f32.mrf.mxu0  ;;  %v2033_v19 = vpop.f32.mrf.mxu1 }
 0x3e2   :  { %v2063_v60 = vadd.f32 %v2020_v33, %v303_v28  ;;  %v2064_v56 = vadd.f32 %v2033_v19, %v304_v39  ;;  %v6093_v19 = vld [vmem:[#allocation74_spill] sm:$0xff]  ;;  %v6094_v33 = vld [vmem:[#allocation77_spill] sm:$0xff] }
 0x3e3   :  { %v263_v39 = vmul.f32 %v6093_v19, %v220_v9 }
 0x3e4   :  { %v3513_v10 = vmul.f32 -1.442695, %v2063_v60  ;;  %v3514_v62 = vmul.f32 -1.442695, %v2064_v56 }
 0x3e6   :  { %3788 = vpow2.f32 %v3513_v10  ;;  %v305_v10 = vadd.f32 %v6094_v33, %v263_v39 }
 0x3e7   :  { %3790 = vpow2.f32 %v3514_v62 }
 0x3e8   :  { %v2046_v51 = vpop.f32.mrf.mxu2  ;;  %v2059_v48 = vpop.f32.mrf.mxu3 }
 0x3e9   :  { %v2066_v55 = vadd.f32 %v2059_v48, %v306_v24  ;;  %v2022_v12 = vpop.f32.mrf.mxu0  ;;  %v2035_v16 = vpop.f32.mrf.mxu1 }
 0x3ea   :  { %v2065_v16 = vadd.f32 %v2046_v51, %v305_v10 }
 0x3eb   :  { %v3515_v4 = vmul.f32 -1.442695, %v2066_v55 }
 0x3ec   :  { %v3789_v34 = vpop.eup %3788 }
 0x3ed   :  { %v3791_v5 = vpop.eup %3790  ;;  %v2175_v22 = vadd.f32 1.0, %v3789_v34  ;;  %3792 = vpow2.f32 %v3515_v4 }
 0x3ee   :  { %v2194_v28 = vadd.f32 1.0, %v3791_v5 }
 0x3ef   :  { %3794 = vrcp.f32 %v2175_v22  ;;  %v2187_v19 = vand.u32 2147483648, %v2175_v22  ;;  %v2185_v20 = vand.u32 2147483647, %v2175_v22  ;;  %vm2181_vm14 = vweird.f32 %v2175_v22 }
 0x3f0   :  { %3796 = vrcp.f32 %v2194_v28  ;;  %v2048_v56 = vpop.f32.mrf.mxu2  ;;  %v2061_v60 = vpop.f32.mrf.mxu3  ;;  %v2204_v39 = vand.u32 2147483647, %v2194_v28  ;;  %vm2200_vm15 = vweird.f32 %v2194_v28 }
 0x3f1   :  { %v5150_v62 = vpop.f32.mrf.mxu0  ;;  %v2206_v60 = vand.u32 2147483648, %v2194_v28  ;;  %v2188_v10 = vor.u32 1.1754944e-38, %v2187_v19  ;;  %vm2186_vm2 = vcmp.eq.f32.partialorder %v2185_v20, 8.507059e+37 }
 0x3f2   :  { %vm2205_vm3 = vcmp.eq.f32.partialorder %v2204_v39, 8.507059e+37 }
 0x3f3   :  { %v3793_v8 = vpop.eup %3792 }
 0x3f4   :  { %v2214_v48 = vadd.f32 1.0, %v3793_v8 }
 0x3f5   :  { %v3795_v12 = vpop.eup %3794 }
 0x3f6   :  { %v3797_v55 = vpop.eup %3796  ;;  %v2177_v24 = vmul.f32 %v3795_v12, %v2175_v22  ;;  %3798 = vrcp.f32 %v2214_v48  ;;  %vm2182_vm12 = vweird.f32 %v3795_v12  ;;  %v2226_v20 = vand.u32 2147483648, %v2214_v48 }
 0x3f7   :  { %v2196_v34 = vmul.f32 %v3797_v55, %v2194_v28  ;;  %3800 = vtanh.f32 %v2065_v16  ;;  %vm2201_vm13 = vweird.f32 %v3797_v55  ;;  %vm2183_vm0 = vmor %vm2181_vm14, %vm2182_vm12  ;;  %vm2220_vm5 = vweird.f32 %v2214_v48 }
 0x3f8   :  { %v2178_v4 = vsub.f32 1.0, %v2177_v24  ;;  %v5153_v5 = vpop.f32.mrf.mxu2  ;;  %vm2202_vm1 = vmor %vm2200_vm15, %vm2201_vm13 }
 0x3f9   :  { %v2197_v9 = vsub.f32 1.0, %v2196_v34  ;;  %v2079_v56 = vpop.f32.mrf.mxu0  ;;  %v2207_v34 = vor.u32 1.1754944e-38, %v2206_v60 }
 0x3fa   :  { %v2179_v61 = vmul.f32 %v3795_v12, %v2178_v4 }
 0x3fb   :  { %v2198_v49 = vmul.f32 %v3797_v55, %v2197_v9 }
 0x3fc   :  { %v3799_v8 = vpop.eup %3798  ;;  %v2180_v51 = vadd.f32 %v3795_v12, %v2179_v61 }
 0x3fd   :  { %v2199_v24 = vadd.f32 %v3797_v55, %v2198_v49  ;;  %v2216_v33 = vmul.f32 %v3799_v8, %v2214_v48  ;;  %v3801_v16 = vpop.eup %3800  ;;  %vm2221_vm4 = vweird.f32 %v3799_v8 }
 0x3fe   :  { %v2184_v57 = vsel %vm2183_vm0, %v3795_v12, %v2180_v51  ;;  %vm2222_vm6 = vmor %vm2220_vm5, %vm2221_vm4 }
 0x3ff   :  { %v2189_v56 = vsel %vm2186_vm2, %v2188_v10, %v2184_v57  ;;  %v2203_v4 = vsel %vm2202_vm1, %v3797_v55, %v2199_v24  ;;  %v2217_v59 = vsub.f32 1.0, %v2216_v33  ;;  %v2224_v57 = vand.u32 2147483647, %v2214_v48 }
 0x400   :  { %v2208_v9 = vsel %vm2205_vm3, %v2207_v34, %v2203_v4  ;;  %v2231_v37 = vmul.f32 %v3801_v16, %v2189_v56  ;;  %v2105_v30 = vpop.f32.mrf.mxu2  ;;  %v2227_v55 = vor.u32 1.1754944e-38, %v2226_v20  ;;  %v2078_v48 = vadd.f32 %v5150_v62, %v5865_v50 }
 0x401   :  { %v2230_v61 = vmul.f32 %v2208_v9, %v5010_v32  ;;  %v2218_v22 = vmul.f32 %v3799_v8, %v2217_v59  ;;  %vm2225_vm7 = vcmp.eq.f32.partialorder %v2224_v57, 8.507059e+37  ;;  %v2104_v62 = vadd.f32 %v5153_v5, %v5866_v11  ;;  %v6095_v57 = vld [vmem:[#allocation108_spill] sm:$0xff] }
 0x402   :  { %v5156_v28 = vpop.f32.mrf.mxu0 }
 0x403   :  { %v5158_v19 = vadd.f32 %v2231_v37, %v2230_v61  ;;  %v2219_v49 = vadd.f32 %v3799_v8, %v2218_v22 }
 0x405   :  { %3802 = vtanh.f32 %v5158_v19  ;;  %v2223_v12 = vsel %vm2222_vm6, %v3799_v8, %v2219_v49 }
 0x406   :  { %v2228_v59 = vsel %vm2225_vm7, %v2227_v55, %v2223_v12 }
 0x408   :  { %v5161_v33 = vpop.f32.mrf.mxu2 }
 0x409   :  { %v2156_v12 = vadd.f32 %v5161_v33, %v6095_v57 }
 0x40a   :  { %v2131_v30 = vpop.f32.mrf.mxu0 }
 0x40b   :  { %v3803_v32 = vpop.eup %3802 }
 0x40c   :  { %v2234_v60 = vmul.f32 %v3803_v32, %v2228_v59 }
 0x40e   :  { %v5163_v39 = vpack.c.bf16 %v2234_v60, %v2234_v60 }
 0x410   :  { %v2157_v37 = vpop.f32.mrf.mxu2  ;;  %2307 = vmatmul.bf16.vlgmr.msrb.gmra.mxu0 %v5163_v39  ;;  %2320 = vmatmul.bf16.vlgmr.msrb.gmra.mxu1 %v5163_v39 }
 0x411   :  { %2333 = vmatmul.bf16.vlgmr.msrb.gmra.mxu2 %v5163_v39  ;;  %2346 = vmatmul.bf16.vlgmr.msrb.gmra.mxu3 %v5163_v39  ;;  %v6096_v37 = vld [vmem:[#allocation16_spill] sm:$0xff] }
 0x412   :  { %2408 = vmatpush.bf16.msrb.mxu0 %v4341_v2  ;;  %2434 = vmatpush.bf16.msrb.mxu2 %v5793_v7 }
 0x413   :  { %2421 = vmatpush.bf16.msrb.mxu1 %v5794_v29  ;;  %2447 = vmatpush.bf16.msrb.mxu3 %v5795_v0 }
 0x416   :  { %2409 = vmatpush.bf16.msrb.mxu0 %v5798_v25  ;;  %2435 = vmatpush.bf16.msrb.mxu2 %v5799_v26 }
 0x417   :  { %2422 = vmatpush.bf16.msrb.mxu1 %v5800_v41  ;;  %2448 = vmatpush.bf16.msrb.mxu3 %v5801_v58 }
 0x41a   :  { %2410 = vmatpush.bf16.msrb.mxu0 %v5802_v21  ;;  %2436 = vmatpush.bf16.msrb.mxu2 %v5803_v18 }
 0x41b   :  { %2423 = vmatpush.bf16.msrb.mxu1 %v5804_v42  ;;  %2449 = vmatpush.bf16.msrb.mxu3 %v5867_v35 }
 0x41c   :  { %v2090_v8 = vpop.f32.mrf.mxu1 }
 0x41d   :  { %v2091_v51 = vadd.f32 %v2090_v8, %v2078_v48  ;;  %v6097_v48 = vld [vmem:[#allocation17_spill] sm:$0xff] }
 0x41e   :  { %2411 = vmatpush.bf16.msrb.mxu0 %v5868_v14  ;;  %2437 = vmatpush.bf16.msrb.mxu2 %v5869_v17 }
 0x41f   :  { %v3516_v10 = vmul.f32 -1.442695, %v2091_v51  ;;  %2424 = vmatpush.bf16.msrb.mxu1 %v5872_v27  ;;  %2450 = vmatpush.bf16.msrb.mxu3 %v5873_v3 }
 0x420   :  { %2364 = vmatmul.bf16.vlgmr.msra.gmra.mxu0 %v5163_v39 }
 0x421   :  { %3804 = vpow2.f32 %v3516_v10  ;;  %2390 = vmatmul.bf16.vlgmr.msra.gmra.mxu2 %v5163_v39 }
 0x422   :  { %2412 = vmatpush.bf16.msrb.mxu0 %v5874_v43  ;;  %2438 = vmatpush.bf16.msrb.mxu2 %v5875_v47  ;;  %v2116_v24 = vpop.f32.mrf.mxu3 }
 0x423   :  { %v2117_v34 = vadd.f32 %v2116_v24, %v2104_v62  ;;  %2425 = vmatpush.bf16.msrb.mxu1 %v5813_v1  ;;  %2451 = vmatpush.bf16.msrb.mxu3 %v5814_v6  ;;  %v6099_v62 = vld [vmem:[#allocation20_spill] sm:$0xff]  ;;  %v6100_v24 = vld [vmem:[#allocation21_spill] sm:$0xff] }
 0x424   :  { %v2092_v16 = vpop.f32.mrf.mxu1 }
 0x425   :  { %v3517_v56 = vmul.f32 -1.442695, %v2117_v34 }
 0x426   :  { %2413 = vmatpush.bf16.msrb.mxu0 %v5815_v38  ;;  %2439 = vmatpush.bf16.msrb.mxu2 %v5816_v45 }
 0x427   :  { %v3805_v5 = vpop.eup %3804  ;;  %3806 = vpow2.f32 %v3517_v56  ;;  %2426 = vmatpush.bf16.msrb.mxu1 %v4413_v36  ;;  %2452 = vmatpush.bf16.msrb.mxu3 %v4411_v46 }
 0x428   :  { %v2238_v4 = vadd.f32 1.0, %v3805_v5 }
 0x42a   :  { %3808 = vrcp.f32 %v2238_v4  ;;  %2414 = vmatpush.bf16.msrb.mxu0 %v4417_v13  ;;  %2440 = vmatpush.bf16.msrb.mxu2 %v4419_v54  ;;  %v2118_v9 = vpop.f32.mrf.mxu3  ;;  %vm2244_vm10 = vweird.f32 %v2238_v4 }
 0x42b   :  { %2427 = vmatpush.bf16.msrb.mxu1 %v4425_v53  ;;  %2453 = vmatpush.bf16.msrb.mxu3 %v4423_v31 }
 0x42c   :  { %v2142_v61 = vpop.f32.mrf.mxu1 }
 0x42d   :  { %v3807_v22 = vpop.eup %3806 }
 0x42e   :  { %v2257_v49 = vadd.f32 1.0, %v3807_v22  ;;  %2415 = vmatpush.bf16.msrb.mxu0 %v4429_v40  ;;  %2441 = vmatpush.bf16.msrb.mxu2 %v4431_v52  ;;  %v2250_v22 = vand.u32 2147483648, %v2238_v4 }
 0x42f   :  { %2428 = vmatpush.bf16.msrb.mxu1 %v4437_v44  ;;  %2454 = vmatpush.bf16.msrb.mxu3 %v5946_v23 }
 0x430   :  { %v3809_v20 = vpop.eup %3808  ;;  %3810 = vrcp.f32 %v2257_v49  ;;  %v2269_v16 = vand.u32 2147483648, %v2257_v49  ;;  %vm2263_vm11 = vweird.f32 %v2257_v49 }
 0x431   :  { %v2240_v55 = vmul.f32 %v3809_v20, %v2238_v4  ;;  %2416 = vmatmul.bf16.vlgmr.msrb.gmra.mxu0 %v5163_v39  ;;  %2442 = vmatmul.bf16.vlgmr.msrb.gmra.mxu2 %v5163_v39  ;;  %vm2245_vm8 = vweird.f32 %v3809_v20 }
 0x432   :  { %2587 = vmatpush.bf16.msra.mxu0 %v6019_v63  ;;  %2613 = vmatpush.bf16.msra.mxu2 %v6020_v15  ;;  %v2168_v30 = vpop.f32.mrf.mxu3  ;;  %v6098_v15 = vld [vmem:[#allocation109_spill] sm:$0xff]  ;;  %vm5221_vm12 = vmor %vm2244_vm10, %vm2245_vm8 }
 0x433   :  { %v2241_v32 = vsub.f32 1.0, %v2240_v55  ;;  %v2169_v59 = vadd.f32 %v2168_v30, %v2156_v12  ;;  %v2130_v10 = vadd.f32 %v5156_v28, %v6098_v15  ;;  %v2267_v12 = vand.u32 2147483647, %v2257_v49  ;;  %v6101_v30 = vld [vmem:[#allocation24_spill] sm:$0xff]  ;;  %v6102_v28 = vld [vmem:[#allocation25_spill] sm:$0xff] }
 0x434   :  { %v2144_v60 = vpop.f32.mrf.mxu1  ;;  %v2248_v55 = vand.u32 2147483647, %v2238_v4  ;;  %v6165_v15 = vld [vmem:[#allocation52_spill] sm:$0xff] }
 0x435   :  { %v3518_v8 = vmul.f32 -1.442695, %v2169_v59  ;;  %v2242_v51 = vmul.f32 %v3809_v20, %v2241_v32  ;;  %v2143_v34 = vadd.f32 %v2142_v61, %v2130_v10  ;;  %v2270_v60 = vor.u32 1.1754944e-38, %v2269_v16  ;;  %v6105_v10 = vld [vmem:[#allocation28_spill] sm:$0xff]  ;;  %v6114_v59 = vld [vmem:[#allocation43_spill] sm:$0xff] }
 0x436   :  { %2588 = vmatpush.bf16.msra.mxu0 %v6096_v37  ;;  %2614 = vmatpush.bf16.msra.mxu2 %v6097_v48  ;;  %v3811_v63 = vpop.eup %3810  ;;  %vm2268_vm14 = vcmp.eq.f32.partialorder %v2267_v12, 8.507059e+37  ;;  %vm2249_vm15 = vcmp.eq.f32.partialorder %v2248_v55, 8.507059e+37  ;;  %v6108_v16 = vld [vmem:[#allocation32_spill] sm:$0xff] }
 0x437   :  { %v2259_v33 = vmul.f32 %v3811_v63, %v2257_v49  ;;  %3812 = vpow2.f32 %v3518_v8  ;;  %v2243_v56 = vadd.f32 %v3809_v20, %v2242_v51  ;;  %vm2264_vm9 = vweird.f32 %v3811_v63  ;;  %v6106_v49 = vld [vmem:[#allocation29_spill] sm:$0xff] }
 0x438   :  { %3814 = vtanh.f32 %v2143_v34  ;;  %vm2265_vm13 = vmor %vm2263_vm11, %vm2264_vm9  ;;  %v2251_v8 = vor.u32 1.1754944e-38, %v2250_v22  ;;  %v6112_v22 = vld [vmem:[#allocation37_spill] sm:$0xff] }
 0x439   :  { %v2260_v39 = vsub.f32 1.0, %v2259_v33  ;;  %v2247_v37 = vsel %vm5221_vm12, %v3809_v20, %v2243_v56 }
 0x43a   :  { %2589 = vmatpush.bf16.msra.mxu0 %v6099_v62  ;;  %2615 = vmatpush.bf16.msra.mxu2 %v6100_v24  ;;  %v2170_v5 = vpop.f32.mrf.mxu3  ;;  %v2252_v33 = vsel %vm2249_vm15, %v2251_v8, %v2247_v37  ;;  %v6107_v62 = vld [vmem:[#allocation85_spill] sm:$0xff]  ;;  %v6116_v37 = vld [vmem:[#allocation46_spill] sm:$0xff] }
 0x43b   :  { %v2261_v9 = vmul.f32 %v3811_v63, %v2260_v39  ;;  %v6109_v5 = vld [vmem:[#allocation33_spill] sm:$0xff] }
 0x43d   :  { %v3813_v32 = vpop.eup %3812  ;;  %v2262_v61 = vadd.f32 %v3811_v63, %v2261_v9  ;;  %v6111_v9 = vld [vmem:[#allocation36_spill] sm:$0xff] }
 0x43e   :  { %2590 = vmatpush.bf16.msra.mxu0 %v6101_v30  ;;  %2616 = vmatpush.bf16.msra.mxu2 %v6102_v28  ;;  %v2277_v48 = vadd.f32 1.0, %v3813_v32  ;;  %v3815_v39 = vpop.eup %3814  ;;  %v6113_v32 = vld [vmem:[#allocation42_spill] sm:$0xff] }
 0x43f   :  { %v2266_v4 = vsel %vm2265_vm13, %v3811_v63, %v2262_v61  ;;  %v2294_v34 = vmul.f32 %v3815_v39, %v2252_v33  ;;  %v6117_v33 = vld [vmem:[#allocation50_spill] sm:$0xff] }
 0x440   :  { %v2271_v51 = vsel %vm2268_vm14, %v2270_v60, %v2266_v4  ;;  %3816 = vrcp.f32 %v2277_v48  ;;  %v2289_v55 = vand.u32 2147483648, %v2277_v48  ;;  %v2287_v28 = vand.u32 2147483647, %v2277_v48  ;;  %v6115_v60 = vld [vmem:[#allocation45_spill] sm:$0xff]  ;;  %v6120_v39 = vld [vmem:[#allocation14_spill] sm:$0xff] }
 0x441   :  { %v2293_v24 = vmul.f32 %v2271_v51, %v6107_v62  ;;  %vm2283_vm1 = vweird.f32 %v2277_v48  ;;  %v6118_v62 = vld [vmem:[#allocation51_spill] sm:$0xff] }
 0x442   :  { %2591 = vmatpush.bf16.msra.mxu0 %v6105_v10  ;;  %2617 = vmatpush.bf16.msra.mxu2 %v6106_v49  ;;  %v2290_v8 = vor.u32 1.1754944e-38, %v2289_v55  ;;  %vm2288_vm3 = vcmp.eq.f32.partialorder %v2287_v28, 8.507059e+37  ;;  %v6129_v55 = vld [vmem:[#allocation66_spill] sm:$0xff]  ;;  %v6131_v28 = vld [vmem:[#allocation27_spill] sm:$0xff] }
 0x443   :  { %v5232_v56 = vadd.f32 %v2294_v34, %v2293_v24  ;;  %v6121_v34 = vld [vmem:[#allocation56_spill] sm:$0xff] }
 0x445   :  { %6110 = vst [vmem:[#allocation87_spill] sm:$0xff] %v5232_v56  ;;  %3818 = vtanh.f32 %v5232_v56 }
 0x446   :  { %2592 = vmatpush.bf16.msra.mxu0 %v6108_v16  ;;  %2618 = vmatpush.bf16.msra.mxu2 %v6109_v5  ;;  %v3817_v20 = vpop.eup %3816  ;;  %v6122_v16 = vld [vmem:[#allocation59_spill] sm:$0xff] }
 0x447   :  { %v2279_v63 = vmul.f32 %v3817_v20, %v2277_v48  ;;  %vm2284_vm0 = vweird.f32 %v3817_v20  ;;  %v6119_v48 = vld [vmem:[#allocation15_spill] sm:$0xff] }
 0x448   :  { %vm2285_vm2 = vmor %vm2283_vm1, %vm2284_vm0  ;;  %v6123_v5 = vld [vmem:[#allocation19_spill] sm:$0xff] }
 0x449   :  { %v2280_v12 = vsub.f32 1.0, %v2279_v63  ;;  %v6125_v63 = vld [vmem:[#allocation62_spill] sm:$0xff] }
 0x44a   :  { %2593 = vmatpush.bf16.msra.mxu0 %v6111_v9  ;;  %2619 = vmatpush.bf16.msra.mxu2 %v6112_v22  ;;  %v6126_v9 = vld [vmem:[#allocation63_spill] sm:$0xff] }
 0x44b   :  { %v2281_v30 = vmul.f32 %v3817_v20, %v2280_v12  ;;  %v3819_v51 = vpop.eup %3818  ;;  %v6127_v22 = vld [vmem:[#allocation23_spill] sm:$0xff]  ;;  %v6128_v12 = vld [vmem:[#allocation22_spill] sm:$0xff] }
 0x44d   :  { %v2282_v61 = vadd.f32 %v3817_v20, %v2281_v30  ;;  %v6130_v30 = vld [vmem:[#allocation67_spill] sm:$0xff] }
 0x44e   :  { %2594 = vmatpush.bf16.msra.mxu0 %v6113_v32  ;;  %2620 = vmatpush.bf16.msra.mxu2 %v6114_v59  ;;  %v6132_v32 = vld [vmem:[#allocation26_spill] sm:$0xff] }
 0x44f   :  { %v2286_v4 = vsel %vm2285_vm2, %v3817_v20, %v2282_v61  ;;  %v6124_v20 = vld [vmem:[#allocation18_spill] sm:$0xff]  ;;  %v6134_v61 = vld [vmem:[#allocation71_spill] sm:$0xff] }
 0x450   :  { %v2291_v10 = vsel %vm2288_vm3, %v2290_v8, %v2286_v4  ;;  %v6133_v59 = vld [vmem:[#allocation70_spill] sm:$0xff]  ;;  %v6135_v8 = vld [vmem:[#allocation31_spill] sm:$0xff] }
 0x451   :  { %v2297_v49 = vmul.f32 %v3819_v51, %v2291_v10  ;;  %v6136_v4 = vld [vmem:[#allocation30_spill] sm:$0xff]  ;;  %v6137_v51 = vld [vmem:[#allocation75_spill] sm:$0xff]  ;;  %v6138_v10 = vld [vmem:[#allocation76_spill] sm:$0xff] }
 0x452   :  { %2644 = vmatpush.bf16.msrb.mxu0 %v6115_v60  ;;  %2670 = vmatpush.bf16.msrb.mxu2 %v6116_v37 }
 0x453   :  { %v2355_v24 = vpack.c.bf16 %v2297_v49, %v2297_v49  ;;  %v6139_v49 = vld [vmem:[#allocation35_spill] sm:$0xff] }
 0x455   :  { %2377 = vmatmul.bf16.vlgmr.msra.gmra.mxu1 %v2355_v24  ;;  %2403 = vmatmul.bf16.vlgmr.msra.gmra.mxu3 %v2355_v24 }
 0x456   :  { %2645 = vmatpush.bf16.msrb.mxu0 %v6117_v33  ;;  %2671 = vmatpush.bf16.msrb.mxu2 %v6118_v62 }
 0x457   :  { %2600 = vmatpush.bf16.msra.mxu1 %v6119_v48  ;;  %2626 = vmatpush.bf16.msra.mxu3 %v6120_v39  ;;  %v6140_v48 = vld [vmem:[#allocation34_spill] sm:$0xff]  ;;  %v6141_v39 = vld [vmem:[#allocation80_spill] sm:$0xff] }
 0x45a   :  { %2646 = vmatpush.bf16.msrb.mxu0 %v6121_v34  ;;  %2672 = vmatpush.bf16.msrb.mxu2 %v6122_v16 }
 0x45b   :  { %2601 = vmatpush.bf16.msra.mxu1 %v6123_v5  ;;  %2627 = vmatpush.bf16.msra.mxu3 %v6124_v20  ;;  %v6142_v5 = vld [vmem:[#allocation81_spill] sm:$0xff] }
 0x45c   :  { %v6143_v20 = vld [vmem:[#allocation41_spill] sm:$0xff] }
 0x45e   :  { %2647 = vmatpush.bf16.msrb.mxu0 %v6125_v63  ;;  %2673 = vmatpush.bf16.msrb.mxu2 %v6126_v9 }
 0x45f   :  { %2602 = vmatpush.bf16.msra.mxu1 %v6127_v22  ;;  %2628 = vmatpush.bf16.msra.mxu3 %v6128_v12  ;;  %v6144_v22 = vld [vmem:[#allocation38_spill] sm:$0xff]  ;;  %v6146_v12 = vld [vmem:[#allocation44_spill] sm:$0xff] }
 0x462   :  { %2648 = vmatpush.bf16.msrb.mxu0 %v6129_v55  ;;  %2674 = vmatpush.bf16.msrb.mxu2 %v6130_v30  ;;  %v6166_v30 = vld [vmem:[#allocation83_spill] sm:$0xff] }
 0x463   :  { %2603 = vmatpush.bf16.msra.mxu1 %v6131_v28  ;;  %2629 = vmatpush.bf16.msra.mxu3 %v6132_v32  ;;  %v6147_v28 = vld [vmem:[#allocation49_spill] sm:$0xff]  ;;  %v6148_v32 = vld [vmem:[#allocation47_spill] sm:$0xff] }
 0x465   :  { %2429 = vmatmul.bf16.vlgmr.msrb.gmra.mxu1 %v2355_v24  ;;  %2455 = vmatmul.bf16.vlgmr.msrb.gmra.mxu3 %v2355_v24  ;;  %v6145_v24 = vld [vmem:[#allocation48_spill] sm:$0xff] }
 0x466   :  { %2649 = vmatpush.bf16.msrb.mxu0 %v6133_v59  ;;  %2675 = vmatpush.bf16.msrb.mxu2 %v6134_v61 }
 0x467   :  { %2604 = vmatpush.bf16.msra.mxu1 %v6135_v8  ;;  %2630 = vmatpush.bf16.msra.mxu3 %v6136_v4  ;;  %v6149_v8 = vld [vmem:[#allocation55_spill] sm:$0xff]  ;;  %v6150_v4 = vld [vmem:[#allocation54_spill] sm:$0xff] }
 0x46a   :  { %2650 = vmatpush.bf16.msrb.mxu0 %v6137_v51  ;;  %2676 = vmatpush.bf16.msrb.mxu2 %v6138_v10 }
 0x46b   :  { %2605 = vmatpush.bf16.msra.mxu1 %v6139_v49  ;;  %2631 = vmatpush.bf16.msra.mxu3 %v6140_v48  ;;  %v6151_v49 = vld [vmem:[#allocation61_spill] sm:$0xff]  ;;  %v6152_v48 = vld [vmem:[#allocation60_spill] sm:$0xff] }
 0x46e   :  { %2651 = vmatpush.bf16.msrb.mxu0 %v6141_v39  ;;  %2677 = vmatpush.bf16.msrb.mxu2 %v6142_v5  ;;  %v6153_v5 = vld [vmem:[#allocation65_spill] sm:$0xff] }
 0x46f   :  { %2606 = vmatpush.bf16.msra.mxu1 %v6143_v20  ;;  %2632 = vmatpush.bf16.msra.mxu3 %v6144_v22  ;;  %v6154_v20 = vld [vmem:[#allocation64_spill] sm:$0xff]  ;;  %v6155_v22 = vld [vmem:[#allocation69_spill] sm:$0xff] }
 0x473   :  { %2607 = vmatpush.bf16.msra.mxu1 %v6145_v24  ;;  %2633 = vmatpush.bf16.msra.mxu3 %v6146_v12  ;;  %v6156_v24 = vld [vmem:[#allocation68_spill] sm:$0xff]  ;;  %v225_v12 = vpop.permute.xlu0 %224 }
 0x477   :  { %2657 = vmatpush.bf16.msrb.mxu1 %v6147_v28  ;;  %2683 = vmatpush.bf16.msrb.mxu3 %v6148_v32  ;;  %v6157_v28 = vld [vmem:[#allocation73_spill] sm:$0xff]  ;;  %v6158_v32 = vld [vmem:[#allocation72_spill] sm:$0xff] }
 0x47b   :  { %2658 = vmatpush.bf16.msrb.mxu1 %v6149_v8  ;;  %2684 = vmatpush.bf16.msrb.mxu3 %v6150_v4  ;;  %v6159_v8 = vld [vmem:[#allocation39_spill] sm:$0xff]  ;;  %v6160_v4 = vld [vmem:[#allocation40_spill] sm:$0xff] }
 0x47c   :  { %v265_v39 = vmul.f32 %v6159_v8, %v225_v12  ;;  %v266_v56 = vmul.f32 %v6160_v4, %v225_v12 }
 0x47f   :  { %2659 = vmatpush.bf16.msrb.mxu1 %v6151_v49  ;;  %2685 = vmatpush.bf16.msrb.mxu3 %v6152_v48  ;;  %v6161_v49 = vld [vmem:[#allocation79_spill] sm:$0xff]  ;;  %v6162_v48 = vld [vmem:[#allocation78_spill] sm:$0xff] }
 0x483   :  { %2660 = vmatpush.bf16.msrb.mxu1 %v6153_v5  ;;  %2686 = vmatpush.bf16.msrb.mxu3 %v6154_v20  ;;  %v6163_v5 = vld [vmem:[#allocation53_spill] sm:$0xff] }
 0x484   :  { %v307_v10 = vadd.f32 %v6163_v5, %v265_v39  ;;  %v6164_v20 = vld [vmem:[#allocation57_spill] sm:$0xff] }
 0x485   :  { %v308_v51 = vadd.f32 %v6164_v20, %v266_v56 }
 0x487   :  { %2661 = vmatpush.bf16.msrb.mxu1 %v6155_v22  ;;  %2687 = vmatpush.bf16.msrb.mxu3 %v6156_v24 }
 0x48b   :  { %2662 = vmatpush.bf16.msrb.mxu1 %v6157_v28  ;;  %2688 = vmatpush.bf16.msrb.mxu3 %v6158_v32  ;;  %v268_v28 = vmul.f32 %v6165_v15, %v225_v12  ;;  %v6167_v32 = vld [vmem:[#allocation82_spill] sm:$0xff] }
 0x48c   :  { %v6169_v15 = vld [vmem:[#allocation74_spill] sm:$0xff] }
 0x48d   :  { %v2308_v22 = vpop.f32.mrf.mxu0  ;;  %v2321_v61 = vpop.f32.mrf.mxu1 }
 0x48e   :  { %v2351_v24 = vadd.f32 %v2308_v22, %v307_v10  ;;  %v2352_v59 = vadd.f32 %v2321_v61, %v308_v51 }
 0x48f   :  { %2663 = vmatpush.bf16.msrb.mxu1 %v6161_v49  ;;  %2689 = vmatpush.bf16.msrb.mxu3 %v6162_v48  ;;  %v6168_v49 = vld [vmem:[#allocation58_spill] sm:$0xff] }
 0x490   :  { %v3519_v8 = vmul.f32 -1.442695, %v2351_v24  ;;  %v3520_v4 = vmul.f32 -1.442695, %v2352_v59  ;;  %v310_v48 = vadd.f32 %v6168_v49, %v268_v28  ;;  %v6170_v24 = vld [vmem:[#allocation77_spill] sm:$0xff] }
 0x492   :  { %3820 = vpow2.f32 %v3519_v8 }
 0x493   :  { %2664 = vmatpush.bf16.msrb.mxu1 %v6166_v30  ;;  %2690 = vmatpush.bf16.msrb.mxu3 %v6167_v32  ;;  %3822 = vpow2.f32 %v3520_v4  ;;  %v267_v30 = vmul.f32 %v6169_v15, %v225_v12 }
 0x494   :  { %v2334_v55 = vpop.f32.mrf.mxu2  ;;  %v2347_v39 = vpop.f32.mrf.mxu3 }
 0x495   :  { %v2354_v5 = vadd.f32 %v2347_v39, %v310_v48  ;;  %v2310_v56 = vpop.f32.mrf.mxu0  ;;  %v2323_v20 = vpop.f32.mrf.mxu1  ;;  %v309_v49 = vadd.f32 %v6170_v24, %v267_v30 }
 0x497   :  { %v3521_v9 = vmul.f32 -1.442695, %v2354_v5  ;;  %v2353_v20 = vadd.f32 %v2334_v55, %v309_v49 }
 0x498   :  { %v3821_v10 = vpop.eup %3820 }
 0x499   :  { %v3823_v61 = vpop.eup %3822  ;;  %v2463_v51 = vadd.f32 1.0, %v3821_v10  ;;  %3824 = vpow2.f32 %v3521_v9 }
 0x49a   :  { %v2482_v22 = vadd.f32 1.0, %v3823_v61 }
 0x49b   :  { %3826 = vrcp.f32 %v2463_v51  ;;  %v2475_v15 = vand.u32 2147483648, %v2463_v51  ;;  %v2473_v63 = vand.u32 2147483647, %v2463_v51  ;;  %vm2469_vm6 = vweird.f32 %v2463_v51 }
 0x49c   :  { %3828 = vrcp.f32 %v2482_v22  ;;  %v2336_v59 = vpop.f32.mrf.mxu2  ;;  %v2349_v8 = vpop.f32.mrf.mxu3  ;;  %v2492_v30 = vand.u32 2147483647, %v2482_v22  ;;  %vm2488_vm7 = vweird.f32 %v2482_v22 }
 0x49d   :  { %v5294_v4 = vpop.f32.mrf.mxu0  ;;  %v2494_v8 = vand.u32 2147483648, %v2482_v22  ;;  %v2476_v49 = vor.u32 1.1754944e-38, %v2475_v15  ;;  %vm2474_vm10 = vcmp.eq.f32.partialorder %v2473_v63, 8.507059e+37 }
 0x49e   :  { %vm2493_vm11 = vcmp.eq.f32.partialorder %v2492_v30, 8.507059e+37 }
 0x49f   :  { %v3825_v28 = vpop.eup %3824 }
 0x4a0   :  { %v2502_v48 = vadd.f32 1.0, %v3825_v28 }
 0x4a1   :  { %v3827_v39 = vpop.eup %3826 }
 0x4a2   :  { %v3829_v5 = vpop.eup %3828  ;;  %v2465_v56 = vmul.f32 %v3827_v39, %v2463_v51  ;;  %3830 = vrcp.f32 %v2502_v48  ;;  %vm2470_vm4 = vweird.f32 %v3827_v39  ;;  %v2514_v63 = vand.u32 2147483648, %v2502_v48 }
 0x4a3   :  { %v2484_v10 = vmul.f32 %v3829_v5, %v2482_v22  ;;  %3832 = vtanh.f32 %v2353_v20  ;;  %vm2489_vm5 = vweird.f32 %v3829_v5  ;;  %vm2471_vm8 = vmor %vm2469_vm6, %vm2470_vm4  ;;  %vm2508_vm13 = vweird.f32 %v2502_v48 }
 0x4a4   :  { %v2466_v9 = vsub.f32 1.0, %v2465_v56  ;;  %v5297_v61 = vpop.f32.mrf.mxu2  ;;  %vm2490_vm9 = vmor %vm2488_vm7, %vm2489_vm5 }
 0x4a5   :  { %v2485_v12 = vsub.f32 1.0, %v2484_v10  ;;  %v2367_v59 = vpop.f32.mrf.mxu0  ;;  %v2495_v10 = vor.u32 1.1754944e-38, %v2494_v8 }
 0x4a6   :  { %v2467_v32 = vmul.f32 %v3827_v39, %v2466_v9 }
 0x4a7   :  { %v2486_v57 = vmul.f32 %v3829_v5, %v2485_v12 }
 0x4a8   :  { %v3831_v28 = vpop.eup %3830  ;;  %v2468_v55 = vadd.f32 %v3827_v39, %v2467_v32 }
 0x4a9   :  { %v2487_v56 = vadd.f32 %v3829_v5, %v2486_v57  ;;  %v2504_v24 = vmul.f32 %v3831_v28, %v2502_v48  ;;  %v3833_v20 = vpop.eup %3832  ;;  %vm2509_vm12 = vweird.f32 %v3831_v28 }
 0x4aa   :  { %v2472_v16 = vsel %vm2471_vm8, %v3827_v39, %v2468_v55  ;;  %vm2510_vm14 = vmor %vm2508_vm13, %vm2509_vm12 }
 0x4ab   :  { %v2477_v59 = vsel %vm2474_vm10, %v2476_v49, %v2472_v16  ;;  %v2491_v9 = vsel %vm2490_vm9, %v3829_v5, %v2487_v56  ;;  %v2505_v34 = vsub.f32 1.0, %v2504_v24  ;;  %v2512_v16 = vand.u32 2147483647, %v2502_v48 }
 0x4ac   :  { %v2496_v12 = vsel %vm2493_vm11, %v2495_v10, %v2491_v9  ;;  %v2519_v62 = vmul.f32 %v3833_v20, %v2477_v59  ;;  %v2393_v33 = vpop.f32.mrf.mxu2  ;;  %v2515_v5 = vor.u32 1.1754944e-38, %v2514_v63  ;;  %v2366_v48 = vadd.f32 %v5294_v4, %v5865_v50 }
 0x4ad   :  { %v2518_v32 = vmul.f32 %v2496_v12, %v5158_v19  ;;  %v2506_v51 = vmul.f32 %v3831_v28, %v2505_v34  ;;  %vm2513_vm15 = vcmp.eq.f32.partialorder %v2512_v16, 8.507059e+37  ;;  %v2392_v56 = vadd.f32 %v5297_v61, %v5866_v11 }
 0x4ae   :  { %v5300_v22 = vpop.f32.mrf.mxu0 }
 0x4af   :  { %v5302_v15 = vadd.f32 %v2519_v62, %v2518_v32  ;;  %v2507_v57 = vadd.f32 %v3831_v28, %v2506_v51  ;;  %v6171_v32 = vld [vmem:[#allocation50_spill] sm:$0xff]  ;;  %v6172_v51 = vld [vmem:[#allocation51_spill] sm:$0xff] }
 0x4b1   :  { %3834 = vtanh.f32 %v5302_v15  ;;  %v2511_v39 = vsel %vm2510_vm14, %v3831_v28, %v2507_v57 }
 0x4b2   :  { %v2516_v34 = vsel %vm2513_vm15, %v2515_v5, %v2511_v39  ;;  %v6173_v39 = vld [vmem:[#allocation56_spill] sm:$0xff]  ;;  %v6174_v5 = vld [vmem:[#allocation59_spill] sm:$0xff] }
 0x4b4   :  { %v5305_v24 = vpop.f32.mrf.mxu2 }
 0x4b6   :  { %v2419_v33 = vpop.f32.mrf.mxu0 }
 0x4b7   :  { %v3835_v19 = vpop.eup %3834 }
 0x4b8   :  { %v2522_v8 = vmul.f32 %v3835_v19, %v2516_v34 }
 0x4ba   :  { %v2586_v30 = vpack.c.bf16 %v2522_v8, %v2522_v8  ;;  %v6176_v8 = vld [vmem:[#allocation62_spill] sm:$0xff] }
 0x4bc   :  { %v2445_v62 = vpop.f32.mrf.mxu2  ;;  %2595 = vmatmul.bf16.vlgmr.msra.gmra.mxu0 %v2586_v30  ;;  %2608 = vmatmul.bf16.vlgmr.msra.gmra.mxu1 %v2586_v30 }
 0x4bd   :  { %2621 = vmatmul.bf16.vlgmr.msra.gmra.mxu2 %v2586_v30  ;;  %2634 = vmatmul.bf16.vlgmr.msra.gmra.mxu3 %v2586_v30 }
 0x4be   :  { %2696 = vmatpush.bf16.msra.mxu0 %v4341_v2  ;;  %2722 = vmatpush.bf16.msra.mxu2 %v5793_v7 }
 0x4bf   :  { %2709 = vmatpush.bf16.msra.mxu1 %v5794_v29  ;;  %2735 = vmatpush.bf16.msra.mxu3 %v5795_v0 }
 0x4c2   :  { %2697 = vmatpush.bf16.msra.mxu0 %v5798_v25  ;;  %2723 = vmatpush.bf16.msra.mxu2 %v5799_v26 }
 0x4c3   :  { %2710 = vmatpush.bf16.msra.mxu1 %v5800_v41  ;;  %2736 = vmatpush.bf16.msra.mxu3 %v5801_v58 }
 0x4c6   :  { %2698 = vmatpush.bf16.msra.mxu0 %v5802_v21  ;;  %2724 = vmatpush.bf16.msra.mxu2 %v5803_v18 }
 0x4c7   :  { %2711 = vmatpush.bf16.msra.mxu1 %v5804_v42  ;;  %2737 = vmatpush.bf16.msra.mxu3 %v5867_v35 }
 0x4ca   :  { %2699 = vmatpush.bf16.msra.mxu0 %v5868_v14  ;;  %2725 = vmatpush.bf16.msra.mxu2 %v5869_v17 }
 0x4cb   :  { %2712 = vmatpush.bf16.msra.mxu1 %v5872_v27  ;;  %2738 = vmatpush.bf16.msra.mxu3 %v5873_v3 }
 0x4cc   :  { %2652 = vmatmul.bf16.vlgmr.msrb.gmra.mxu0 %v2586_v30 }
 0x4cd   :  { %2678 = vmatmul.bf16.vlgmr.msrb.gmra.mxu2 %v2586_v30 }
 0x4ce   :  { %2700 = vmatpush.bf16.msra.mxu0 %v5874_v43  ;;  %2726 = vmatpush.bf16.msra.mxu2 %v5875_v47 }
 0x4cf   :  { %2713 = vmatpush.bf16.msra.mxu1 %v5813_v1  ;;  %2739 = vmatpush.bf16.msra.mxu3 %v5814_v6 }
 0x4d2   :  { %2701 = vmatpush.bf16.msra.mxu0 %v5815_v38  ;;  %2727 = vmatpush.bf16.msra.mxu2 %v5816_v45  ;;  %v2378_v28 = vpop.f32.mrf.mxu1 }
 0x4d3   :  { %v2379_v55 = vadd.f32 %v2378_v28, %v2366_v48  ;;  %2714 = vmatpush.bf16.msra.mxu1 %v4413_v36  ;;  %2740 = vmatpush.bf16.msra.mxu3 %v4411_v46 }
 0x4d5   :  { %v3522_v49 = vmul.f32 -1.442695, %v2379_v55 }
 0x4d6   :  { %2702 = vmatpush.bf16.msra.mxu0 %v4417_v13  ;;  %2728 = vmatpush.bf16.msra.mxu2 %v4419_v54 }
 0x4d7   :  { %3836 = vpow2.f32 %v3522_v49  ;;  %2715 = vmatpush.bf16.msra.mxu1 %v4425_v53  ;;  %2741 = vmatpush.bf16.msra.mxu3 %v4423_v31 }
 0x4d8   :  { %v2404_v4 = vpop.f32.mrf.mxu3 }
 0x4d9   :  { %v2405_v10 = vadd.f32 %v2404_v4, %v2392_v56  ;;  %v6178_v4 = vld [vmem:[#allocation66_spill] sm:$0xff] }
 0x4da   :  { %2703 = vmatpush.bf16.msra.mxu0 %v4429_v40  ;;  %2729 = vmatpush.bf16.msra.mxu2 %v4431_v52  ;;  %v2380_v20 = vpop.f32.mrf.mxu1 }
 0x4db   :  { %v3523_v59 = vmul.f32 -1.442695, %v2405_v10  ;;  %2716 = vmatpush.bf16.msra.mxu1 %v4437_v44  ;;  %2742 = vmatpush.bf16.msra.mxu3 %v5946_v23  ;;  %v6179_v10 = vld [vmem:[#allocation67_spill] sm:$0xff]  ;;  %v6180_v20 = vld [vmem:[#allocation109_spill] sm:$0xff] }
 0x4dd   :  { %v3837_v61 = vpop.eup %3836  ;;  %2704 = vmatmul.bf16.vlgmr.msra.gmra.mxu0 %v2586_v30  ;;  %2730 = vmatmul.bf16.vlgmr.msra.gmra.mxu2 %v2586_v30  ;;  %3838 = vpow2.f32 %v3523_v59  ;;  %v6177_v30 = vld [vmem:[#allocation63_spill] sm:$0xff]  ;;  %v2418_v59 = vadd.f32 %v5300_v22, %v6180_v20  ;;  %v6196_v22 = vld [vmem:[#allocation65_spill] sm:$0xff] }
 0x4de   :  { %2876 = vmatpush.bf16.msrb.mxu0 %v6115_v60  ;;  %2902 = vmatpush.bf16.msrb.mxu2 %v6116_v37  ;;  %v2526_v9 = vadd.f32 1.0, %v3837_v61  ;;  %v6175_v37 = vld [vmem:[#allocation108_spill] sm:$0xff] }
 0x4df   :  { %v2444_v33 = vadd.f32 %v5305_v24, %v6175_v37 }
 0x4e0   :  { %3840 = vrcp.f32 %v2526_v9  ;;  %v2406_v12 = vpop.f32.mrf.mxu3  ;;  %vm2532_vm2 = vweird.f32 %v2526_v9 }
 0x4e2   :  { %2877 = vmatpush.bf16.msrb.mxu0 %v6171_v32  ;;  %2903 = vmatpush.bf16.msrb.mxu2 %v6172_v51  ;;  %v2430_v57 = vpop.f32.mrf.mxu1 }
 0x4e3   :  { %v3839_v63 = vpop.eup %3838  ;;  %v2431_v12 = vadd.f32 %v2430_v57, %v2418_v59  ;;  %v6187_v59 = vld [vmem:[#allocation87_spill] sm:$0xff] }
 0x4e4   :  { %v2545_v16 = vadd.f32 1.0, %v3839_v63 }
 0x4e6   :  { %2878 = vmatpush.bf16.msrb.mxu0 %v6173_v39  ;;  %2904 = vmatpush.bf16.msrb.mxu2 %v6174_v5  ;;  %v3841_v60 = vpop.eup %3840  ;;  %3842 = vrcp.f32 %v2545_v16  ;;  %v2557_v32 = vand.u32 2147483648, %v2545_v16  ;;  %v6181_v39 = vld [vmem:[#allocation70_spill] sm:$0xff]  ;;  %v6182_v5 = vld [vmem:[#allocation71_spill] sm:$0xff]  ;;  %vm2551_vm3 = vweird.f32 %v2545_v16 }
 0x4e7   :  { %v2528_v19 = vmul.f32 %v3841_v60, %v2526_v9  ;;  %vm2533_vm0 = vweird.f32 %v3841_v60 }
 0x4e8   :  { %v2456_v34 = vpop.f32.mrf.mxu3  ;;  %vm5359_vm4 = vmor %vm2532_vm2, %vm2533_vm0 }
 0x4e9   :  { %v2529_v62 = vsub.f32 1.0, %v2528_v19  ;;  %v2457_v48 = vadd.f32 %v2456_v34, %v2444_v33  ;;  %v2538_v19 = vand.u32 2147483648, %v2526_v9  ;;  %v2555_v34 = vand.u32 2147483647, %v2545_v16 }
 0x4ea   :  { %2879 = vmatpush.bf16.msrb.mxu0 %v6176_v8  ;;  %2905 = vmatpush.bf16.msrb.mxu2 %v6177_v30  ;;  %v2432_v28 = vpop.f32.mrf.mxu1  ;;  %v2536_v8 = vand.u32 2147483647, %v2526_v9 }
 0x4eb   :  { %v3524_v55 = vmul.f32 -1.442695, %v2457_v48  ;;  %v2530_v56 = vmul.f32 %v3841_v60, %v2529_v62  ;;  %v2558_v62 = vor.u32 1.1754944e-38, %v2557_v32  ;;  %vm2556_vm6 = vcmp.eq.f32.partialorder %v2555_v34, 8.507059e+37 }
 0x4ec   :  { %v3843_v49 = vpop.eup %3842  ;;  %vm2537_vm7 = vcmp.eq.f32.partialorder %v2536_v8, 8.507059e+37 }
 0x4ed   :  { %v2547_v24 = vmul.f32 %v3843_v49, %v2545_v16  ;;  %3844 = vpow2.f32 %v3524_v55  ;;  %v2531_v51 = vadd.f32 %v3841_v60, %v2530_v56  ;;  %vm2552_vm1 = vweird.f32 %v3843_v49  ;;  %v6185_v55 = vld [vmem:[#allocation75_spill] sm:$0xff]  ;;  %v6186_v56 = vld [vmem:[#allocation76_spill] sm:$0xff] }
 0x4ee   :  { %2880 = vmatpush.bf16.msrb.mxu0 %v6178_v4  ;;  %2906 = vmatpush.bf16.msrb.mxu2 %v6179_v10  ;;  %3846 = vtanh.f32 %v2431_v12  ;;  %vm2553_vm5 = vmor %vm2551_vm3, %vm2552_vm1  ;;  %v2539_v4 = vor.u32 1.1754944e-38, %v2538_v19  ;;  %v6189_v12 = vld [vmem:[#allocation81_spill] sm:$0xff] }
 0x4ef   :  { %v2548_v61 = vsub.f32 1.0, %v2547_v24  ;;  %v2535_v48 = vsel %vm5359_vm4, %v3841_v60, %v2531_v51 }
 0x4f0   :  { %v2458_v63 = vpop.f32.mrf.mxu3  ;;  %v2540_v10 = vsel %vm2537_vm7, %v2539_v4, %v2535_v48  ;;  %v6203_v48 = vld [vmem:[#allocation78_spill] sm:$0xff]  ;;  %v6207_v4 = vld [vmem:[#allocation40_spill] sm:$0xff] }
 0x4f1   :  { %v2549_v33 = vmul.f32 %v3843_v49, %v2548_v61  ;;  %v6188_v61 = vld [vmem:[#allocation80_spill] sm:$0xff] }
 0x4f2   :  { %2881 = vmatpush.bf16.msrb.mxu0 %v6181_v39  ;;  %2907 = vmatpush.bf16.msrb.mxu2 %v6182_v5 }
 0x4f3   :  { %v3845_v30 = vpop.eup %3844  ;;  %v2550_v57 = vadd.f32 %v3843_v49, %v2549_v33 }
 0x4f4   :  { %v2565_v28 = vadd.f32 1.0, %v3845_v30  ;;  %v3847_v32 = vpop.eup %3846 }
 0x4f5   :  { %v2554_v9 = vsel %vm2553_vm5, %v3843_v49, %v2550_v57  ;;  %v2582_v60 = vmul.f32 %v3847_v32, %v2540_v10  ;;  %v6199_v57 = vld [vmem:[#allocation68_spill] sm:$0xff] }
 0x4f6   :  { %2882 = vmatpush.bf16.msrb.mxu0 %v6185_v55  ;;  %2908 = vmatpush.bf16.msrb.mxu2 %v6186_v56  ;;  %v2559_v16 = vsel %vm2556_vm6, %v2558_v62, %v2554_v9  ;;  %3848 = vrcp.f32 %v2565_v28  ;;  %v2577_v5 = vand.u32 2147483648, %v2565_v28  ;;  %v2575_v19 = vand.u32 2147483647, %v2565_v28  ;;  %v6202_v62 = vld [vmem:[#allocation79_spill] sm:$0xff] }
 0x4f7   :  { %v2581_v24 = vmul.f32 %v2559_v16, %v6187_v59  ;;  %vm2571_vm9 = vweird.f32 %v2565_v28  ;;  %v6206_v55 = vld [vmem:[#allocation39_spill] sm:$0xff] }
 0x4f8   :  { %vm2576_vm11 = vcmp.eq.f32.partialorder %v2575_v19, 8.507059e+37 }
 0x4f9   :  { %v5372_v63 = vadd.f32 %v2582_v60, %v2581_v24 }
 0x4fa   :  { %2883 = vmatpush.bf16.msrb.mxu0 %v6188_v61  ;;  %2909 = vmatpush.bf16.msrb.mxu2 %v6189_v12 }
 0x4fb   :  { %3850 = vtanh.f32 %v5372_v63 }
 0x4fc   :  { %v3849_v51 = vpop.eup %3848 }
 0x4fd   :  { %v2567_v49 = vmul.f32 %v3849_v51, %v2565_v28  ;;  %vm2572_vm8 = vweird.f32 %v3849_v51  ;;  %v230_v28 = vpop.permute.xlu1 %229 }
 0x4fe   :  { %2928 = vmatpush.bf16.msra.mxu0 %v4341_v2  ;;  %2954 = vmatpush.bf16.msra.mxu2 %v5793_v7  ;;  %vm2573_vm10 = vmor %vm2571_vm9, %vm2572_vm8  ;;  %v2578_v7 = vor.u32 1.1754944e-38, %v2577_v5  ;;  %v269_v56 = vmul.f32 %v6206_v55, %v230_v28  ;;  %v270_v9 = vmul.f32 %v6207_v4, %v230_v28 }
 0x4ff   :  { %v2568_v39 = vsub.f32 1.0, %v2567_v49 }
 0x501   :  { %v2569_v33 = vmul.f32 %v3849_v51, %v2568_v39 }
 0x502   :  { %2929 = vmatpush.bf16.msra.mxu0 %v5798_v25  ;;  %2955 = vmatpush.bf16.msra.mxu2 %v5799_v26  ;;  %v3851_v25 = vpop.eup %3850 }
 0x503   :  { %v2570_v2 = vadd.f32 %v3849_v51, %v2569_v33 }
 0x505   :  { %v2574_v34 = vsel %vm2573_vm10, %v3849_v51, %v2570_v2 }
 0x506   :  { %2930 = vmatpush.bf16.msra.mxu0 %v5802_v21  ;;  %2956 = vmatpush.bf16.msra.mxu2 %v5803_v18  ;;  %v2579_v26 = vsel %vm2576_vm11, %v2578_v7, %v2574_v34  ;;  %v6190_v21 = vld [vmem:[#allocation49_spill] sm:$0xff]  ;;  %v6191_v18 = vld [vmem:[#allocation47_spill] sm:$0xff] }
 0x507   :  { %v2585_v8 = vmul.f32 %v3851_v25, %v2579_v26 }
 0x509   :  { %v2643_v30 = vpack.c.bf16 %v2585_v8, %v2585_v8 }
 0x50a   :  { %2931 = vmatpush.bf16.msra.mxu0 %v5868_v14  ;;  %2957 = vmatpush.bf16.msra.mxu2 %v5869_v17  ;;  %v6192_v14 = vld [vmem:[#allocation55_spill] sm:$0xff]  ;;  %v6193_v17 = vld [vmem:[#allocation54_spill] sm:$0xff] }
 0x50b   :  { %2665 = vmatmul.bf16.vlgmr.msrb.gmra.mxu1 %v2643_v30  ;;  %2691 = vmatmul.bf16.vlgmr.msrb.gmra.mxu3 %v2643_v30 }
 0x50c   :  { %2889 = vmatpush.bf16.msrb.mxu1 %v6190_v21  ;;  %2915 = vmatpush.bf16.msrb.mxu3 %v6191_v18 }
 0x50e   :  { %2932 = vmatpush.bf16.msra.mxu0 %v5874_v43  ;;  %2958 = vmatpush.bf16.msra.mxu2 %v5875_v47  ;;  %v6194_v43 = vld [vmem:[#allocation61_spill] sm:$0xff]  ;;  %v6195_v47 = vld [vmem:[#allocation60_spill] sm:$0xff] }
 0x510   :  { %2890 = vmatpush.bf16.msrb.mxu1 %v6192_v14  ;;  %2916 = vmatpush.bf16.msrb.mxu3 %v6193_v17 }
 0x512   :  { %2933 = vmatpush.bf16.msra.mxu0 %v5815_v38  ;;  %2959 = vmatpush.bf16.msra.mxu2 %v5816_v45  ;;  %v6197_v38 = vld [vmem:[#allocation64_spill] sm:$0xff]  ;;  %v6198_v45 = vld [vmem:[#allocation69_spill] sm:$0xff] }
 0x514   :  { %2891 = vmatpush.bf16.msrb.mxu1 %v6194_v43  ;;  %2917 = vmatpush.bf16.msrb.mxu3 %v6195_v47 }
 0x516   :  { %2934 = vmatpush.bf16.msra.mxu0 %v4417_v13  ;;  %2960 = vmatpush.bf16.msra.mxu2 %v4419_v54  ;;  %v6200_v13 = vld [vmem:[#allocation73_spill] sm:$0xff]  ;;  %v6201_v54 = vld [vmem:[#allocation72_spill] sm:$0xff] }
 0x518   :  { %2892 = vmatpush.bf16.msrb.mxu1 %v6196_v22  ;;  %2918 = vmatpush.bf16.msrb.mxu3 %v6197_v38 }
 0x51a   :  { %2935 = vmatpush.bf16.msra.mxu0 %v4429_v40  ;;  %2961 = vmatpush.bf16.msra.mxu2 %v4431_v52  ;;  %v6204_v40 = vld [vmem:[#allocation83_spill] sm:$0xff]  ;;  %v6205_v52 = vld [vmem:[#allocation82_spill] sm:$0xff] }
 0x51b   :  { %2717 = vmatmul.bf16.vlgmr.msra.gmra.mxu1 %v2643_v30  ;;  %2743 = vmatmul.bf16.vlgmr.msra.gmra.mxu3 %v2643_v30 }
 0x51c   :  { %2893 = vmatpush.bf16.msrb.mxu1 %v6198_v45  ;;  %2919 = vmatpush.bf16.msrb.mxu3 %v6199_v57 }
 0x520   :  { %2894 = vmatpush.bf16.msrb.mxu1 %v6200_v13  ;;  %2920 = vmatpush.bf16.msrb.mxu3 %v6201_v54 }
 0x524   :  { %2895 = vmatpush.bf16.msrb.mxu1 %v6202_v62  ;;  %2921 = vmatpush.bf16.msrb.mxu3 %v6203_v48 }
 0x528   :  { %2896 = vmatpush.bf16.msrb.mxu1 %v6204_v40  ;;  %2922 = vmatpush.bf16.msrb.mxu3 %v6205_v52 }
 0x52c   :  { %2941 = vmatpush.bf16.msra.mxu1 %v5794_v29  ;;  %2967 = vmatpush.bf16.msra.mxu3 %v5795_v0  ;;  %v6208_v29 = vld [vmem:[#allocation53_spill] sm:$0xff] }
 0x52d   :  { %v311_v16 = vadd.f32 %v6208_v29, %v269_v56  ;;  %v6209_v0 = vld [vmem:[#allocation57_spill] sm:$0xff] }
 0x52e   :  { %v312_v10 = vadd.f32 %v6209_v0, %v270_v9 }
 0x530   :  { %2942 = vmatpush.bf16.msra.mxu1 %v5800_v41  ;;  %2968 = vmatpush.bf16.msra.mxu3 %v5801_v58 }
 0x534   :  { %2943 = vmatpush.bf16.msra.mxu1 %v5804_v42  ;;  %2969 = vmatpush.bf16.msra.mxu3 %v5867_v35  ;;  %v6210_v35 = vld [vmem:[#allocation52_spill] sm:$0xff] }
 0x535   :  { %v272_v24 = vmul.f32 %v6210_v35, %v230_v28 }
 0x538   :  { %2944 = vmatpush.bf16.msra.mxu1 %v5872_v27  ;;  %2970 = vmatpush.bf16.msra.mxu3 %v5873_v3  ;;  %v6211_v27 = vld [vmem:[#allocation58_spill] sm:$0xff] }
 0x539   :  { %v2596_v41 = vpop.f32.mrf.mxu0  ;;  %v2609_v59 = vpop.f32.mrf.mxu1  ;;  %v314_v3 = vadd.f32 %v6211_v27, %v272_v24 }
 0x53a   :  { %v2639_v58 = vadd.f32 %v2596_v41, %v311_v16  ;;  %v2640_v42 = vadd.f32 %v2609_v59, %v312_v10 }
 0x53c   :  { %2945 = vmatpush.bf16.msra.mxu1 %v5813_v1  ;;  %2971 = vmatpush.bf16.msra.mxu3 %v5814_v6  ;;  %v3525_v61 = vmul.f32 -1.442695, %v2639_v58  ;;  %v3526_v12 = vmul.f32 -1.442695, %v2640_v42 }
 0x53e   :  { %3852 = vpow2.f32 %v3525_v61 }
 0x53f   :  { %3854 = vpow2.f32 %v3526_v12 }
 0x540   :  { %2946 = vmatpush.bf16.msra.mxu1 %v4413_v36  ;;  %2972 = vmatpush.bf16.msra.mxu3 %v4411_v46  ;;  %v2622_v32 = vpop.f32.mrf.mxu2  ;;  %v2635_v60 = vpop.f32.mrf.mxu3  ;;  %v6212_v46 = vld [vmem:[#allocation74_spill] sm:$0xff] }
 0x541   :  { %v2642_v51 = vadd.f32 %v2635_v60, %v314_v3  ;;  %v2598_v1 = vpop.f32.mrf.mxu0  ;;  %v2611_v49 = vpop.f32.mrf.mxu1  ;;  %v271_v19 = vmul.f32 %v6212_v46, %v230_v28 }
 0x543   :  { %v3527_v6 = vmul.f32 -1.442695, %v2642_v51 }
 0x544   :  { %2947 = vmatpush.bf16.msra.mxu1 %v4425_v53  ;;  %2973 = vmatpush.bf16.msra.mxu3 %v4423_v31  ;;  %v3853_v39 = vpop.eup %3852  ;;  %v6213_v31 = vld [vmem:[#allocation77_spill] sm:$0xff] }
 0x545   :  { %v3855_v5 = vpop.eup %3854  ;;  %v2751_v33 = vadd.f32 1.0, %v3853_v39  ;;  %3856 = vpow2.f32 %v3527_v6  ;;  %v313_v25 = vadd.f32 %v6213_v31, %v271_v19 }
 0x546   :  { %v2770_v36 = vadd.f32 1.0, %v3855_v5 }
 0x547   :  { %3858 = vrcp.f32 %v2751_v33  ;;  %v2641_v30 = vadd.f32 %v2622_v32, %v313_v25  ;;  %v2763_v43 = vand.u32 2147483648, %v2751_v33  ;;  %v2761_v45 = vand.u32 2147483647, %v2751_v33 }
 0x548   :  { %2948 = vmatpush.bf16.msra.mxu1 %v4437_v44  ;;  %2974 = vmatpush.bf16.msra.mxu3 %v5946_v23  ;;  %3860 = vrcp.f32 %v2770_v36  ;;  %v2624_v2 = vpop.f32.mrf.mxu2  ;;  %v2637_v7 = vpop.f32.mrf.mxu3  ;;  %v2782_v22 = vand.u32 2147483648, %v2770_v36  ;;  %v2780_v13 = vand.u32 2147483647, %v2770_v36  ;;  %vm2757_vm14 = vweird.f32 %v2751_v33 }
 0x549   :  { %v5428_v34 = vpop.f32.mrf.mxu0  ;;  %vm2776_vm15 = vweird.f32 %v2770_v36  ;;  %v2764_v48 = vor.u32 1.1754944e-38, %v2763_v43  ;;  %vm2762_vm2 = vcmp.eq.f32.partialorder %v2761_v45, 8.507059e+37 }
 0x54a   :  { %v2783_v28 = vor.u32 1.1754944e-38, %v2782_v22  ;;  %vm2781_vm3 = vcmp.eq.f32.partialorder %v2780_v13, 8.507059e+37  ;;  %v2654_v6 = vadd.f32 %v5428_v34, %v5865_v50 }
 0x54b   :  { %v3857_v53 = vpop.eup %3856 }
 0x54c   :  { %v2790_v26 = vadd.f32 1.0, %v3857_v53 }
 0x54d   :  { %v3859_v8 = vpop.eup %3858 }
 0x54e   :  { %v3861_v21 = vpop.eup %3860  ;;  %v2753_v18 = vmul.f32 %v3859_v8, %v2751_v33  ;;  %3862 = vrcp.f32 %v2790_v26  ;;  %vm2758_vm12 = vweird.f32 %v3859_v8  ;;  %v2802_v24 = vand.u32 2147483648, %v2790_v26 }
 0x54f   :  { %v2772_v44 = vmul.f32 %v3861_v21, %v2770_v36  ;;  %3864 = vtanh.f32 %v2641_v30  ;;  %vm2777_vm13 = vweird.f32 %v3861_v21  ;;  %vm2759_vm0 = vmor %vm2757_vm14, %vm2758_vm12  ;;  %vm2796_vm5 = vweird.f32 %v2790_v26 }
 0x550   :  { %v2754_v23 = vsub.f32 1.0, %v2753_v18  ;;  %v2679_v14 = vpop.f32.mrf.mxu2  ;;  %vm2778_vm1 = vmor %vm2776_vm15, %vm2777_vm13  ;;  %v2800_v61 = vand.u32 2147483647, %v2790_v26  ;;  %v2803_v3 = vor.u32 1.1754944e-38, %v2802_v24 }
 0x551   :  { %v2773_v17 = vsub.f32 1.0, %v2772_v44  ;;  %v2655_v47 = vpop.f32.mrf.mxu0  ;;  %v2680_v36 = vadd.f32 %v2679_v14, %v5866_v11 }
 0x552   :  { %v2755_v38 = vmul.f32 %v3859_v8, %v2754_v23  ;;  %vm2801_vm7 = vcmp.eq.f32.partialorder %v2800_v61, 8.507059e+37 }
 0x553   :  { %v2774_v57 = vmul.f32 %v3861_v21, %v2773_v17 }
 0x554   :  { %v3863_v54 = vpop.eup %3862  ;;  %v2756_v62 = vadd.f32 %v3859_v8, %v2755_v38 }
 0x555   :  { %v2775_v40 = vadd.f32 %v3861_v21, %v2774_v57  ;;  %v2792_v52 = vmul.f32 %v3863_v54, %v2790_v26  ;;  %v3865_v56 = vpop.eup %3864  ;;  %vm2797_vm4 = vweird.f32 %v3863_v54 }
 0x556   :  { %v2760_v55 = vsel %vm2759_vm0, %v3859_v8, %v2756_v62  ;;  %vm2798_vm6 = vmor %vm2796_vm5, %vm2797_vm4 }
 0x557   :  { %v2765_v4 = vsel %vm2762_vm2, %v2764_v48, %v2760_v55  ;;  %v2779_v9 = vsel %vm2778_vm1, %v3861_v21, %v2775_v40  ;;  %v2793_v29 = vsub.f32 1.0, %v2792_v52 }
 0x558   :  { %v2784_v16 = vsel %vm2781_vm3, %v2783_v28, %v2779_v9  ;;  %v2807_v0 = vmul.f32 %v3865_v56, %v2765_v4  ;;  %v2681_v10 = vpop.f32.mrf.mxu2 }
 0x559   :  { %v2806_v41 = vmul.f32 %v2784_v16, %v5302_v15  ;;  %v2794_v59 = vmul.f32 %v3863_v54, %v2793_v29 }
 0x55a   :  { %v2705_v58 = vpop.f32.mrf.mxu0 }
 0x55b   :  { %v2808_v42 = vadd.f32 %v2807_v0, %v2806_v41  ;;  %v2795_v35 = vadd.f32 %v3863_v54, %v2794_v59  ;;  %v2706_v30 = vadd.f32 %v2705_v58, %v6180_v20 }
 0x55d   :  { %3866 = vtanh.f32 %v2808_v42  ;;  %v2799_v27 = vsel %vm2798_vm6, %v3863_v54, %v2795_v35 }
 0x55e   :  { %v2804_v51 = vsel %vm2801_vm7, %v2803_v3, %v2799_v27 }
 0x560   :  { %v2731_v12 = vpop.f32.mrf.mxu2 }
 0x561   :  { %v2732_v44 = vadd.f32 %v2731_v12, %v6175_v37 }
 0x562   :  { %v2707_v32 = vpop.f32.mrf.mxu0 }
 0x563   :  { %v3867_v60 = vpop.eup %3866 }
 0x564   :  { %v2810_v1 = vmul.f32 %v3867_v60, %v2804_v51 }
 0x566   :  { %v2874_v49 = vpack.c.bf16 %v2810_v1, %v2810_v1 }
 0x568   :  { %v2733_v15 = vpop.f32.mrf.mxu2  ;;  %2884 = vmatmul.bf16.vlgmr.msrb.gmra.mxu0 %v2874_v49  ;;  %2910 = vmatmul.bf16.vlgmr.msrb.gmra.mxu2 %v2874_v49 }
 0x578   :  { %2936 = vmatmul.bf16.vlgmr.msra.gmra.mxu0 %v2874_v49  ;;  %2962 = vmatmul.bf16.vlgmr.msra.gmra.mxu2 %v2874_v49 }
 0x588   :  { %v2666_v39 = vpop.f32.mrf.mxu1 }
 0x589   :  { %v2667_v5 = vadd.f32 %v2666_v39, %v2654_v6 }
 0x58b   :  { %v3528_v33 = vmul.f32 -1.442695, %v2667_v5 }
 0x58d   :  { %3868 = vpow2.f32 %v3528_v33 }
 0x58e   :  { %v2692_v46 = vpop.f32.mrf.mxu3 }
 0x58f   :  { %v2693_v19 = vadd.f32 %v2692_v46, %v2680_v36 }
 0x590   :  { %v2668_v2 = vpop.f32.mrf.mxu1 }
 0x591   :  { %v3529_v7 = vmul.f32 -1.442695, %v2693_v19 }
 0x593   :  { %v3869_v53 = vpop.eup %3868  ;;  %3870 = vpow2.f32 %v3529_v7 }
 0x594   :  { %v2814_v31 = vadd.f32 1.0, %v3869_v53 }
 0x596   :  { %3872 = vrcp.f32 %v2814_v31  ;;  %v2694_v25 = vpop.f32.mrf.mxu3  ;;  %v2826_v47 = vand.u32 2147483648, %v2814_v31  ;;  %v2824_v45 = vand.u32 2147483647, %v2814_v31  ;;  %vm2820_vm9 = vweird.f32 %v2814_v31 }
 0x598   :  { %v2718_v26 = vpop.f32.mrf.mxu1  ;;  %v2827_v48 = vor.u32 1.1754944e-38, %v2826_v47  ;;  %vm2825_vm11 = vcmp.eq.f32.partialorder %v2824_v45, 8.507059e+37  ;;  %v3053_v47 = vld [vmem:[#allocation7 + $0x50] sm:$0xff] }
 0x599   :  { %v3871_v8 = vpop.eup %3870  ;;  %v2719_v18 = vadd.f32 %v2718_v26, %v2706_v30 }
 0x59a   :  { %v2833_v34 = vadd.f32 1.0, %v3871_v8  ;;  %v3057_v8 = vld [vmem:[#allocation7 + $0x70] sm:$0xff] }
 0x59c   :  { %v3873_v21 = vpop.eup %3872  ;;  %3874 = vrcp.f32 %v2833_v34  ;;  %v2845_v55 = vand.u32 2147483648, %v2833_v34  ;;  %v2843_v29 = vand.u32 2147483647, %v2833_v34  ;;  %vm2839_vm13 = vweird.f32 %v2833_v34 }
 0x59d   :  { %v2816_v23 = vmul.f32 %v3873_v21, %v2814_v31  ;;  %3876 = vtanh.f32 %v2719_v18  ;;  %vm2821_vm8 = vweird.f32 %v3873_v21  ;;  %v3058_v31 = vld [vmem:[#allocation7 + $0x78] sm:$0xff]  ;;  %v3055_v18 = vld [vmem:[#allocation7 + $0x60] sm:$0xff] }
 0x59e   :  { %v2744_v14 = vpop.f32.mrf.mxu3  ;;  %vm2822_vm10 = vmor %vm2820_vm9, %vm2821_vm8  ;;  %v2846_v41 = vor.u32 1.1754944e-38, %v2845_v55  ;;  %vm2844_vm15 = vcmp.eq.f32.partialorder %v2843_v29, 8.507059e+37  ;;  %3063 = vmatpush.msrb.mxu0 %v3058_v31  ;;  %v3047_v55 = vld [vmem:[#allocation7 + $0x20] sm:$0xff] }
 0x59f   :  { %v2817_v17 = vsub.f32 1.0, %v2816_v23  ;;  %v2745_v43 = vadd.f32 %v2744_v14, %v2732_v44  ;;  %v3054_v14 = vld [vmem:[#allocation7 + $0x58] sm:$0xff] }
 0x5a0   :  { %v2720_v22 = vpop.f32.mrf.mxu1  ;;  %3064 = vmatpush.msrb.mxu0 %v3057_v8 }
 0x5a1   :  { %v2818_v38 = vmul.f32 %v3873_v21, %v2817_v17  ;;  %v3530_v57 = vmul.f32 -1.442695, %v2745_v43  ;;  %v3052_v22 = vld [vmem:[#allocation7 + $0x48] sm:$0xff] }
 0x5a2   :  { %v3875_v13 = vpop.eup %3874 }
 0x5a3   :  { %v2835_v54 = vmul.f32 %v3875_v13, %v2833_v34  ;;  %v2819_v62 = vadd.f32 %v3873_v21, %v2818_v38  ;;  %3878 = vpow2.f32 %v3530_v57  ;;  %v3877_v28 = vpop.eup %3876  ;;  %vm2840_vm12 = vweird.f32 %v3875_v13  ;;  %v3056_v34 = vld [vmem:[#allocation7 + $0x68] sm:$0xff]  ;;  %v3051_v57 = vld [vmem:[#allocation7 + $0x40] sm:$0xff] }
 0x5a4   :  { %vm2841_vm14 = vmor %vm2839_vm13, %vm2840_vm12  ;;  %3065 = vmatpush.msrb.mxu0 %v3056_v34 }
 0x5a5   :  { %v2836_v40 = vsub.f32 1.0, %v2835_v54  ;;  %v2823_v52 = vsel %vm2822_vm10, %v3873_v21, %v2819_v62  ;;  %v3049_v54 = vld [vmem:[#allocation7 + $0x30] sm:$0xff] }
 0x5a6   :  { %v2828_v56 = vsel %vm2825_vm11, %v2827_v48, %v2823_v52  ;;  %v2746_v4 = vpop.f32.mrf.mxu3  ;;  %3066 = vmatpush.msrb.mxu0 %v3055_v18  ;;  %v3048_v48 = vld [vmem:[#allocation7 + $0x28] sm:$0xff] }
 0x5a7   :  { %v2837_v9 = vmul.f32 %v3875_v13, %v2836_v40  ;;  %v2870_v16 = vmul.f32 %v3877_v28, %v2828_v56 }
 0x5a8   :  { %3067 = vmatpush.msrb.mxu0 %v3054_v14 }
 0x5a9   :  { %v3879_v0 = vpop.eup %3878  ;;  %v2838_v10 = vadd.f32 %v3875_v13, %v2837_v9  ;;  %v3046_v9 = vld [vmem:[#allocation7 + $0x18] sm:$0xff] }
 0x5aa   :  { %v2853_v59 = vadd.f32 1.0, %v3879_v0  ;;  %3068 = vmatpush.msrb.mxu0 %v3053_v47 }
 0x5ab   :  { %v2842_v58 = vsel %vm2841_vm14, %v3875_v13, %v2838_v10  ;;  %v3045_v10 = vld [vmem:[#allocation7 + $0x10] sm:$0xff] }
 0x5ac   :  { %v2847_v42 = vsel %vm2844_vm15, %v2846_v41, %v2842_v58  ;;  %3880 = vrcp.f32 %v2853_v59  ;;  %v2865_v3 = vand.u32 2147483648, %v2853_v59  ;;  %v2863_v60 = vand.u32 2147483647, %v2853_v59  ;;  %3069 = vmatpush.msrb.mxu0 %v3052_v22 }
 0x5ad   :  { %v2869_v35 = vmul.f32 %v2847_v42, %v5372_v63  ;;  %vm2859_vm1 = vweird.f32 %v2853_v59 }
 0x5ae   :  { %v2866_v1 = vor.u32 1.1754944e-38, %v2865_v3  ;;  %vm2864_vm3 = vcmp.eq.f32.partialorder %v2863_v60, 8.507059e+37  ;;  %3070 = vmatpush.msrb.mxu0 %v3051_v57  ;;  %v3043_v3 = vld [vmem:[#allocation7] sm:$0xff] }
 0x5af   :  { %v5438_v24 = vadd.f32 %v2870_v16, %v2869_v35 }
 0x5b1   :  { %3882 = vtanh.f32 %v5438_v24 }
 0x5b2   :  { %v3881_v61 = vpop.eup %3880 }
 0x5b3   :  { %v2855_v12 = vmul.f32 %v3881_v61, %v2853_v59  ;;  %vm2860_vm0 = vweird.f32 %v3881_v61 }
 0x5b4   :  { %vm2861_vm2 = vmor %vm2859_vm1, %vm2860_vm0 }
 0x5b5   :  { %v2856_v27 = vsub.f32 1.0, %v2855_v12 }
 0x5b7   :  { %v2857_v32 = vmul.f32 %v3881_v61, %v2856_v27  ;;  %v3883_v15 = vpop.eup %3882 }
 0x5b9   :  { %v2858_v51 = vadd.f32 %v3881_v61, %v2857_v32 }
 0x5bb   :  { %v2862_v49 = vsel %vm2861_vm2, %v3881_v61, %v2858_v51 }
 0x5bc   :  { %v2867_v6 = vsel %vm2864_vm3, %v2866_v1, %v2862_v49 }
 0x5bd   :  { %v2873_v63 = vmul.f32 %v3883_v15, %v2867_v6 }
 0x5bf   :  { %v2875_v39 = vpack.c.bf16 %v2873_v63, %v2873_v63 }
 0x5c1   :  { %2897 = vmatmul.bf16.vlgmr.msrb.gmra.mxu1 %v2875_v39  ;;  %2923 = vmatmul.bf16.vlgmr.msrb.gmra.mxu3 %v2875_v39 }
 0x5d1   :  { %2949 = vmatmul.bf16.vlgmr.msra.gmra.mxu1 %v2875_v39  ;;  %2975 = vmatmul.bf16.vlgmr.msra.gmra.mxu3 %v2875_v39 }
 0x5e5   :  { %v2885_v5 = vpop.f32.mrf.mxu0 }
 0x5e6   :  { %v2886_v25 = vadd.f32 %v2885_v5, %v5865_v50 }
 0x5eb   :  { %v2911_v33 = vpop.f32.mrf.mxu2 }
 0x5ec   :  { %v2912_v44 = vadd.f32 %v2911_v33, %v5866_v11  ;;  %v3050_v11 = vld [vmem:[#allocation7 + $0x38] sm:$0xff] }
 0x5ed   :  { %v2887_v36 = vpop.f32.mrf.mxu0  ;;  %3071 = vmatpush.msrb.mxu0 %v3050_v11 }
 0x5ef   :  { %3072 = vmatpush.msrb.mxu0 %v3049_v54 }
 0x5f1   :  { %3073 = vmatpush.msrb.mxu0 %v3048_v48 }
 0x5f3   :  { %v2913_v46 = vpop.f32.mrf.mxu2  ;;  %3074 = vmatpush.msrb.mxu0 %v3047_v55 }
 0x5f5   :  { %v2937_v19 = vpop.f32.mrf.mxu0  ;;  %3075 = vmatpush.msrb.mxu0 %v3046_v9 }
 0x5f6   :  { %v2938_v52 = vadd.f32 %v2937_v19, %v6180_v20  ;;  %v3044_v20 = vld [vmem:[#allocation7 + $0x8] sm:$0xff] }
 0x5f7   :  { %3076 = vmatpush.msrb.mxu0 %v3045_v10 }
 0x5f9   :  { %3077 = vmatpush.msrb.mxu0 %v3044_v20 }
 0x5fb   :  { %v2963_v2 = vpop.f32.mrf.mxu2  ;;  %3078 = vmatpush.msrb.mxu0 %v3043_v3 }
 0x5fc   :  { %v2964_v29 = vadd.f32 %v2963_v2, %v6175_v37 }
 0x5fd   :  { %v2939_v7 = vpop.f32.mrf.mxu0 }
 0x603   :  { %v2965_v53 = vpop.f32.mrf.mxu2 }
 0x63e   :  { %v2898_v26 = vpop.f32.mrf.mxu1 }
 0x63f   :  { %v2899_v30 = vadd.f32 %v2898_v26, %v2886_v25 }
 0x641   :  { %v3531_v21 = vmul.f32 -1.442695, %v2899_v30 }
 0x643   :  { %3884 = vpow2.f32 %v3531_v21 }
 0x644   :  { %v2924_v23 = vpop.f32.mrf.mxu3 }
 0x645   :  { %v2925_v17 = vadd.f32 %v2924_v23, %v2912_v44 }
 0x646   :  { %v2900_v43 = vpop.f32.mrf.mxu1 }
 0x647   :  { %v3532_v50 = vmul.f32 -1.442695, %v2925_v17 }
 0x649   :  { %v3885_v38 = vpop.eup %3884  ;;  %3886 = vpow2.f32 %v3532_v50 }
 0x64a   :  { %v2983_v45 = vadd.f32 1.0, %v3885_v38 }
 0x64c   :  { %3888 = vrcp.f32 %v2983_v45  ;;  %v2926_v13 = vpop.f32.mrf.mxu3  ;;  %v2995_v58 = vand.u32 2147483648, %v2983_v45  ;;  %v2993_v61 = vand.u32 2147483647, %v2983_v45  ;;  %vm2989_vm5 = vweird.f32 %v2983_v45 }
 0x64e   :  { %v2950_v62 = vpop.f32.mrf.mxu1  ;;  %v2996_v60 = vor.u32 1.1754944e-38, %v2995_v58  ;;  %vm2994_vm7 = vcmp.eq.f32.partialorder %v2993_v61, 8.507059e+37 }
 0x64f   :  { %v3887_v40 = vpop.eup %3886  ;;  %v2951_v4 = vadd.f32 %v2950_v62, %v2938_v52 }
 0x650   :  { %v3002_v28 = vadd.f32 1.0, %v3887_v40 }
 0x652   :  { %v3889_v56 = vpop.eup %3888  ;;  %3890 = vrcp.f32 %v3002_v28  ;;  %v3014_v15 = vand.u32 2147483648, %v3002_v28  ;;  %v3012_v5 = vand.u32 2147483647, %v3002_v28  ;;  %vm3008_vm9 = vweird.f32 %v3002_v28 }
 0x653   :  { %v2985_v16 = vmul.f32 %v3889_v56, %v2983_v45  ;;  %3892 = vtanh.f32 %v2951_v4  ;;  %vm2990_vm4 = vweird.f32 %v3889_v56 }
 0x654   :  { %v2976_v0 = vpop.f32.mrf.mxu3  ;;  %vm2991_vm6 = vmor %vm2989_vm5, %vm2990_vm4  ;;  %v3015_v19 = vor.u32 1.1754944e-38, %v3014_v15  ;;  %vm3013_vm11 = vcmp.eq.f32.partialorder %v3012_v5, 8.507059e+37 }
 0x655   :  { %v2986_v41 = vsub.f32 1.0, %v2985_v16  ;;  %v2977_v59 = vadd.f32 %v2976_v0, %v2964_v29 }
 0x656   :  { %v2952_v42 = vpop.f32.mrf.mxu1 }
 0x657   :  { %v2987_v35 = vmul.f32 %v3889_v56, %v2986_v41  ;;  %v3533_v12 = vmul.f32 -1.442695, %v2977_v59 }
 0x658   :  { %v3891_v27 = vpop.eup %3890 }
 0x659   :  { %v3004_v32 = vmul.f32 %v3891_v27, %v3002_v28  ;;  %v2988_v37 = vadd.f32 %v3889_v56, %v2987_v35  ;;  %3894 = vpow2.f32 %v3533_v12  ;;  %v3893_v49 = vpop.eup %3892  ;;  %vm3009_vm8 = vweird.f32 %v3891_v27 }
 0x65a   :  { %vm3010_vm10 = vmor %vm3008_vm9, %vm3009_vm8 }
 0x65b   :  { %v3005_v51 = vsub.f32 1.0, %v3004_v32  ;;  %v2992_v1 = vsel %vm2991_vm6, %v3889_v56, %v2988_v37 }
 0x65c   :  { %v2997_v6 = vsel %vm2994_vm7, %v2996_v60, %v2992_v1  ;;  %v2978_v63 = vpop.f32.mrf.mxu3 }
 0x65d   :  { %v3006_v39 = vmul.f32 %v3891_v27, %v3005_v51  ;;  %v3039_v33 = vmul.f32 %v3893_v49, %v2997_v6 }
 0x65f   :  { %v3895_v36 = vpop.eup %3894  ;;  %v3007_v46 = vadd.f32 %v3891_v27, %v3006_v39 }
 0x660   :  { %v3022_v2 = vadd.f32 1.0, %v3895_v36 }
 0x661   :  { %v3011_v7 = vsel %vm3010_vm10, %v3891_v27, %v3007_v46 }
 0x662   :  { %v3016_v53 = vsel %vm3013_vm11, %v3015_v19, %v3011_v7  ;;  %3896 = vrcp.f32 %v3022_v2  ;;  %v3034_v34 = vand.u32 2147483648, %v3022_v2  ;;  %v3032_v18 = vand.u32 2147483647, %v3022_v2 }
 0x663   :  { %v3038_v31 = vmul.f32 %v3016_v53, %v5438_v24  ;;  %vm3028_vm13 = vweird.f32 %v3022_v2  ;;  %v3643_v24 = vld [vmem:[%s5459_s7] ss:$0 sm:$0xff] }
 0x664   :  { %v3035_v23 = vor.u32 1.1754944e-38, %v3034_v34  ;;  %vm3033_vm15 = vcmp.eq.f32.partialorder %v3032_v18, 8.507059e+37 }
 0x665   :  { %v3040_v25 = vadd.f32 %v3039_v33, %v3038_v31 }
 0x667   :  { %3898 = vtanh.f32 %v3040_v25 }
 0x668   :  { %v3897_v26 = vpop.eup %3896 }
 0x669   :  { %v3024_v8 = vmul.f32 %v3897_v26, %v3022_v2  ;;  %vm3029_vm12 = vweird.f32 %v3897_v26 }
 0x66a   :  { %vm3030_vm14 = vmor %vm3028_vm13, %vm3029_vm12 }
 0x66b   :  { %v3025_v30 = vsub.f32 1.0, %v3024_v8 }
 0x66d   :  { %v3026_v21 = vmul.f32 %v3897_v26, %v3025_v30  ;;  %v3899_v17 = vpop.eup %3898 }
 0x66f   :  { %v3027_v44 = vadd.f32 %v3897_v26, %v3026_v21 }
 0x671   :  { %v3031_v14 = vsel %vm3030_vm14, %v3897_v26, %v3027_v44 }
 0x672   :  { %v3036_v43 = vsel %vm3033_vm15, %v3035_v23, %v3031_v14 }
 0x673   :  { %v3042_v47 = vmul.f32 %v3899_v17, %v3036_v43 }
 0x675   :  { %3079 = vmatmul.f32.vlgmr.msrb.gmra.mxu0 %v3042_v47 }
 0x6f2   :  { %v3080_v50 = vpop.f32.mrf.mxu0 }
 0x6f3   :  { %v3081_v22 = vadd.f32 %v3643_v24, %v3080_v50 }
 0x6f5   :  { %3083 = vst [vmem:[#allocation8] sm:$0xff] %v3081_v22 }
 0x6f6   :  { %3094 = dma.vmem_to_hbm [thread:$0]  %s3090_s4, 128, %s3092_s22, [#allocation4]  }
 0x6f7   :  { %4000 = dma.done.wait [#allocation4], 128  }
 0x6f8   :  { %4001 = vsyncadd [#allocation4], 4294967168 }
 0x6f9   :  { %3099 = vsyncpa [#allocation3], 1 }
 0x6fa   :  { %3100 = vsyncpa [#allocation6], 1 }
 0x6fb   :  { %3101 = vsyncpa [#allocation4], 1 }

</bundles_post_ra>
